<compile_context>
chip_gen: v5e
topology: v5e:2x2
jax: 0.10.0
libtpu: 0.0.40
codegen_flags: <defaults>
</compile_context>

<pallas_src>
import jax
import jax.numpy as jnp
from jax.experimental import pallas as pl
from jax.experimental.pallas import tpu as pltpu

# ----- synthetic CLIP-text-encoder config (small shapes) -----
BATCH = 2
SEQ = 8
EMBED = 32
HEADS = 4
HEAD_DIM = EMBED // HEADS
INTER = 4 * EMBED          # 128
LAYERS = 2
VOCAB = 64
EPS = 1e-5
NEG_INF = -1e9


def _layer_norm(x, g, b):
    mu = jnp.mean(x, axis=-1, keepdims=True)
    var = jnp.mean((x - mu) ** 2, axis=-1, keepdims=True)
    return (x - mu) * jax.lax.rsqrt(var + EPS) * g + b


def encoder_kernel(x_ref, mask_ref,
                   ln_g_ref, ln_b_ref,
                   w_qkv_ref, b_qkv_ref,
                   w_o_ref, b_o_ref,
                   w1_ref, b1_ref, w2_ref, b2_ref,
                   o_ref):
    """Fused CLIP text encoder: LAYERS x (attn + MLP) + final LayerNorm.

    x_ref:     (B*S, E) f32 residual stream
    mask_ref:  (B, S)   i32 key-padding mask (1 = keep)
    ln_g/b:    (2*L+1, 1, E) f32     (ln1_l, ln2_l, ..., final)
    w_qkv:     (L, 3, H, E, Dh) bf16 (q-scale folded into the q slice)
    b_qkv:     (L, 3, H, 1, Dh) f32
    w_o:       (L, H, Dh, E) bf16 ; b_o: (L, 1, E) f32
    w1:        (L, E, I) bf16 ; b1: (L, 1, I) f32
    w2:        (L, I, E) bf16 ; b2: (L, 1, E) f32
    """
    x = x_ref[...]                                             # (B*S, E) f32

    # ---- additive attention bias (causal + key padding), built in-kernel ----
    rows = jax.lax.broadcasted_iota(jnp.int32, (SEQ, SEQ), 0)
    cols = jax.lax.broadcasted_iota(jnp.int32, (SEQ, SEQ), 1)
    causal_ok = (cols <= rows)[None, :, :]                     # (1, S, S)
    pad_ok = (mask_ref[...] > 0)[:, None, :]                   # (B, 1, S)
    bias = jnp.where(jnp.logical_and(causal_ok, pad_ok),
                     0.0, NEG_INF).astype(jnp.float32)         # (B, S, S)

    for l in range(LAYERS):
        # ---- self-attention block (pre-LN) ----
        h = _layer_norm(x, ln_g_ref[2 * l], ln_b_ref[2 * l])
        h_bf = h.astype(jnp.bfloat16)

        attn = jnp.zeros((BATCH * SEQ, EMBED), jnp.float32)
        for hd in range(HEADS):                                # static, HEADS=4
            q = jnp.dot(h_bf, w_qkv_ref[l, 0, hd],
                        preferred_element_type=jnp.float32) + b_qkv_ref[l, 0, hd]
            k = jnp.dot(h_bf, w_qkv_ref[l, 1, hd],
                        preferred_element_type=jnp.float32) + b_qkv_ref[l, 1, hd]
            v = jnp.dot(h_bf, w_qkv_ref[l, 2, hd],
                        preferred_element_type=jnp.float32) + b_qkv_ref[l, 2, hd]

            q3 = q.reshape(BATCH, SEQ, HEAD_DIM)               # leading-dim split only
            k3 = k.reshape(BATCH, SEQ, HEAD_DIM)
            v3 = v.reshape(BATCH, SEQ, HEAD_DIM)

            s = jnp.einsum('bqd,bkd->bqk', q3, k3,
                           preferred_element_type=jnp.float32) + bias
            s = s - jnp.max(s, axis=-1, keepdims=True)
            p = jnp.exp(s)
            p = p * pl.reciprocal(jnp.sum(p, axis=-1, keepdims=True), approx=True)

            ctx = jnp.einsum('bqk,bkd->bqd',
                             p.astype(jnp.bfloat16), v3.astype(jnp.bfloat16),
                             preferred_element_type=jnp.float32)
            ctx2 = ctx.reshape(BATCH * SEQ, HEAD_DIM).astype(jnp.bfloat16)
            # accumulate through the output projection: sum_h ctx_h @ Wo_h
            attn = attn + jnp.dot(ctx2, w_o_ref[l, hd],
                                  preferred_element_type=jnp.float32)

        x = x + attn + b_o_ref[l]

        # ---- MLP block (pre-LN, quick_gelu) ----
        h = _layer_norm(x, ln_g_ref[2 * l + 1], ln_b_ref[2 * l + 1])
        h1 = jnp.dot(h.astype(jnp.bfloat16), w1_ref[l],
                     preferred_element_type=jnp.float32) + b1_ref[l]
        h1 = h1 * jax.nn.sigmoid(1.702 * h1)                   # quick_gelu
        h2 = jnp.dot(h1.astype(jnp.bfloat16), w2_ref[l],
                     preferred_element_type=jnp.float32) + b2_ref[l]
        x = x + h2

    # ---- final LayerNorm ----
    o_ref[...] = _layer_norm(x, ln_g_ref[2 * LAYERS], ln_b_ref[2 * LAYERS])


def run_encoder(x2d, mask, packed):
    vmem = pltpu.MemorySpace.VMEM
    return pl.pallas_call(
        encoder_kernel,
        out_shape=jax.ShapeDtypeStruct((BATCH * SEQ, EMBED), jnp.float32),
        in_specs=[pl.BlockSpec(memory_space=vmem)] * (2 + len(packed)),
        out_specs=pl.BlockSpec(memory_space=vmem),
    )(x2d, mask, *packed)


def init_params(seed=0):
    key = jax.random.PRNGKey(seed)

    def nrm(k, shape, scale):
        return (scale * jax.random.normal(k, shape)).astype(jnp.float32)

    keys = jax.random.split(key, 2 + LAYERS * 6)
    token_emb = nrm(keys[0], (VOCAB, EMBED), 0.02)
    pos_emb = nrm(keys[1], (SEQ, EMBED), 0.01)

    zeros_e = jnp.zeros((1, EMBED), jnp.float32)
    ones_e = jnp.ones((1, EMBED), jnp.float32)
    zeros_i = jnp.zeros((1, INTER), jnp.float32)

    layers = []
    ki = 2
    for _ in range(LAYERS):
        wq = nrm(keys[ki + 0], (EMBED, EMBED), EMBED ** -0.5)
        wk = nrm(keys[ki + 1], (EMBED, EMBED), EMBED ** -0.5)
        wv = nrm(keys[ki + 2], (EMBED, EMBED), EMBED ** -0.5)
        wo = nrm(keys[ki + 3], (EMBED, EMBED), EMBED ** -0.5)
        w1 = nrm(keys[ki + 4], (EMBED, INTER), EMBED ** -0.5)
        w2 = nrm(keys[ki + 5], (INTER, EMBED), INTER ** -0.5)
        ki += 6
        layers.append((
            ones_e, zeros_e,                              # ln1 gamma / beta
            wq, zeros_e, wk, zeros_e, wv, zeros_e,        # q, k, v proj (+bias)
            wo, zeros_e,                                  # out proj (+bias)
            ones_e, zeros_e,                              # ln2 gamma / beta
            w1, zeros_i, w2, zeros_e,                     # mlp fc1 / fc2 (+bias)
        ))
    return {"token_emb": token_emb, "pos_emb": pos_emb, "layers": layers,
            "final_g": ones_e, "final_b": zeros_e}


def pack_params(params):
    """Stack per-layer params, pre-split heads, fold q scale, cast weights bf16."""
    scale = HEAD_DIM ** -0.5

    def heads_in(w):    # (E, E) -> (H, E, Dh)
        return w.reshape(EMBED, HEADS, HEAD_DIM).transpose(1, 0, 2)

    def heads_b(b):     # (1, E) -> (H, 1, Dh)
        return b.reshape(HEADS, 1, HEAD_DIM)

    ln_g, ln_b = [], []
    w_qkv, b_qkv, w_o, b_o = [], [], [], []
    w_1, b_1, w_2, b_2 = [], [], [], []
    for (l1g, l1b, wq, bq, wk, bk, wv, bv, wo, bo,
         l2g, l2b, w1, b1, w2, b2) in params["layers"]:
        ln_g += [l1g, l2g]
        ln_b += [l1b, l2b]
        w_qkv.append(jnp.stack([heads_in(wq) * scale, heads_in(wk), heads_in(wv)]))
        b_qkv.append(jnp.stack([heads_b(bq) * scale, heads_b(bk), heads_b(bv)]))
        w_o.append(wo.reshape(HEADS, HEAD_DIM, EMBED))
        b_o.append(bo)
        w_1.append(w1)
        b_1.append(b1)
        w_2.append(w2)
        b_2.append(b2)
    ln_g.append(params["final_g"])
    ln_b.append(params["final_b"])

    return (
        jnp.stack(ln_g),                           # (2L+1, 1, E)     f32
        jnp.stack(ln_b),                           # (2L+1, 1, E)     f32
        jnp.stack(w_qkv).astype(jnp.bfloat16),     # (L, 3, H, E, Dh) bf16
        jnp.stack(b_qkv),                          # (L, 3, H, 1, Dh) f32
        jnp.stack(w_o).astype(jnp.bfloat16),       # (L, H, Dh, E)    bf16
        jnp.stack(b_o),                            # (L, 1, E)        f32
        jnp.stack(w_1).astype(jnp.bfloat16),       # (L, E, I)        bf16
        jnp.stack(b_1),                            # (L, 1, I)        f32
        jnp.stack(w_2).astype(jnp.bfloat16),       # (L, I, E)        bf16
        jnp.stack(b_2),                            # (L, 1, E)        f32
    )


def clip_text_encoder(input_ids, attention_mask, params, packed=None):
    if packed is None:
        packed = pack_params(params)

    # embedding gather + position add (glue)
    tok = jnp.take(params["token_emb"], input_ids, axis=0)       # (B, S, E)
    x = (tok + params["pos_emb"][None, :, :]).astype(jnp.float32)
    x2d = x.reshape(BATCH * SEQ, EMBED)

    out2d = run_encoder(x2d, attention_mask.astype(jnp.int32), packed)
    last_hidden = out2d.reshape(BATCH, SEQ, EMBED)

    # pooler_output: hidden state at EOS position (argmax of input_ids), glue
    eos_idx = jnp.argmax(input_ids, axis=-1)
    pooled = last_hidden[jnp.arange(BATCH), eos_idx]             # (B, E)
    # TODO(synk): output_attentions / output_hidden_states / position_ids and
    # eos_token_id-based pooling of newer HF CLIP checkpoints are not modeled;
    # this returns the (last_hidden_state, pooler_output) pair of return_dict=True.
    return last_hidden, pooled


if __name__ == "__main__":
    key = jax.random.PRNGKey(0)
    input_ids = jax.random.randint(key, (BATCH, SEQ), 0, VOCAB, dtype=jnp.int32)
    attention_mask = jnp.ones((BATCH, SEQ), jnp.int32)
    params = init_params(0)

    last_hidden, pooled = clip_text_encoder(input_ids, attention_mask, params)
    jax.block_until_ready((last_hidden, pooled))

    assert last_hidden.shape == (BATCH, SEQ, EMBED)
    assert pooled.shape == (BATCH, EMBED)
    print("KERNEL_OK")
</pallas_src>

<mosaic_0001>
module attributes {stable_mosaic.version = 11 : i64} {
  func.func @encoder_kernel(%arg0: memref<16x32xf32, #tpu.memory_space<vmem>>, %arg1: memref<2x8xi32, #tpu.memory_space<vmem>>, %arg2: memref<5x1x32xf32, #tpu.memory_space<vmem>>, %arg3: memref<5x1x32xf32, #tpu.memory_space<vmem>>, %arg4: memref<2x3x4x32x8xbf16, #tpu.memory_space<vmem>>, %arg5: memref<2x3x4x1x8xf32, #tpu.memory_space<vmem>>, %arg6: memref<2x4x8x32xbf16, #tpu.memory_space<vmem>>, %arg7: memref<2x1x32xf32, #tpu.memory_space<vmem>>, %arg8: memref<2x32x128xbf16, #tpu.memory_space<vmem>>, %arg9: memref<2x1x128xf32, #tpu.memory_space<vmem>>, %arg10: memref<2x128x32xbf16, #tpu.memory_space<vmem>>, %arg11: memref<2x1x32xf32, #tpu.memory_space<vmem>>, %arg12: memref<16x32xf32, #tpu.memory_space<vmem>>) attributes {dimension_semantics = [], scalar_prefetch = 0 : i64, scratch_operands = 0 : i64, tpu.core_type = #tpu.core_type<tc>} {
    %c0 = arith.constant 0 : index
    %c0_0 = arith.constant 0 : index
    %0 = vector.load %arg0[%c0, %c0_0] : memref<16x32xf32, #tpu.memory_space<vmem>>, vector<16x32xf32>
    %1 = tpu.iota {dimensions = array<i32: 0>} : vector<8x8xi32>
    %2 = tpu.iota {dimensions = array<i32: 1>} : vector<8x8xi32>
    %3 = arith.cmpi sle, %2, %1 : vector<8x8xi32>
    %4 = vector.shape_cast %3 : vector<8x8xi1> to vector<1x8x8xi1>
    %c0_1 = arith.constant 0 : index
    %c0_2 = arith.constant 0 : index
    %5 = vector.load %arg1[%c0_1, %c0_2] : memref<2x8xi32, #tpu.memory_space<vmem>>, vector<2x8xi32>
    %c0_i32 = arith.constant 0 : i32
    %6 = vector.broadcast %c0_i32 : i32 to vector<2x8xi32>
    %7 = arith.cmpi sgt, %5, %6 : vector<2x8xi32>
    %8 = vector.shape_cast %7 : vector<2x8xi1> to vector<2x1x8xi1>
    %9 = vector.broadcast %4 : vector<1x8x8xi1> to vector<2x8x8xi1>
    %10 = vector.broadcast %8 : vector<2x1x8xi1> to vector<2x8x8xi1>
    %11 = arith.andi %9, %10 : vector<2x8x8xi1>
    %cst = arith.constant 0.000000e+00 : f32
    %cst_3 = arith.constant -1.000000e+09 : f32
    %12 = vector.broadcast %cst : f32 to vector<2x8x8xf32>
    %13 = vector.broadcast %cst_3 : f32 to vector<2x8x8xf32>
    %14 = arith.select %11, %12, %13 : vector<2x8x8xi1>, vector<2x8x8xf32>
    %c0_4 = arith.constant 0 : index
    %c0_5 = arith.constant 0 : index
    %c0_6 = arith.constant 0 : index
    %15 = vector.load %arg2[%c0_4, %c0_5, %c0_6] : memref<5x1x32xf32, #tpu.memory_space<vmem>>, vector<1x1x32xf32>
    %16 = vector.shape_cast %15 : vector<1x1x32xf32> to vector<1x32xf32>
    %c0_7 = arith.constant 0 : index
    %c0_8 = arith.constant 0 : index
    %c0_9 = arith.constant 0 : index
    %17 = vector.load %arg3[%c0_7, %c0_8, %c0_9] : memref<5x1x32xf32, #tpu.memory_space<vmem>>, vector<1x1x32xf32>
    %18 = vector.shape_cast %17 : vector<1x1x32xf32> to vector<1x32xf32>
    %cst_10 = arith.constant dense<0.000000e+00> : vector<16xf32>
    %19 = vector.multi_reduction <add>, %0, %cst_10 [1] : vector<16x32xf32> to vector<16xf32>
    %20 = vector.shape_cast %19 : vector<16xf32> to vector<16x1xf32>
    %cst_11 = arith.constant 3.200000e+01 : f32
    %21 = vector.broadcast %cst_11 : f32 to vector<16x1xf32>
    %22 = arith.divf %20, %21 : vector<16x1xf32>
    %23 = vector.broadcast %22 : vector<16x1xf32> to vector<16x32xf32>
    %24 = arith.subf %0, %23 : vector<16x32xf32>
    %25 = arith.mulf %24, %24 : vector<16x32xf32>
    %cst_12 = arith.constant dense<0.000000e+00> : vector<16xf32>
    %26 = vector.multi_reduction <add>, %25, %cst_12 [1] : vector<16x32xf32> to vector<16xf32>
    %27 = vector.shape_cast %26 : vector<16xf32> to vector<16x1xf32>
    %cst_13 = arith.constant 3.200000e+01 : f32
    %28 = vector.broadcast %cst_13 : f32 to vector<16x1xf32>
    %29 = arith.divf %27, %28 : vector<16x1xf32>
    %30 = vector.broadcast %22 : vector<16x1xf32> to vector<16x32xf32>
    %31 = arith.subf %0, %30 : vector<16x32xf32>
    %cst_14 = arith.constant 9.99999974E-6 : f32
    %32 = vector.broadcast %cst_14 : f32 to vector<16x1xf32>
    %33 = arith.addf %29, %32 : vector<16x1xf32>
    %34 = math.rsqrt %33 : vector<16x1xf32>
    %35 = vector.broadcast %34 : vector<16x1xf32> to vector<16x32xf32>
    %36 = arith.mulf %31, %35 : vector<16x32xf32>
    %37 = vector.broadcast %16 : vector<1x32xf32> to vector<16x32xf32>
    %38 = arith.mulf %36, %37 : vector<16x32xf32>
    %39 = vector.broadcast %18 : vector<1x32xf32> to vector<16x32xf32>
    %40 = arith.addf %38, %39 : vector<16x32xf32>
    %41 = arith.truncf %40 : vector<16x32xf32> to vector<16x32xbf16>
    %cst_15 = arith.constant 0.000000e+00 : f32
    %42 = vector.broadcast %cst_15 : f32 to vector<16x32xf32>
    %c0_16 = arith.constant 0 : index
    %c0_17 = arith.constant 0 : index
    %c0_18 = arith.constant 0 : index
    %c0_19 = arith.constant 0 : index
    %c0_20 = arith.constant 0 : index
    %43 = vector.load %arg4[%c0_16, %c0_17, %c0_18, %c0_19, %c0_20] : memref<2x3x4x32x8xbf16, #tpu.memory_space<vmem>>, vector<1x1x1x32x8xbf16>
    %44 = vector.shape_cast %43 : vector<1x1x1x32x8xbf16> to vector<32x8xbf16>
    %cst_21 = arith.constant dense<0.000000e+00> : vector<16x8xf32>
    %45 = tpu.matmul %41, %44, %cst_21 {dimension_numbers = #tpu.dot_dimension_numbers<[1], [0], [0], [1], [0, 0, 1, 1], [], []>} : vector<16x32xbf16>, vector<32x8xbf16>, vector<16x8xf32> -> vector<16x8xf32>
    %c0_22 = arith.constant 0 : index
    %c0_23 = arith.constant 0 : index
    %c0_24 = arith.constant 0 : index
    %c0_25 = arith.constant 0 : index
    %c0_26 = arith.constant 0 : index
    %46 = vector.load %arg5[%c0_22, %c0_23, %c0_24, %c0_25, %c0_26] : memref<2x3x4x1x8xf32, #tpu.memory_space<vmem>>, vector<1x1x1x1x8xf32>
    %47 = vector.shape_cast %46 : vector<1x1x1x1x8xf32> to vector<1x8xf32>
    %48 = vector.broadcast %47 : vector<1x8xf32> to vector<16x8xf32>
    %49 = arith.addf %45, %48 : vector<16x8xf32>
    %c0_27 = arith.constant 0 : index
    %c1 = arith.constant 1 : index
    %c0_28 = arith.constant 0 : index
    %c0_29 = arith.constant 0 : index
    %c0_30 = arith.constant 0 : index
    %50 = vector.load %arg4[%c0_27, %c1, %c0_28, %c0_29, %c0_30] : memref<2x3x4x32x8xbf16, #tpu.memory_space<vmem>>, vector<1x1x1x32x8xbf16>
    %51 = vector.shape_cast %50 : vector<1x1x1x32x8xbf16> to vector<32x8xbf16>
    %cst_31 = arith.constant dense<0.000000e+00> : vector<16x8xf32>
    %52 = tpu.matmul %41, %51, %cst_31 {dimension_numbers = #tpu.dot_dimension_numbers<[1], [0], [0], [1], [0, 0, 1, 1], [], []>} : vector<16x32xbf16>, vector<32x8xbf16>, vector<16x8xf32> -> vector<16x8xf32>
    %c0_32 = arith.constant 0 : index
    %c1_33 = arith.constant 1 : index
    %c0_34 = arith.constant 0 : index
    %c0_35 = arith.constant 0 : index
    %c0_36 = arith.constant 0 : index
    %53 = vector.load %arg5[%c0_32, %c1_33, %c0_34, %c0_35, %c0_36] : memref<2x3x4x1x8xf32, #tpu.memory_space<vmem>>, vector<1x1x1x1x8xf32>
    %54 = vector.shape_cast %53 : vector<1x1x1x1x8xf32> to vector<1x8xf32>
    %55 = vector.broadcast %54 : vector<1x8xf32> to vector<16x8xf32>
    %56 = arith.addf %52, %55 : vector<16x8xf32>
    %c0_37 = arith.constant 0 : index
    %c2 = arith.constant 2 : index
    %c0_38 = arith.constant 0 : index
    %c0_39 = arith.constant 0 : index
    %c0_40 = arith.constant 0 : index
    %57 = vector.load %arg4[%c0_37, %c2, %c0_38, %c0_39, %c0_40] : memref<2x3x4x32x8xbf16, #tpu.memory_space<vmem>>, vector<1x1x1x32x8xbf16>
    %58 = vector.shape_cast %57 : vector<1x1x1x32x8xbf16> to vector<32x8xbf16>
    %cst_41 = arith.constant dense<0.000000e+00> : vector<16x8xf32>
    %59 = tpu.matmul %41, %58, %cst_41 {dimension_numbers = #tpu.dot_dimension_numbers<[1], [0], [0], [1], [0, 0, 1, 1], [], []>} : vector<16x32xbf16>, vector<32x8xbf16>, vector<16x8xf32> -> vector<16x8xf32>
    %c0_42 = arith.constant 0 : index
    %c2_43 = arith.constant 2 : index
    %c0_44 = arith.constant 0 : index
    %c0_45 = arith.constant 0 : index
    %c0_46 = arith.constant 0 : index
    %60 = vector.load %arg5[%c0_42, %c2_43, %c0_44, %c0_45, %c0_46] : memref<2x3x4x1x8xf32, #tpu.memory_space<vmem>>, vector<1x1x1x1x8xf32>
    %61 = vector.shape_cast %60 : vector<1x1x1x1x8xf32> to vector<1x8xf32>
    %62 = vector.broadcast %61 : vector<1x8xf32> to vector<16x8xf32>
    %63 = arith.addf %59, %62 : vector<16x8xf32>
    %64 = vector.shape_cast %49 : vector<16x8xf32> to vector<2x8x8xf32>
    %65 = vector.shape_cast %56 : vector<16x8xf32> to vector<2x8x8xf32>
    %66 = vector.shape_cast %63 : vector<16x8xf32> to vector<2x8x8xf32>
    "tpu.trace_start"() <{level = 10 : i32, message = "bqd,bkd->bqk"}> : () -> ()
    %cst_47 = arith.constant dense<0.000000e+00> : vector<2x8x8xf32>
    %67 = tpu.matmul %64, %65, %cst_47 {dimension_numbers = #tpu.dot_dimension_numbers<[2], [2], [1], [1], [0, 0, 0, 1, 1, 1], [0], [0]>} : vector<2x8x8xf32>, vector<2x8x8xf32>, vector<2x8x8xf32> -> vector<2x8x8xf32>
    "tpu.trace_stop"() : () -> ()
    %68 = arith.addf %67, %14 : vector<2x8x8xf32>
    %cst_48 = arith.constant dense<0xFF800000> : vector<2x8xf32>
    %69 = vector.multi_reduction <maximumf>, %68, %cst_48 [2] : vector<2x8x8xf32> to vector<2x8xf32>
    %70 = vector.shape_cast %69 : vector<2x8xf32> to vector<2x8x1xf32>
    %71 = vector.broadcast %70 : vector<2x8x1xf32> to vector<2x8x8xf32>
    %72 = arith.subf %68, %71 : vector<2x8x8xf32>
    %73 = math.exp %72 : vector<2x8x8xf32>
    %cst_49 = arith.constant dense<0.000000e+00> : vector<2x8xf32>
    %74 = vector.multi_reduction <add>, %73, %cst_49 [2] : vector<2x8x8xf32> to vector<2x8xf32>
    %75 = vector.shape_cast %74 : vector<2x8xf32> to vector<2x8x1xf32>
    %76 = tpu.reciprocal %75 {approx = true} : vector<2x8x1xf32> -> vector<2x8x1xf32>
    %77 = vector.broadcast %76 : vector<2x8x1xf32> to vector<2x8x8xf32>
    %78 = arith.mulf %73, %77 : vector<2x8x8xf32>
    %79 = arith.truncf %78 : vector<2x8x8xf32> to vector<2x8x8xbf16>
    %80 = arith.truncf %66 : vector<2x8x8xf32> to vector<2x8x8xbf16>
    "tpu.trace_start"() <{level = 10 : i32, message = "bqk,bkd->bqd"}> : () -> ()
    %cst_50 = arith.constant dense<0.000000e+00> : vector<2x8x8xf32>
    %81 = tpu.matmul %79, %80, %cst_50 {dimension_numbers = #tpu.dot_dimension_numbers<[2], [1], [1], [2], [0, 0, 0, 1, 1, 2], [0], [0]>} : vector<2x8x8xbf16>, vector<2x8x8xbf16>, vector<2x8x8xf32> -> vector<2x8x8xf32>
    "tpu.trace_stop"() : () -> ()
    %82 = vector.shape_cast %81 : vector<2x8x8xf32> to vector<16x8xf32>
    %83 = arith.truncf %82 : vector<16x8xf32> to vector<16x8xbf16>
    %c0_51 = arith.constant 0 : index
    %c0_52 = arith.constant 0 : index
    %c0_53 = arith.constant 0 : index
    %c0_54 = arith.constant 0 : index
    %84 = vector.load %arg6[%c0_51, %c0_52, %c0_53, %c0_54] : memref<2x4x8x32xbf16, #tpu.memory_space<vmem>>, vector<1x1x8x32xbf16>
    %85 = vector.shape_cast %84 : vector<1x1x8x32xbf16> to vector<8x32xbf16>
    %cst_55 = arith.constant dense<0.000000e+00> : vector<16x32xf32>
    %86 = tpu.matmul %83, %85, %cst_55 {dimension_numbers = #tpu.dot_dimension_numbers<[1], [0], [0], [1], [0, 0, 1, 1], [], []>} : vector<16x8xbf16>, vector<8x32xbf16>, vector<16x32xf32> -> vector<16x32xf32>
    %87 = arith.addf %42, %86 : vector<16x32xf32>
    %c0_56 = arith.constant 0 : index
    %c0_57 = arith.constant 0 : index
    %c1_58 = arith.constant 1 : index
    %c0_59 = arith.constant 0 : index
    %c0_60 = arith.constant 0 : index
    %88 = vector.load %arg4[%c0_56, %c0_57, %c1_58, %c0_59, %c0_60] : memref<2x3x4x32x8xbf16, #tpu.memory_space<vmem>>, vector<1x1x1x32x8xbf16>
    %89 = vector.shape_cast %88 : vector<1x1x1x32x8xbf16> to vector<32x8xbf16>
    %cst_61 = arith.constant dense<0.000000e+00> : vector<16x8xf32>
    %90 = tpu.matmul %41, %89, %cst_61 {dimension_numbers = #tpu.dot_dimension_numbers<[1], [0], [0], [1], [0, 0, 1, 1], [], []>} : vector<16x32xbf16>, vector<32x8xbf16>, vector<16x8xf32> -> vector<16x8xf32>
    %c0_62 = arith.constant 0 : index
    %c0_63 = arith.constant 0 : index
    %c1_64 = arith.constant 1 : index
    %c0_65 = arith.constant 0 : index
    %c0_66 = arith.constant 0 : index
    %91 = vector.load %arg5[%c0_62, %c0_63, %c1_64, %c0_65, %c0_66] : memref<2x3x4x1x8xf32, #tpu.memory_space<vmem>>, vector<1x1x1x1x8xf32>
    %92 = vector.shape_cast %91 : vector<1x1x1x1x8xf32> to vector<1x8xf32>
    %93 = vector.broadcast %92 : vector<1x8xf32> to vector<16x8xf32>
    %94 = arith.addf %90, %93 : vector<16x8xf32>
    %c0_67 = arith.constant 0 : index
    %c1_68 = arith.constant 1 : index
    %c1_69 = arith.constant 1 : index
    %c0_70 = arith.constant 0 : index
    %c0_71 = arith.constant 0 : index
    %95 = vector.load %arg4[%c0_67, %c1_68, %c1_69, %c0_70, %c0_71] : memref<2x3x4x32x8xbf16, #tpu.memory_space<vmem>>, vector<1x1x1x32x8xbf16>
    %96 = vector.shape_cast %95 : vector<1x1x1x32x8xbf16> to vector<32x8xbf16>
    %cst_72 = arith.constant dense<0.000000e+00> : vector<16x8xf32>
    %97 = tpu.matmul %41, %96, %cst_72 {dimension_numbers = #tpu.dot_dimension_numbers<[1], [0], [0], [1], [0, 0, 1, 1], [], []>} : vector<16x32xbf16>, vector<32x8xbf16>, vector<16x8xf32> -> vector<16x8xf32>
    %c0_73 = arith.constant 0 : index
    %c1_74 = arith.constant 1 : index
    %c1_75 = arith.constant 1 : index
    %c0_76 = arith.constant 0 : index
    %c0_77 = arith.constant 0 : index
    %98 = vector.load %arg5[%c0_73, %c1_74, %c1_75, %c0_76, %c0_77] : memref<2x3x4x1x8xf32, #tpu.memory_space<vmem>>, vector<1x1x1x1x8xf32>
    %99 = vector.shape_cast %98 : vector<1x1x1x1x8xf32> to vector<1x8xf32>
    %100 = vector.broadcast %99 : vector<1x8xf32> to vector<16x8xf32>
    %101 = arith.addf %97, %100 : vector<16x8xf32>
    %c0_78 = arith.constant 0 : index
    %c2_79 = arith.constant 2 : index
    %c1_80 = arith.constant 1 : index
    %c0_81 = arith.constant 0 : index
    %c0_82 = arith.constant 0 : index
    %102 = vector.load %arg4[%c0_78, %c2_79, %c1_80, %c0_81, %c0_82] : memref<2x3x4x32x8xbf16, #tpu.memory_space<vmem>>, vector<1x1x1x32x8xbf16>
    %103 = vector.shape_cast %102 : vector<1x1x1x32x8xbf16> to vector<32x8xbf16>
    %cst_83 = arith.constant dense<0.000000e+00> : vector<16x8xf32>
    %104 = tpu.matmul %41, %103, %cst_83 {dimension_numbers = #tpu.dot_dimension_numbers<[1], [0], [0], [1], [0, 0, 1, 1], [], []>} : vector<16x32xbf16>, vector<32x8xbf16>, vector<16x8xf32> -> vector<16x8xf32>
    %c0_84 = arith.constant 0 : index
    %c2_85 = arith.constant 2 : index
    %c1_86 = arith.constant 1 : index
    %c0_87 = arith.constant 0 : index
    %c0_88 = arith.constant 0 : index
    %105 = vector.load %arg5[%c0_84, %c2_85, %c1_86, %c0_87, %c0_88] : memref<2x3x4x1x8xf32, #tpu.memory_space<vmem>>, vector<1x1x1x1x8xf32>
    %106 = vector.shape_cast %105 : vector<1x1x1x1x8xf32> to vector<1x8xf32>
    %107 = vector.broadcast %106 : vector<1x8xf32> to vector<16x8xf32>
    %108 = arith.addf %104, %107 : vector<16x8xf32>
    %109 = vector.shape_cast %94 : vector<16x8xf32> to vector<2x8x8xf32>
    %110 = vector.shape_cast %101 : vector<16x8xf32> to vector<2x8x8xf32>
    %111 = vector.shape_cast %108 : vector<16x8xf32> to vector<2x8x8xf32>
    "tpu.trace_start"() <{level = 10 : i32, message = "bqd,bkd->bqk"}> : () -> ()
    %cst_89 = arith.constant dense<0.000000e+00> : vector<2x8x8xf32>
    %112 = tpu.matmul %109, %110, %cst_89 {dimension_numbers = #tpu.dot_dimension_numbers<[2], [2], [1], [1], [0, 0, 0, 1, 1, 1], [0], [0]>} : vector<2x8x8xf32>, vector<2x8x8xf32>, vector<2x8x8xf32> -> vector<2x8x8xf32>
    "tpu.trace_stop"() : () -> ()
    %113 = arith.addf %112, %14 : vector<2x8x8xf32>
    %cst_90 = arith.constant dense<0xFF800000> : vector<2x8xf32>
    %114 = vector.multi_reduction <maximumf>, %113, %cst_90 [2] : vector<2x8x8xf32> to vector<2x8xf32>
    %115 = vector.shape_cast %114 : vector<2x8xf32> to vector<2x8x1xf32>
    %116 = vector.broadcast %115 : vector<2x8x1xf32> to vector<2x8x8xf32>
    %117 = arith.subf %113, %116 : vector<2x8x8xf32>
    %118 = math.exp %117 : vector<2x8x8xf32>
    %cst_91 = arith.constant dense<0.000000e+00> : vector<2x8xf32>
    %119 = vector.multi_reduction <add>, %118, %cst_91 [2] : vector<2x8x8xf32> to vector<2x8xf32>
    %120 = vector.shape_cast %119 : vector<2x8xf32> to vector<2x8x1xf32>
    %121 = tpu.reciprocal %120 {approx = true} : vector<2x8x1xf32> -> vector<2x8x1xf32>
    %122 = vector.broadcast %121 : vector<2x8x1xf32> to vector<2x8x8xf32>
    %123 = arith.mulf %118, %122 : vector<2x8x8xf32>
    %124 = arith.truncf %123 : vector<2x8x8xf32> to vector<2x8x8xbf16>
    %125 = arith.truncf %111 : vector<2x8x8xf32> to vector<2x8x8xbf16>
    "tpu.trace_start"() <{level = 10 : i32, message = "bqk,bkd->bqd"}> : () -> ()
    %cst_92 = arith.constant dense<0.000000e+00> : vector<2x8x8xf32>
    %126 = tpu.matmul %124, %125, %cst_92 {dimension_numbers = #tpu.dot_dimension_numbers<[2], [1], [1], [2], [0, 0, 0, 1, 1, 2], [0], [0]>} : vector<2x8x8xbf16>, vector<2x8x8xbf16>, vector<2x8x8xf32> -> vector<2x8x8xf32>
    "tpu.trace_stop"() : () -> ()
    %127 = vector.shape_cast %126 : vector<2x8x8xf32> to vector<16x8xf32>
    %128 = arith.truncf %127 : vector<16x8xf32> to vector<16x8xbf16>
    %c0_93 = arith.constant 0 : index
    %c1_94 = arith.constant 1 : index
    %c0_95 = arith.constant 0 : index
    %c0_96 = arith.constant 0 : index
    %129 = vector.load %arg6[%c0_93, %c1_94, %c0_95, %c0_96] : memref<2x4x8x32xbf16, #tpu.memory_space<vmem>>, vector<1x1x8x32xbf16>
    %130 = vector.shape_cast %129 : vector<1x1x8x32xbf16> to vector<8x32xbf16>
    %cst_97 = arith.constant dense<0.000000e+00> : vector<16x32xf32>
    %131 = tpu.matmul %128, %130, %cst_97 {dimension_numbers = #tpu.dot_dimension_numbers<[1], [0], [0], [1], [0, 0, 1, 1], [], []>} : vector<16x8xbf16>, vector<8x32xbf16>, vector<16x32xf32> -> vector<16x32xf32>
    %132 = arith.addf %87, %131 : vector<16x32xf32>
    %c0_98 = arith.constant 0 : index
    %c0_99 = arith.constant 0 : index
    %c2_100 = arith.constant 2 : index
    %c0_101 = arith.constant 0 : index
    %c0_102 = arith.constant 0 : index
    %133 = vector.load %arg4[%c0_98, %c0_99, %c2_100, %c0_101, %c0_102] : memref<2x3x4x32x8xbf16, #tpu.memory_space<vmem>>, vector<1x1x1x32x8xbf16>
    %134 = vector.shape_cast %133 : vector<1x1x1x32x8xbf16> to vector<32x8xbf16>
    %cst_103 = arith.constant dense<0.000000e+00> : vector<16x8xf32>
    %135 = tpu.matmul %41, %134, %cst_103 {dimension_numbers = #tpu.dot_dimension_numbers<[1], [0], [0], [1], [0, 0, 1, 1], [], []>} : vector<16x32xbf16>, vector<32x8xbf16>, vector<16x8xf32> -> vector<16x8xf32>
    %c0_104 = arith.constant 0 : index
    %c0_105 = arith.constant 0 : index
    %c2_106 = arith.constant 2 : index
    %c0_107 = arith.constant 0 : index
    %c0_108 = arith.constant 0 : index
    %136 = vector.load %arg5[%c0_104, %c0_105, %c2_106, %c0_107, %c0_108] : memref<2x3x4x1x8xf32, #tpu.memory_space<vmem>>, vector<1x1x1x1x8xf32>
    %137 = vector.shape_cast %136 : vector<1x1x1x1x8xf32> to vector<1x8xf32>
    %138 = vector.broadcast %137 : vector<1x8xf32> to vector<16x8xf32>
    %139 = arith.addf %135, %138 : vector<16x8xf32>
    %c0_109 = arith.constant 0 : index
    %c1_110 = arith.constant 1 : index
    %c2_111 = arith.constant 2 : index
    %c0_112 = arith.constant 0 : index
    %c0_113 = arith.constant 0 : index
    %140 = vector.load %arg4[%c0_109, %c1_110, %c2_111, %c0_112, %c0_113] : memref<2x3x4x32x8xbf16, #tpu.memory_space<vmem>>, vector<1x1x1x32x8xbf16>
    %141 = vector.shape_cast %140 : vector<1x1x1x32x8xbf16> to vector<32x8xbf16>
    %cst_114 = arith.constant dense<0.000000e+00> : vector<16x8xf32>
    %142 = tpu.matmul %41, %141, %cst_114 {dimension_numbers = #tpu.dot_dimension_numbers<[1], [0], [0], [1], [0, 0, 1, 1], [], []>} : vector<16x32xbf16>, vector<32x8xbf16>, vector<16x8xf32> -> vector<16x8xf32>
    %c0_115 = arith.constant 0 : index
    %c1_116 = arith.constant 1 : index
    %c2_117 = arith.constant 2 : index
    %c0_118 = arith.constant 0 : index
    %c0_119 = arith.constant 0 : index
    %143 = vector.load %arg5[%c0_115, %c1_116, %c2_117, %c0_118, %c0_119] : memref<2x3x4x1x8xf32, #tpu.memory_space<vmem>>, vector<1x1x1x1x8xf32>
    %144 = vector.shape_cast %143 : vector<1x1x1x1x8xf32> to vector<1x8xf32>
    %145 = vector.broadcast %144 : vector<1x8xf32> to vector<16x8xf32>
    %146 = arith.addf %142, %145 : vector<16x8xf32>
    %c0_120 = arith.constant 0 : index
    %c2_121 = arith.constant 2 : index
    %c2_122 = arith.constant 2 : index
    %c0_123 = arith.constant 0 : index
    %c0_124 = arith.constant 0 : index
    %147 = vector.load %arg4[%c0_120, %c2_121, %c2_122, %c0_123, %c0_124] : memref<2x3x4x32x8xbf16, #tpu.memory_space<vmem>>, vector<1x1x1x32x8xbf16>
    %148 = vector.shape_cast %147 : vector<1x1x1x32x8xbf16> to vector<32x8xbf16>
    %cst_125 = arith.constant dense<0.000000e+00> : vector<16x8xf32>
    %149 = tpu.matmul %41, %148, %cst_125 {dimension_numbers = #tpu.dot_dimension_numbers<[1], [0], [0], [1], [0, 0, 1, 1], [], []>} : vector<16x32xbf16>, vector<32x8xbf16>, vector<16x8xf32> -> vector<16x8xf32>
    %c0_126 = arith.constant 0 : index
    %c2_127 = arith.constant 2 : index
    %c2_128 = arith.constant 2 : index
    %c0_129 = arith.constant 0 : index
    %c0_130 = arith.constant 0 : index
    %150 = vector.load %arg5[%c0_126, %c2_127, %c2_128, %c0_129, %c0_130] : memref<2x3x4x1x8xf32, #tpu.memory_space<vmem>>, vector<1x1x1x1x8xf32>
    %151 = vector.shape_cast %150 : vector<1x1x1x1x8xf32> to vector<1x8xf32>
    %152 = vector.broadcast %151 : vector<1x8xf32> to vector<16x8xf32>
    %153 = arith.addf %149, %152 : vector<16x8xf32>
    %154 = vector.shape_cast %139 : vector<16x8xf32> to vector<2x8x8xf32>
    %155 = vector.shape_cast %146 : vector<16x8xf32> to vector<2x8x8xf32>
    %156 = vector.shape_cast %153 : vector<16x8xf32> to vector<2x8x8xf32>
    "tpu.trace_start"() <{level = 10 : i32, message = "bqd,bkd->bqk"}> : () -> ()
    %cst_131 = arith.constant dense<0.000000e+00> : vector<2x8x8xf32>
    %157 = tpu.matmul %154, %155, %cst_131 {dimension_numbers = #tpu.dot_dimension_numbers<[2], [2], [1], [1], [0, 0, 0, 1, 1, 1], [0], [0]>} : vector<2x8x8xf32>, vector<2x8x8xf32>, vector<2x8x8xf32> -> vector<2x8x8xf32>
    "tpu.trace_stop"() : () -> ()
    %158 = arith.addf %157, %14 : vector<2x8x8xf32>
    %cst_132 = arith.constant dense<0xFF800000> : vector<2x8xf32>
    %159 = vector.multi_reduction <maximumf>, %158, %cst_132 [2] : vector<2x8x8xf32> to vector<2x8xf32>
    %160 = vector.shape_cast %159 : vector<2x8xf32> to vector<2x8x1xf32>
    %161 = vector.broadcast %160 : vector<2x8x1xf32> to vector<2x8x8xf32>
    %162 = arith.subf %158, %161 : vector<2x8x8xf32>
    %163 = math.exp %162 : vector<2x8x8xf32>
    %cst_133 = arith.constant dense<0.000000e+00> : vector<2x8xf32>
    %164 = vector.multi_reduction <add>, %163, %cst_133 [2] : vector<2x8x8xf32> to vector<2x8xf32>
    %165 = vector.shape_cast %164 : vector<2x8xf32> to vector<2x8x1xf32>
    %166 = tpu.reciprocal %165 {approx = true} : vector<2x8x1xf32> -> vector<2x8x1xf32>
    %167 = vector.broadcast %166 : vector<2x8x1xf32> to vector<2x8x8xf32>
    %168 = arith.mulf %163, %167 : vector<2x8x8xf32>
    %169 = arith.truncf %168 : vector<2x8x8xf32> to vector<2x8x8xbf16>
    %170 = arith.truncf %156 : vector<2x8x8xf32> to vector<2x8x8xbf16>
    "tpu.trace_start"() <{level = 10 : i32, message = "bqk,bkd->bqd"}> : () -> ()
    %cst_134 = arith.constant dense<0.000000e+00> : vector<2x8x8xf32>
    %171 = tpu.matmul %169, %170, %cst_134 {dimension_numbers = #tpu.dot_dimension_numbers<[2], [1], [1], [2], [0, 0, 0, 1, 1, 2], [0], [0]>} : vector<2x8x8xbf16>, vector<2x8x8xbf16>, vector<2x8x8xf32> -> vector<2x8x8xf32>
    "tpu.trace_stop"() : () -> ()
    %172 = vector.shape_cast %171 : vector<2x8x8xf32> to vector<16x8xf32>
    %173 = arith.truncf %172 : vector<16x8xf32> to vector<16x8xbf16>
    %c0_135 = arith.constant 0 : index
    %c2_136 = arith.constant 2 : index
    %c0_137 = arith.constant 0 : index
    %c0_138 = arith.constant 0 : index
    %174 = vector.load %arg6[%c0_135, %c2_136, %c0_137, %c0_138] : memref<2x4x8x32xbf16, #tpu.memory_space<vmem>>, vector<1x1x8x32xbf16>
    %175 = vector.shape_cast %174 : vector<1x1x8x32xbf16> to vector<8x32xbf16>
    %cst_139 = arith.constant dense<0.000000e+00> : vector<16x32xf32>
    %176 = tpu.matmul %173, %175, %cst_139 {dimension_numbers = #tpu.dot_dimension_numbers<[1], [0], [0], [1], [0, 0, 1, 1], [], []>} : vector<16x8xbf16>, vector<8x32xbf16>, vector<16x32xf32> -> vector<16x32xf32>
    %177 = arith.addf %132, %176 : vector<16x32xf32>
    %c0_140 = arith.constant 0 : index
    %c0_141 = arith.constant 0 : index
    %c3 = arith.constant 3 : index
    %c0_142 = arith.constant 0 : index
    %c0_143 = arith.constant 0 : index
    %178 = vector.load %arg4[%c0_140, %c0_141, %c3, %c0_142, %c0_143] : memref<2x3x4x32x8xbf16, #tpu.memory_space<vmem>>, vector<1x1x1x32x8xbf16>
    %179 = vector.shape_cast %178 : vector<1x1x1x32x8xbf16> to vector<32x8xbf16>
    %cst_144 = arith.constant dense<0.000000e+00> : vector<16x8xf32>
    %180 = tpu.matmul %41, %179, %cst_144 {dimension_numbers = #tpu.dot_dimension_numbers<[1], [0], [0], [1], [0, 0, 1, 1], [], []>} : vector<16x32xbf16>, vector<32x8xbf16>, vector<16x8xf32> -> vector<16x8xf32>
    %c0_145 = arith.constant 0 : index
    %c0_146 = arith.constant 0 : index
    %c3_147 = arith.constant 3 : index
    %c0_148 = arith.constant 0 : index
    %c0_149 = arith.constant 0 : index
    %181 = vector.load %arg5[%c0_145, %c0_146, %c3_147, %c0_148, %c0_149] : memref<2x3x4x1x8xf32, #tpu.memory_space<vmem>>, vector<1x1x1x1x8xf32>
    %182 = vector.shape_cast %181 : vector<1x1x1x1x8xf32> to vector<1x8xf32>
    %183 = vector.broadcast %182 : vector<1x8xf32> to vector<16x8xf32>
    %184 = arith.addf %180, %183 : vector<16x8xf32>
    %c0_150 = arith.constant 0 : index
    %c1_151 = arith.constant 1 : index
    %c3_152 = arith.constant 3 : index
    %c0_153 = arith.constant 0 : index
    %c0_154 = arith.constant 0 : index
    %185 = vector.load %arg4[%c0_150, %c1_151, %c3_152, %c0_153, %c0_154] : memref<2x3x4x32x8xbf16, #tpu.memory_space<vmem>>, vector<1x1x1x32x8xbf16>
    %186 = vector.shape_cast %185 : vector<1x1x1x32x8xbf16> to vector<32x8xbf16>
    %cst_155 = arith.constant dense<0.000000e+00> : vector<16x8xf32>
    %187 = tpu.matmul %41, %186, %cst_155 {dimension_numbers = #tpu.dot_dimension_numbers<[1], [0], [0], [1], [0, 0, 1, 1], [], []>} : vector<16x32xbf16>, vector<32x8xbf16>, vector<16x8xf32> -> vector<16x8xf32>
    %c0_156 = arith.constant 0 : index
    %c1_157 = arith.constant 1 : index
    %c3_158 = arith.constant 3 : index
    %c0_159 = arith.constant 0 : index
    %c0_160 = arith.constant 0 : index
    %188 = vector.load %arg5[%c0_156, %c1_157, %c3_158, %c0_159, %c0_160] : memref<2x3x4x1x8xf32, #tpu.memory_space<vmem>>, vector<1x1x1x1x8xf32>
    %189 = vector.shape_cast %188 : vector<1x1x1x1x8xf32> to vector<1x8xf32>
    %190 = vector.broadcast %189 : vector<1x8xf32> to vector<16x8xf32>
    %191 = arith.addf %187, %190 : vector<16x8xf32>
    %c0_161 = arith.constant 0 : index
    %c2_162 = arith.constant 2 : index
    %c3_163 = arith.constant 3 : index
    %c0_164 = arith.constant 0 : index
    %c0_165 = arith.constant 0 : index
    %192 = vector.load %arg4[%c0_161, %c2_162, %c3_163, %c0_164, %c0_165] : memref<2x3x4x32x8xbf16, #tpu.memory_space<vmem>>, vector<1x1x1x32x8xbf16>
    %193 = vector.shape_cast %192 : vector<1x1x1x32x8xbf16> to vector<32x8xbf16>
    %cst_166 = arith.constant dense<0.000000e+00> : vector<16x8xf32>
    %194 = tpu.matmul %41, %193, %cst_166 {dimension_numbers = #tpu.dot_dimension_numbers<[1], [0], [0], [1], [0, 0, 1, 1], [], []>} : vector<16x32xbf16>, vector<32x8xbf16>, vector<16x8xf32> -> vector<16x8xf32>
    %c0_167 = arith.constant 0 : index
    %c2_168 = arith.constant 2 : index
    %c3_169 = arith.constant 3 : index
    %c0_170 = arith.constant 0 : index
    %c0_171 = arith.constant 0 : index
    %195 = vector.load %arg5[%c0_167, %c2_168, %c3_169, %c0_170, %c0_171] : memref<2x3x4x1x8xf32, #tpu.memory_space<vmem>>, vector<1x1x1x1x8xf32>
    %196 = vector.shape_cast %195 : vector<1x1x1x1x8xf32> to vector<1x8xf32>
    %197 = vector.broadcast %196 : vector<1x8xf32> to vector<16x8xf32>
    %198 = arith.addf %194, %197 : vector<16x8xf32>
    %199 = vector.shape_cast %184 : vector<16x8xf32> to vector<2x8x8xf32>
    %200 = vector.shape_cast %191 : vector<16x8xf32> to vector<2x8x8xf32>
    %201 = vector.shape_cast %198 : vector<16x8xf32> to vector<2x8x8xf32>
    "tpu.trace_start"() <{level = 10 : i32, message = "bqd,bkd->bqk"}> : () -> ()
    %cst_172 = arith.constant dense<0.000000e+00> : vector<2x8x8xf32>
    %202 = tpu.matmul %199, %200, %cst_172 {dimension_numbers = #tpu.dot_dimension_numbers<[2], [2], [1], [1], [0, 0, 0, 1, 1, 1], [0], [0]>} : vector<2x8x8xf32>, vector<2x8x8xf32>, vector<2x8x8xf32> -> vector<2x8x8xf32>
    "tpu.trace_stop"() : () -> ()
    %203 = arith.addf %202, %14 : vector<2x8x8xf32>
    %cst_173 = arith.constant dense<0xFF800000> : vector<2x8xf32>
    %204 = vector.multi_reduction <maximumf>, %203, %cst_173 [2] : vector<2x8x8xf32> to vector<2x8xf32>
    %205 = vector.shape_cast %204 : vector<2x8xf32> to vector<2x8x1xf32>
    %206 = vector.broadcast %205 : vector<2x8x1xf32> to vector<2x8x8xf32>
    %207 = arith.subf %203, %206 : vector<2x8x8xf32>
    %208 = math.exp %207 : vector<2x8x8xf32>
    %cst_174 = arith.constant dense<0.000000e+00> : vector<2x8xf32>
    %209 = vector.multi_reduction <add>, %208, %cst_174 [2] : vector<2x8x8xf32> to vector<2x8xf32>
    %210 = vector.shape_cast %209 : vector<2x8xf32> to vector<2x8x1xf32>
    %211 = tpu.reciprocal %210 {approx = true} : vector<2x8x1xf32> -> vector<2x8x1xf32>
    %212 = vector.broadcast %211 : vector<2x8x1xf32> to vector<2x8x8xf32>
    %213 = arith.mulf %208, %212 : vector<2x8x8xf32>
    %214 = arith.truncf %213 : vector<2x8x8xf32> to vector<2x8x8xbf16>
    %215 = arith.truncf %201 : vector<2x8x8xf32> to vector<2x8x8xbf16>
    "tpu.trace_start"() <{level = 10 : i32, message = "bqk,bkd->bqd"}> : () -> ()
    %cst_175 = arith.constant dense<0.000000e+00> : vector<2x8x8xf32>
    %216 = tpu.matmul %214, %215, %cst_175 {dimension_numbers = #tpu.dot_dimension_numbers<[2], [1], [1], [2], [0, 0, 0, 1, 1, 2], [0], [0]>} : vector<2x8x8xbf16>, vector<2x8x8xbf16>, vector<2x8x8xf32> -> vector<2x8x8xf32>
    "tpu.trace_stop"() : () -> ()
    %217 = vector.shape_cast %216 : vector<2x8x8xf32> to vector<16x8xf32>
    %218 = arith.truncf %217 : vector<16x8xf32> to vector<16x8xbf16>
    %c0_176 = arith.constant 0 : index
    %c3_177 = arith.constant 3 : index
    %c0_178 = arith.constant 0 : index
    %c0_179 = arith.constant 0 : index
    %219 = vector.load %arg6[%c0_176, %c3_177, %c0_178, %c0_179] : memref<2x4x8x32xbf16, #tpu.memory_space<vmem>>, vector<1x1x8x32xbf16>
    %220 = vector.shape_cast %219 : vector<1x1x8x32xbf16> to vector<8x32xbf16>
    %cst_180 = arith.constant dense<0.000000e+00> : vector<16x32xf32>
    %221 = tpu.matmul %218, %220, %cst_180 {dimension_numbers = #tpu.dot_dimension_numbers<[1], [0], [0], [1], [0, 0, 1, 1], [], []>} : vector<16x8xbf16>, vector<8x32xbf16>, vector<16x32xf32> -> vector<16x32xf32>
    %222 = arith.addf %177, %221 : vector<16x32xf32>
    %223 = arith.addf %0, %222 : vector<16x32xf32>
    %c0_181 = arith.constant 0 : index
    %c0_182 = arith.constant 0 : index
    %c0_183 = arith.constant 0 : index
    %224 = vector.load %arg7[%c0_181, %c0_182, %c0_183] : memref<2x1x32xf32, #tpu.memory_space<vmem>>, vector<1x1x32xf32>
    %225 = vector.shape_cast %224 : vector<1x1x32xf32> to vector<1x32xf32>
    %226 = vector.broadcast %225 : vector<1x32xf32> to vector<16x32xf32>
    %227 = arith.addf %223, %226 : vector<16x32xf32>
    %c1_184 = arith.constant 1 : index
    %c0_185 = arith.constant 0 : index
    %c0_186 = arith.constant 0 : index
    %228 = vector.load %arg2[%c1_184, %c0_185, %c0_186] : memref<5x1x32xf32, #tpu.memory_space<vmem>>, vector<1x1x32xf32>
    %229 = vector.shape_cast %228 : vector<1x1x32xf32> to vector<1x32xf32>
    %c1_187 = arith.constant 1 : index
    %c0_188 = arith.constant 0 : index
    %c0_189 = arith.constant 0 : index
    %230 = vector.load %arg3[%c1_187, %c0_188, %c0_189] : memref<5x1x32xf32, #tpu.memory_space<vmem>>, vector<1x1x32xf32>
    %231 = vector.shape_cast %230 : vector<1x1x32xf32> to vector<1x32xf32>
    %cst_190 = arith.constant dense<0.000000e+00> : vector<16xf32>
    %232 = vector.multi_reduction <add>, %227, %cst_190 [1] : vector<16x32xf32> to vector<16xf32>
    %233 = vector.shape_cast %232 : vector<16xf32> to vector<16x1xf32>
    %cst_191 = arith.constant 3.200000e+01 : f32
    %234 = vector.broadcast %cst_191 : f32 to vector<16x1xf32>
    %235 = arith.divf %233, %234 : vector<16x1xf32>
    %236 = vector.broadcast %235 : vector<16x1xf32> to vector<16x32xf32>
    %237 = arith.subf %227, %236 : vector<16x32xf32>
    %238 = arith.mulf %237, %237 : vector<16x32xf32>
    %cst_192 = arith.constant dense<0.000000e+00> : vector<16xf32>
    %239 = vector.multi_reduction <add>, %238, %cst_192 [1] : vector<16x32xf32> to vector<16xf32>
    %240 = vector.shape_cast %239 : vector<16xf32> to vector<16x1xf32>
    %cst_193 = arith.constant 3.200000e+01 : f32
    %241 = vector.broadcast %cst_193 : f32 to vector<16x1xf32>
    %242 = arith.divf %240, %241 : vector<16x1xf32>
    %243 = vector.broadcast %235 : vector<16x1xf32> to vector<16x32xf32>
    %244 = arith.subf %227, %243 : vector<16x32xf32>
    %cst_194 = arith.constant 9.99999974E-6 : f32
    %245 = vector.broadcast %cst_194 : f32 to vector<16x1xf32>
    %246 = arith.addf %242, %245 : vector<16x1xf32>
    %247 = math.rsqrt %246 : vector<16x1xf32>
    %248 = vector.broadcast %247 : vector<16x1xf32> to vector<16x32xf32>
    %249 = arith.mulf %244, %248 : vector<16x32xf32>
    %250 = vector.broadcast %229 : vector<1x32xf32> to vector<16x32xf32>
    %251 = arith.mulf %249, %250 : vector<16x32xf32>
    %252 = vector.broadcast %231 : vector<1x32xf32> to vector<16x32xf32>
    %253 = arith.addf %251, %252 : vector<16x32xf32>
    %254 = arith.truncf %253 : vector<16x32xf32> to vector<16x32xbf16>
    %c0_195 = arith.constant 0 : index
    %c0_196 = arith.constant 0 : index
    %c0_197 = arith.constant 0 : index
    %255 = vector.load %arg8[%c0_195, %c0_196, %c0_197] : memref<2x32x128xbf16, #tpu.memory_space<vmem>>, vector<1x32x128xbf16>
    %256 = vector.shape_cast %255 : vector<1x32x128xbf16> to vector<32x128xbf16>
    %cst_198 = arith.constant dense<0.000000e+00> : vector<16x128xf32>
    %257 = tpu.matmul %254, %256, %cst_198 {dimension_numbers = #tpu.dot_dimension_numbers<[1], [0], [0], [1], [0, 0, 1, 1], [], []>} : vector<16x32xbf16>, vector<32x128xbf16>, vector<16x128xf32> -> vector<16x128xf32>
    %c0_199 = arith.constant 0 : index
    %c0_200 = arith.constant 0 : index
    %c0_201 = arith.constant 0 : index
    %258 = vector.load %arg9[%c0_199, %c0_200, %c0_201] : memref<2x1x128xf32, #tpu.memory_space<vmem>>, vector<1x1x128xf32>
    %259 = vector.shape_cast %258 : vector<1x1x128xf32> to vector<1x128xf32>
    %260 = vector.broadcast %259 : vector<1x128xf32> to vector<16x128xf32>
    %261 = arith.addf %257, %260 : vector<16x128xf32>
    %cst_202 = arith.constant 1.702000e+00 : f32
    %262 = vector.broadcast %cst_202 : f32 to vector<16x128xf32>
    %263 = arith.mulf %262, %261 : vector<16x128xf32>
    %264 = arith.negf %263 : vector<16x128xf32>
    %265 = math.exp %264 : vector<16x128xf32>
    %cst_203 = arith.constant 1.000000e+00 : f32
    %266 = vector.broadcast %cst_203 : f32 to vector<16x128xf32>
    %267 = arith.addf %266, %265 : vector<16x128xf32>
    %268 = arith.divf %266, %267 : vector<16x128xf32>
    %269 = arith.mulf %261, %268 : vector<16x128xf32>
    %270 = arith.truncf %269 : vector<16x128xf32> to vector<16x128xbf16>
    %c0_204 = arith.constant 0 : index
    %c0_205 = arith.constant 0 : index
    %c0_206 = arith.constant 0 : index
    %271 = vector.load %arg10[%c0_204, %c0_205, %c0_206] : memref<2x128x32xbf16, #tpu.memory_space<vmem>>, vector<1x128x32xbf16>
    %272 = vector.shape_cast %271 : vector<1x128x32xbf16> to vector<128x32xbf16>
    %cst_207 = arith.constant dense<0.000000e+00> : vector<16x32xf32>
    %273 = tpu.matmul %270, %272, %cst_207 {dimension_numbers = #tpu.dot_dimension_numbers<[1], [0], [0], [1], [0, 0, 1, 1], [], []>} : vector<16x128xbf16>, vector<128x32xbf16>, vector<16x32xf32> -> vector<16x32xf32>
    %c0_208 = arith.constant 0 : index
    %c0_209 = arith.constant 0 : index
    %c0_210 = arith.constant 0 : index
    %274 = vector.load %arg11[%c0_208, %c0_209, %c0_210] : memref<2x1x32xf32, #tpu.memory_space<vmem>>, vector<1x1x32xf32>
    %275 = vector.shape_cast %274 : vector<1x1x32xf32> to vector<1x32xf32>
    %276 = vector.broadcast %275 : vector<1x32xf32> to vector<16x32xf32>
    %277 = arith.addf %273, %276 : vector<16x32xf32>
    %278 = arith.addf %227, %277 : vector<16x32xf32>
    %c2_211 = arith.constant 2 : index
    %c0_212 = arith.constant 0 : index
    %c0_213 = arith.constant 0 : index
    %279 = vector.load %arg2[%c2_211, %c0_212, %c0_213] : memref<5x1x32xf32, #tpu.memory_space<vmem>>, vector<1x1x32xf32>
    %280 = vector.shape_cast %279 : vector<1x1x32xf32> to vector<1x32xf32>
    %c2_214 = arith.constant 2 : index
    %c0_215 = arith.constant 0 : index
    %c0_216 = arith.constant 0 : index
    %281 = vector.load %arg3[%c2_214, %c0_215, %c0_216] : memref<5x1x32xf32, #tpu.memory_space<vmem>>, vector<1x1x32xf32>
    %282 = vector.shape_cast %281 : vector<1x1x32xf32> to vector<1x32xf32>
    %cst_217 = arith.constant dense<0.000000e+00> : vector<16xf32>
    %283 = vector.multi_reduction <add>, %278, %cst_217 [1] : vector<16x32xf32> to vector<16xf32>
    %284 = vector.shape_cast %283 : vector<16xf32> to vector<16x1xf32>
    %cst_218 = arith.constant 3.200000e+01 : f32
    %285 = vector.broadcast %cst_218 : f32 to vector<16x1xf32>
    %286 = arith.divf %284, %285 : vector<16x1xf32>
    %287 = vector.broadcast %286 : vector<16x1xf32> to vector<16x32xf32>
    %288 = arith.subf %278, %287 : vector<16x32xf32>
    %289 = arith.mulf %288, %288 : vector<16x32xf32>
    %cst_219 = arith.constant dense<0.000000e+00> : vector<16xf32>
    %290 = vector.multi_reduction <add>, %289, %cst_219 [1] : vector<16x32xf32> to vector<16xf32>
    %291 = vector.shape_cast %290 : vector<16xf32> to vector<16x1xf32>
    %cst_220 = arith.constant 3.200000e+01 : f32
    %292 = vector.broadcast %cst_220 : f32 to vector<16x1xf32>
    %293 = arith.divf %291, %292 : vector<16x1xf32>
    %294 = vector.broadcast %286 : vector<16x1xf32> to vector<16x32xf32>
    %295 = arith.subf %278, %294 : vector<16x32xf32>
    %cst_221 = arith.constant 9.99999974E-6 : f32
    %296 = vector.broadcast %cst_221 : f32 to vector<16x1xf32>
    %297 = arith.addf %293, %296 : vector<16x1xf32>
    %298 = math.rsqrt %297 : vector<16x1xf32>
    %299 = vector.broadcast %298 : vector<16x1xf32> to vector<16x32xf32>
    %300 = arith.mulf %295, %299 : vector<16x32xf32>
    %301 = vector.broadcast %280 : vector<1x32xf32> to vector<16x32xf32>
    %302 = arith.mulf %300, %301 : vector<16x32xf32>
    %303 = vector.broadcast %282 : vector<1x32xf32> to vector<16x32xf32>
    %304 = arith.addf %302, %303 : vector<16x32xf32>
    %305 = arith.truncf %304 : vector<16x32xf32> to vector<16x32xbf16>
    %cst_222 = arith.constant 0.000000e+00 : f32
    %306 = vector.broadcast %cst_222 : f32 to vector<16x32xf32>
    %c1_223 = arith.constant 1 : index
    %c0_224 = arith.constant 0 : index
    %c0_225 = arith.constant 0 : index
    %c0_226 = arith.constant 0 : index
    %c0_227 = arith.constant 0 : index
    %307 = vector.load %arg4[%c1_223, %c0_224, %c0_225, %c0_226, %c0_227] : memref<2x3x4x32x8xbf16, #tpu.memory_space<vmem>>, vector<1x1x1x32x8xbf16>
    %308 = vector.shape_cast %307 : vector<1x1x1x32x8xbf16> to vector<32x8xbf16>
    %cst_228 = arith.constant dense<0.000000e+00> : vector<16x8xf32>
    %309 = tpu.matmul %305, %308, %cst_228 {dimension_numbers = #tpu.dot_dimension_numbers<[1], [0], [0], [1], [0, 0, 1, 1], [], []>} : vector<16x32xbf16>, vector<32x8xbf16>, vector<16x8xf32> -> vector<16x8xf32>
    %c1_229 = arith.constant 1 : index
    %c0_230 = arith.constant 0 : index
    %c0_231 = arith.constant 0 : index
    %c0_232 = arith.constant 0 : index
    %c0_233 = arith.constant 0 : index
    %310 = vector.load %arg5[%c1_229, %c0_230, %c0_231, %c0_232, %c0_233] : memref<2x3x4x1x8xf32, #tpu.memory_space<vmem>>, vector<1x1x1x1x8xf32>
    %311 = vector.shape_cast %310 : vector<1x1x1x1x8xf32> to vector<1x8xf32>
    %312 = vector.broadcast %311 : vector<1x8xf32> to vector<16x8xf32>
    %313 = arith.addf %309, %312 : vector<16x8xf32>
    %c1_234 = arith.constant 1 : index
    %c1_235 = arith.constant 1 : index
    %c0_236 = arith.constant 0 : index
    %c0_237 = arith.constant 0 : index
    %c0_238 = arith.constant 0 : index
    %314 = vector.load %arg4[%c1_234, %c1_235, %c0_236, %c0_237, %c0_238] : memref<2x3x4x32x8xbf16, #tpu.memory_space<vmem>>, vector<1x1x1x32x8xbf16>
    %315 = vector.shape_cast %314 : vector<1x1x1x32x8xbf16> to vector<32x8xbf16>
    %cst_239 = arith.constant dense<0.000000e+00> : vector<16x8xf32>
    %316 = tpu.matmul %305, %315, %cst_239 {dimension_numbers = #tpu.dot_dimension_numbers<[1], [0], [0], [1], [0, 0, 1, 1], [], []>} : vector<16x32xbf16>, vector<32x8xbf16>, vector<16x8xf32> -> vector<16x8xf32>
    %c1_240 = arith.constant 1 : index
    %c1_241 = arith.constant 1 : index
    %c0_242 = arith.constant 0 : index
    %c0_243 = arith.constant 0 : index
    %c0_244 = arith.constant 0 : index
    %317 = vector.load %arg5[%c1_240, %c1_241, %c0_242, %c0_243, %c0_244] : memref<2x3x4x1x8xf32, #tpu.memory_space<vmem>>, vector<1x1x1x1x8xf32>
    %318 = vector.shape_cast %317 : vector<1x1x1x1x8xf32> to vector<1x8xf32>
    %319 = vector.broadcast %318 : vector<1x8xf32> to vector<16x8xf32>
    %320 = arith.addf %316, %319 : vector<16x8xf32>
    %c1_245 = arith.constant 1 : index
    %c2_246 = arith.constant 2 : index
    %c0_247 = arith.constant 0 : index
    %c0_248 = arith.constant 0 : index
    %c0_249 = arith.constant 0 : index
    %321 = vector.load %arg4[%c1_245, %c2_246, %c0_247, %c0_248, %c0_249] : memref<2x3x4x32x8xbf16, #tpu.memory_space<vmem>>, vector<1x1x1x32x8xbf16>
    %322 = vector.shape_cast %321 : vector<1x1x1x32x8xbf16> to vector<32x8xbf16>
    %cst_250 = arith.constant dense<0.000000e+00> : vector<16x8xf32>
    %323 = tpu.matmul %305, %322, %cst_250 {dimension_numbers = #tpu.dot_dimension_numbers<[1], [0], [0], [1], [0, 0, 1, 1], [], []>} : vector<16x32xbf16>, vector<32x8xbf16>, vector<16x8xf32> -> vector<16x8xf32>
    %c1_251 = arith.constant 1 : index
    %c2_252 = arith.constant 2 : index
    %c0_253 = arith.constant 0 : index
    %c0_254 = arith.constant 0 : index
    %c0_255 = arith.constant 0 : index
    %324 = vector.load %arg5[%c1_251, %c2_252, %c0_253, %c0_254, %c0_255] : memref<2x3x4x1x8xf32, #tpu.memory_space<vmem>>, vector<1x1x1x1x8xf32>
    %325 = vector.shape_cast %324 : vector<1x1x1x1x8xf32> to vector<1x8xf32>
    %326 = vector.broadcast %325 : vector<1x8xf32> to vector<16x8xf32>
    %327 = arith.addf %323, %326 : vector<16x8xf32>
    %328 = vector.shape_cast %313 : vector<16x8xf32> to vector<2x8x8xf32>
    %329 = vector.shape_cast %320 : vector<16x8xf32> to vector<2x8x8xf32>
    %330 = vector.shape_cast %327 : vector<16x8xf32> to vector<2x8x8xf32>
    "tpu.trace_start"() <{level = 10 : i32, message = "bqd,bkd->bqk"}> : () -> ()
    %cst_256 = arith.constant dense<0.000000e+00> : vector<2x8x8xf32>
    %331 = tpu.matmul %328, %329, %cst_256 {dimension_numbers = #tpu.dot_dimension_numbers<[2], [2], [1], [1], [0, 0, 0, 1, 1, 1], [0], [0]>} : vector<2x8x8xf32>, vector<2x8x8xf32>, vector<2x8x8xf32> -> vector<2x8x8xf32>
    "tpu.trace_stop"() : () -> ()
    %332 = arith.addf %331, %14 : vector<2x8x8xf32>
    %cst_257 = arith.constant dense<0xFF800000> : vector<2x8xf32>
    %333 = vector.multi_reduction <maximumf>, %332, %cst_257 [2] : vector<2x8x8xf32> to vector<2x8xf32>
    %334 = vector.shape_cast %333 : vector<2x8xf32> to vector<2x8x1xf32>
    %335 = vector.broadcast %334 : vector<2x8x1xf32> to vector<2x8x8xf32>
    %336 = arith.subf %332, %335 : vector<2x8x8xf32>
    %337 = math.exp %336 : vector<2x8x8xf32>
    %cst_258 = arith.constant dense<0.000000e+00> : vector<2x8xf32>
    %338 = vector.multi_reduction <add>, %337, %cst_258 [2] : vector<2x8x8xf32> to vector<2x8xf32>
    %339 = vector.shape_cast %338 : vector<2x8xf32> to vector<2x8x1xf32>
    %340 = tpu.reciprocal %339 {approx = true} : vector<2x8x1xf32> -> vector<2x8x1xf32>
    %341 = vector.broadcast %340 : vector<2x8x1xf32> to vector<2x8x8xf32>
    %342 = arith.mulf %337, %341 : vector<2x8x8xf32>
    %343 = arith.truncf %342 : vector<2x8x8xf32> to vector<2x8x8xbf16>
    %344 = arith.truncf %330 : vector<2x8x8xf32> to vector<2x8x8xbf16>
    "tpu.trace_start"() <{level = 10 : i32, message = "bqk,bkd->bqd"}> : () -> ()
    %cst_259 = arith.constant dense<0.000000e+00> : vector<2x8x8xf32>
    %345 = tpu.matmul %343, %344, %cst_259 {dimension_numbers = #tpu.dot_dimension_numbers<[2], [1], [1], [2], [0, 0, 0, 1, 1, 2], [0], [0]>} : vector<2x8x8xbf16>, vector<2x8x8xbf16>, vector<2x8x8xf32> -> vector<2x8x8xf32>
    "tpu.trace_stop"() : () -> ()
    %346 = vector.shape_cast %345 : vector<2x8x8xf32> to vector<16x8xf32>
    %347 = arith.truncf %346 : vector<16x8xf32> to vector<16x8xbf16>
    %c1_260 = arith.constant 1 : index
    %c0_261 = arith.constant 0 : index
    %c0_262 = arith.constant 0 : index
    %c0_263 = arith.constant 0 : index
    %348 = vector.load %arg6[%c1_260, %c0_261, %c0_262, %c0_263] : memref<2x4x8x32xbf16, #tpu.memory_space<vmem>>, vector<1x1x8x32xbf16>
    %349 = vector.shape_cast %348 : vector<1x1x8x32xbf16> to vector<8x32xbf16>
    %cst_264 = arith.constant dense<0.000000e+00> : vector<16x32xf32>
    %350 = tpu.matmul %347, %349, %cst_264 {dimension_numbers = #tpu.dot_dimension_numbers<[1], [0], [0], [1], [0, 0, 1, 1], [], []>} : vector<16x8xbf16>, vector<8x32xbf16>, vector<16x32xf32> -> vector<16x32xf32>
    %351 = arith.addf %306, %350 : vector<16x32xf32>
    %c1_265 = arith.constant 1 : index
    %c0_266 = arith.constant 0 : index
    %c1_267 = arith.constant 1 : index
    %c0_268 = arith.constant 0 : index
    %c0_269 = arith.constant 0 : index
    %352 = vector.load %arg4[%c1_265, %c0_266, %c1_267, %c0_268, %c0_269] : memref<2x3x4x32x8xbf16, #tpu.memory_space<vmem>>, vector<1x1x1x32x8xbf16>
    %353 = vector.shape_cast %352 : vector<1x1x1x32x8xbf16> to vector<32x8xbf16>
    %cst_270 = arith.constant dense<0.000000e+00> : vector<16x8xf32>
    %354 = tpu.matmul %305, %353, %cst_270 {dimension_numbers = #tpu.dot_dimension_numbers<[1], [0], [0], [1], [0, 0, 1, 1], [], []>} : vector<16x32xbf16>, vector<32x8xbf16>, vector<16x8xf32> -> vector<16x8xf32>
    %c1_271 = arith.constant 1 : index
    %c0_272 = arith.constant 0 : index
    %c1_273 = arith.constant 1 : index
    %c0_274 = arith.constant 0 : index
    %c0_275 = arith.constant 0 : index
    %355 = vector.load %arg5[%c1_271, %c0_272, %c1_273, %c0_274, %c0_275] : memref<2x3x4x1x8xf32, #tpu.memory_space<vmem>>, vector<1x1x1x1x8xf32>
    %356 = vector.shape_cast %355 : vector<1x1x1x1x8xf32> to vector<1x8xf32>
    %357 = vector.broadcast %356 : vector<1x8xf32> to vector<16x8xf32>
    %358 = arith.addf %354, %357 : vector<16x8xf32>
    %c1_276 = arith.constant 1 : index
    %c1_277 = arith.constant 1 : index
    %c1_278 = arith.constant 1 : index
    %c0_279 = arith.constant 0 : index
    %c0_280 = arith.constant 0 : index
    %359 = vector.load %arg4[%c1_276, %c1_277, %c1_278, %c0_279, %c0_280] : memref<2x3x4x32x8xbf16, #tpu.memory_space<vmem>>, vector<1x1x1x32x8xbf16>
    %360 = vector.shape_cast %359 : vector<1x1x1x32x8xbf16> to vector<32x8xbf16>
    %cst_281 = arith.constant dense<0.000000e+00> : vector<16x8xf32>
    %361 = tpu.matmul %305, %360, %cst_281 {dimension_numbers = #tpu.dot_dimension_numbers<[1], [0], [0], [1], [0, 0, 1, 1], [], []>} : vector<16x32xbf16>, vector<32x8xbf16>, vector<16x8xf32> -> vector<16x8xf32>
    %c1_282 = arith.constant 1 : index
    %c1_283 = arith.constant 1 : index
    %c1_284 = arith.constant 1 : index
    %c0_285 = arith.constant 0 : index
    %c0_286 = arith.constant 0 : index
    %362 = vector.load %arg5[%c1_282, %c1_283, %c1_284, %c0_285, %c0_286] : memref<2x3x4x1x8xf32, #tpu.memory_space<vmem>>, vector<1x1x1x1x8xf32>
    %363 = vector.shape_cast %362 : vector<1x1x1x1x8xf32> to vector<1x8xf32>
    %364 = vector.broadcast %363 : vector<1x8xf32> to vector<16x8xf32>
    %365 = arith.addf %361, %364 : vector<16x8xf32>
    %c1_287 = arith.constant 1 : index
    %c2_288 = arith.constant 2 : index
    %c1_289 = arith.constant 1 : index
    %c0_290 = arith.constant 0 : index
    %c0_291 = arith.constant 0 : index
    %366 = vector.load %arg4[%c1_287, %c2_288, %c1_289, %c0_290, %c0_291] : memref<2x3x4x32x8xbf16, #tpu.memory_space<vmem>>, vector<1x1x1x32x8xbf16>
    %367 = vector.shape_cast %366 : vector<1x1x1x32x8xbf16> to vector<32x8xbf16>
    %cst_292 = arith.constant dense<0.000000e+00> : vector<16x8xf32>
    %368 = tpu.matmul %305, %367, %cst_292 {dimension_numbers = #tpu.dot_dimension_numbers<[1], [0], [0], [1], [0, 0, 1, 1], [], []>} : vector<16x32xbf16>, vector<32x8xbf16>, vector<16x8xf32> -> vector<16x8xf32>
    %c1_293 = arith.constant 1 : index
    %c2_294 = arith.constant 2 : index
    %c1_295 = arith.constant 1 : index
    %c0_296 = arith.constant 0 : index
    %c0_297 = arith.constant 0 : index
    %369 = vector.load %arg5[%c1_293, %c2_294, %c1_295, %c0_296, %c0_297] : memref<2x3x4x1x8xf32, #tpu.memory_space<vmem>>, vector<1x1x1x1x8xf32>
    %370 = vector.shape_cast %369 : vector<1x1x1x1x8xf32> to vector<1x8xf32>
    %371 = vector.broadcast %370 : vector<1x8xf32> to vector<16x8xf32>
    %372 = arith.addf %368, %371 : vector<16x8xf32>
    %373 = vector.shape_cast %358 : vector<16x8xf32> to vector<2x8x8xf32>
    %374 = vector.shape_cast %365 : vector<16x8xf32> to vector<2x8x8xf32>
    %375 = vector.shape_cast %372 : vector<16x8xf32> to vector<2x8x8xf32>
    "tpu.trace_start"() <{level = 10 : i32, message = "bqd,bkd->bqk"}> : () -> ()
    %cst_298 = arith.constant dense<0.000000e+00> : vector<2x8x8xf32>
    %376 = tpu.matmul %373, %374, %cst_298 {dimension_numbers = #tpu.dot_dimension_numbers<[2], [2], [1], [1], [0, 0, 0, 1, 1, 1], [0], [0]>} : vector<2x8x8xf32>, vector<2x8x8xf32>, vector<2x8x8xf32> -> vector<2x8x8xf32>
    "tpu.trace_stop"() : () -> ()
    %377 = arith.addf %376, %14 : vector<2x8x8xf32>
    %cst_299 = arith.constant dense<0xFF800000> : vector<2x8xf32>
    %378 = vector.multi_reduction <maximumf>, %377, %cst_299 [2] : vector<2x8x8xf32> to vector<2x8xf32>
    %379 = vector.shape_cast %378 : vector<2x8xf32> to vector<2x8x1xf32>
    %380 = vector.broadcast %379 : vector<2x8x1xf32> to vector<2x8x8xf32>
    %381 = arith.subf %377, %380 : vector<2x8x8xf32>
    %382 = math.exp %381 : vector<2x8x8xf32>
    %cst_300 = arith.constant dense<0.000000e+00> : vector<2x8xf32>
    %383 = vector.multi_reduction <add>, %382, %cst_300 [2] : vector<2x8x8xf32> to vector<2x8xf32>
    %384 = vector.shape_cast %383 : vector<2x8xf32> to vector<2x8x1xf32>
    %385 = tpu.reciprocal %384 {approx = true} : vector<2x8x1xf32> -> vector<2x8x1xf32>
    %386 = vector.broadcast %385 : vector<2x8x1xf32> to vector<2x8x8xf32>
    %387 = arith.mulf %382, %386 : vector<2x8x8xf32>
    %388 = arith.truncf %387 : vector<2x8x8xf32> to vector<2x8x8xbf16>
    %389 = arith.truncf %375 : vector<2x8x8xf32> to vector<2x8x8xbf16>
    "tpu.trace_start"() <{level = 10 : i32, message = "bqk,bkd->bqd"}> : () -> ()
    %cst_301 = arith.constant dense<0.000000e+00> : vector<2x8x8xf32>
    %390 = tpu.matmul %388, %389, %cst_301 {dimension_numbers = #tpu.dot_dimension_numbers<[2], [1], [1], [2], [0, 0, 0, 1, 1, 2], [0], [0]>} : vector<2x8x8xbf16>, vector<2x8x8xbf16>, vector<2x8x8xf32> -> vector<2x8x8xf32>
    "tpu.trace_stop"() : () -> ()
    %391 = vector.shape_cast %390 : vector<2x8x8xf32> to vector<16x8xf32>
    %392 = arith.truncf %391 : vector<16x8xf32> to vector<16x8xbf16>
    %c1_302 = arith.constant 1 : index
    %c1_303 = arith.constant 1 : index
    %c0_304 = arith.constant 0 : index
    %c0_305 = arith.constant 0 : index
    %393 = vector.load %arg6[%c1_302, %c1_303, %c0_304, %c0_305] : memref<2x4x8x32xbf16, #tpu.memory_space<vmem>>, vector<1x1x8x32xbf16>
    %394 = vector.shape_cast %393 : vector<1x1x8x32xbf16> to vector<8x32xbf16>
    %cst_306 = arith.constant dense<0.000000e+00> : vector<16x32xf32>
    %395 = tpu.matmul %392, %394, %cst_306 {dimension_numbers = #tpu.dot_dimension_numbers<[1], [0], [0], [1], [0, 0, 1, 1], [], []>} : vector<16x8xbf16>, vector<8x32xbf16>, vector<16x32xf32> -> vector<16x32xf32>
    %396 = arith.addf %351, %395 : vector<16x32xf32>
    %c1_307 = arith.constant 1 : index
    %c0_308 = arith.constant 0 : index
    %c2_309 = arith.constant 2 : index
    %c0_310 = arith.constant 0 : index
    %c0_311 = arith.constant 0 : index
    %397 = vector.load %arg4[%c1_307, %c0_308, %c2_309, %c0_310, %c0_311] : memref<2x3x4x32x8xbf16, #tpu.memory_space<vmem>>, vector<1x1x1x32x8xbf16>
    %398 = vector.shape_cast %397 : vector<1x1x1x32x8xbf16> to vector<32x8xbf16>
    %cst_312 = arith.constant dense<0.000000e+00> : vector<16x8xf32>
    %399 = tpu.matmul %305, %398, %cst_312 {dimension_numbers = #tpu.dot_dimension_numbers<[1], [0], [0], [1], [0, 0, 1, 1], [], []>} : vector<16x32xbf16>, vector<32x8xbf16>, vector<16x8xf32> -> vector<16x8xf32>
    %c1_313 = arith.constant 1 : index
    %c0_314 = arith.constant 0 : index
    %c2_315 = arith.constant 2 : index
    %c0_316 = arith.constant 0 : index
    %c0_317 = arith.constant 0 : index
    %400 = vector.load %arg5[%c1_313, %c0_314, %c2_315, %c0_316, %c0_317] : memref<2x3x4x1x8xf32, #tpu.memory_space<vmem>>, vector<1x1x1x1x8xf32>
    %401 = vector.shape_cast %400 : vector<1x1x1x1x8xf32> to vector<1x8xf32>
    %402 = vector.broadcast %401 : vector<1x8xf32> to vector<16x8xf32>
    %403 = arith.addf %399, %402 : vector<16x8xf32>
    %c1_318 = arith.constant 1 : index
    %c1_319 = arith.constant 1 : index
    %c2_320 = arith.constant 2 : index
    %c0_321 = arith.constant 0 : index
    %c0_322 = arith.constant 0 : index
    %404 = vector.load %arg4[%c1_318, %c1_319, %c2_320, %c0_321, %c0_322] : memref<2x3x4x32x8xbf16, #tpu.memory_space<vmem>>, vector<1x1x1x32x8xbf16>
    %405 = vector.shape_cast %404 : vector<1x1x1x32x8xbf16> to vector<32x8xbf16>
    %cst_323 = arith.constant dense<0.000000e+00> : vector<16x8xf32>
    %406 = tpu.matmul %305, %405, %cst_323 {dimension_numbers = #tpu.dot_dimension_numbers<[1], [0], [0], [1], [0, 0, 1, 1], [], []>} : vector<16x32xbf16>, vector<32x8xbf16>, vector<16x8xf32> -> vector<16x8xf32>
    %c1_324 = arith.constant 1 : index
    %c1_325 = arith.constant 1 : index
    %c2_326 = arith.constant 2 : index
    %c0_327 = arith.constant 0 : index
    %c0_328 = arith.constant 0 : index
    %407 = vector.load %arg5[%c1_324, %c1_325, %c2_326, %c0_327, %c0_328] : memref<2x3x4x1x8xf32, #tpu.memory_space<vmem>>, vector<1x1x1x1x8xf32>
    %408 = vector.shape_cast %407 : vector<1x1x1x1x8xf32> to vector<1x8xf32>
    %409 = vector.broadcast %408 : vector<1x8xf32> to vector<16x8xf32>
    %410 = arith.addf %406, %409 : vector<16x8xf32>
    %c1_329 = arith.constant 1 : index
    %c2_330 = arith.constant 2 : index
    %c2_331 = arith.constant 2 : index
    %c0_332 = arith.constant 0 : index
    %c0_333 = arith.constant 0 : index
    %411 = vector.load %arg4[%c1_329, %c2_330, %c2_331, %c0_332, %c0_333] : memref<2x3x4x32x8xbf16, #tpu.memory_space<vmem>>, vector<1x1x1x32x8xbf16>
    %412 = vector.shape_cast %411 : vector<1x1x1x32x8xbf16> to vector<32x8xbf16>
    %cst_334 = arith.constant dense<0.000000e+00> : vector<16x8xf32>
    %413 = tpu.matmul %305, %412, %cst_334 {dimension_numbers = #tpu.dot_dimension_numbers<[1], [0], [0], [1], [0, 0, 1, 1], [], []>} : vector<16x32xbf16>, vector<32x8xbf16>, vector<16x8xf32> -> vector<16x8xf32>
    %c1_335 = arith.constant 1 : index
    %c2_336 = arith.constant 2 : index
    %c2_337 = arith.constant 2 : index
    %c0_338 = arith.constant 0 : index
    %c0_339 = arith.constant 0 : index
    %414 = vector.load %arg5[%c1_335, %c2_336, %c2_337, %c0_338, %c0_339] : memref<2x3x4x1x8xf32, #tpu.memory_space<vmem>>, vector<1x1x1x1x8xf32>
    %415 = vector.shape_cast %414 : vector<1x1x1x1x8xf32> to vector<1x8xf32>
    %416 = vector.broadcast %415 : vector<1x8xf32> to vector<16x8xf32>
    %417 = arith.addf %413, %416 : vector<16x8xf32>
    %418 = vector.shape_cast %403 : vector<16x8xf32> to vector<2x8x8xf32>
    %419 = vector.shape_cast %410 : vector<16x8xf32> to vector<2x8x8xf32>
    %420 = vector.shape_cast %417 : vector<16x8xf32> to vector<2x8x8xf32>
    "tpu.trace_start"() <{level = 10 : i32, message = "bqd,bkd->bqk"}> : () -> ()
    %cst_340 = arith.constant dense<0.000000e+00> : vector<2x8x8xf32>
    %421 = tpu.matmul %418, %419, %cst_340 {dimension_numbers = #tpu.dot_dimension_numbers<[2], [2], [1], [1], [0, 0, 0, 1, 1, 1], [0], [0]>} : vector<2x8x8xf32>, vector<2x8x8xf32>, vector<2x8x8xf32> -> vector<2x8x8xf32>
    "tpu.trace_stop"() : () -> ()
    %422 = arith.addf %421, %14 : vector<2x8x8xf32>
    %cst_341 = arith.constant dense<0xFF800000> : vector<2x8xf32>
    %423 = vector.multi_reduction <maximumf>, %422, %cst_341 [2] : vector<2x8x8xf32> to vector<2x8xf32>
    %424 = vector.shape_cast %423 : vector<2x8xf32> to vector<2x8x1xf32>
    %425 = vector.broadcast %424 : vector<2x8x1xf32> to vector<2x8x8xf32>
    %426 = arith.subf %422, %425 : vector<2x8x8xf32>
    %427 = math.exp %426 : vector<2x8x8xf32>
    %cst_342 = arith.constant dense<0.000000e+00> : vector<2x8xf32>
    %428 = vector.multi_reduction <add>, %427, %cst_342 [2] : vector<2x8x8xf32> to vector<2x8xf32>
    %429 = vector.shape_cast %428 : vector<2x8xf32> to vector<2x8x1xf32>
    %430 = tpu.reciprocal %429 {approx = true} : vector<2x8x1xf32> -> vector<2x8x1xf32>
    %431 = vector.broadcast %430 : vector<2x8x1xf32> to vector<2x8x8xf32>
    %432 = arith.mulf %427, %431 : vector<2x8x8xf32>
    %433 = arith.truncf %432 : vector<2x8x8xf32> to vector<2x8x8xbf16>
    %434 = arith.truncf %420 : vector<2x8x8xf32> to vector<2x8x8xbf16>
    "tpu.trace_start"() <{level = 10 : i32, message = "bqk,bkd->bqd"}> : () -> ()
    %cst_343 = arith.constant dense<0.000000e+00> : vector<2x8x8xf32>
    %435 = tpu.matmul %433, %434, %cst_343 {dimension_numbers = #tpu.dot_dimension_numbers<[2], [1], [1], [2], [0, 0, 0, 1, 1, 2], [0], [0]>} : vector<2x8x8xbf16>, vector<2x8x8xbf16>, vector<2x8x8xf32> -> vector<2x8x8xf32>
    "tpu.trace_stop"() : () -> ()
    %436 = vector.shape_cast %435 : vector<2x8x8xf32> to vector<16x8xf32>
    %437 = arith.truncf %436 : vector<16x8xf32> to vector<16x8xbf16>
    %c1_344 = arith.constant 1 : index
    %c2_345 = arith.constant 2 : index
    %c0_346 = arith.constant 0 : index
    %c0_347 = arith.constant 0 : index
    %438 = vector.load %arg6[%c1_344, %c2_345, %c0_346, %c0_347] : memref<2x4x8x32xbf16, #tpu.memory_space<vmem>>, vector<1x1x8x32xbf16>
    %439 = vector.shape_cast %438 : vector<1x1x8x32xbf16> to vector<8x32xbf16>
    %cst_348 = arith.constant dense<0.000000e+00> : vector<16x32xf32>
    %440 = tpu.matmul %437, %439, %cst_348 {dimension_numbers = #tpu.dot_dimension_numbers<[1], [0], [0], [1], [0, 0, 1, 1], [], []>} : vector<16x8xbf16>, vector<8x32xbf16>, vector<16x32xf32> -> vector<16x32xf32>
    %441 = arith.addf %396, %440 : vector<16x32xf32>
    %c1_349 = arith.constant 1 : index
    %c0_350 = arith.constant 0 : index
    %c3_351 = arith.constant 3 : index
    %c0_352 = arith.constant 0 : index
    %c0_353 = arith.constant 0 : index
    %442 = vector.load %arg4[%c1_349, %c0_350, %c3_351, %c0_352, %c0_353] : memref<2x3x4x32x8xbf16, #tpu.memory_space<vmem>>, vector<1x1x1x32x8xbf16>
    %443 = vector.shape_cast %442 : vector<1x1x1x32x8xbf16> to vector<32x8xbf16>
    %cst_354 = arith.constant dense<0.000000e+00> : vector<16x8xf32>
    %444 = tpu.matmul %305, %443, %cst_354 {dimension_numbers = #tpu.dot_dimension_numbers<[1], [0], [0], [1], [0, 0, 1, 1], [], []>} : vector<16x32xbf16>, vector<32x8xbf16>, vector<16x8xf32> -> vector<16x8xf32>
    %c1_355 = arith.constant 1 : index
    %c0_356 = arith.constant 0 : index
    %c3_357 = arith.constant 3 : index
    %c0_358 = arith.constant 0 : index
    %c0_359 = arith.constant 0 : index
    %445 = vector.load %arg5[%c1_355, %c0_356, %c3_357, %c0_358, %c0_359] : memref<2x3x4x1x8xf32, #tpu.memory_space<vmem>>, vector<1x1x1x1x8xf32>
    %446 = vector.shape_cast %445 : vector<1x1x1x1x8xf32> to vector<1x8xf32>
    %447 = vector.broadcast %446 : vector<1x8xf32> to vector<16x8xf32>
    %448 = arith.addf %444, %447 : vector<16x8xf32>
    %c1_360 = arith.constant 1 : index
    %c1_361 = arith.constant 1 : index
    %c3_362 = arith.constant 3 : index
    %c0_363 = arith.constant 0 : index
    %c0_364 = arith.constant 0 : index
    %449 = vector.load %arg4[%c1_360, %c1_361, %c3_362, %c0_363, %c0_364] : memref<2x3x4x32x8xbf16, #tpu.memory_space<vmem>>, vector<1x1x1x32x8xbf16>
    %450 = vector.shape_cast %449 : vector<1x1x1x32x8xbf16> to vector<32x8xbf16>
    %cst_365 = arith.constant dense<0.000000e+00> : vector<16x8xf32>
    %451 = tpu.matmul %305, %450, %cst_365 {dimension_numbers = #tpu.dot_dimension_numbers<[1], [0], [0], [1], [0, 0, 1, 1], [], []>} : vector<16x32xbf16>, vector<32x8xbf16>, vector<16x8xf32> -> vector<16x8xf32>
    %c1_366 = arith.constant 1 : index
    %c1_367 = arith.constant 1 : index
    %c3_368 = arith.constant 3 : index
    %c0_369 = arith.constant 0 : index
    %c0_370 = arith.constant 0 : index
    %452 = vector.load %arg5[%c1_366, %c1_367, %c3_368, %c0_369, %c0_370] : memref<2x3x4x1x8xf32, #tpu.memory_space<vmem>>, vector<1x1x1x1x8xf32>
    %453 = vector.shape_cast %452 : vector<1x1x1x1x8xf32> to vector<1x8xf32>
    %454 = vector.broadcast %453 : vector<1x8xf32> to vector<16x8xf32>
    %455 = arith.addf %451, %454 : vector<16x8xf32>
    %c1_371 = arith.constant 1 : index
    %c2_372 = arith.constant 2 : index
    %c3_373 = arith.constant 3 : index
    %c0_374 = arith.constant 0 : index
    %c0_375 = arith.constant 0 : index
    %456 = vector.load %arg4[%c1_371, %c2_372, %c3_373, %c0_374, %c0_375] : memref<2x3x4x32x8xbf16, #tpu.memory_space<vmem>>, vector<1x1x1x32x8xbf16>
    %457 = vector.shape_cast %456 : vector<1x1x1x32x8xbf16> to vector<32x8xbf16>
    %cst_376 = arith.constant dense<0.000000e+00> : vector<16x8xf32>
    %458 = tpu.matmul %305, %457, %cst_376 {dimension_numbers = #tpu.dot_dimension_numbers<[1], [0], [0], [1], [0, 0, 1, 1], [], []>} : vector<16x32xbf16>, vector<32x8xbf16>, vector<16x8xf32> -> vector<16x8xf32>
    %c1_377 = arith.constant 1 : index
    %c2_378 = arith.constant 2 : index
    %c3_379 = arith.constant 3 : index
    %c0_380 = arith.constant 0 : index
    %c0_381 = arith.constant 0 : index
    %459 = vector.load %arg5[%c1_377, %c2_378, %c3_379, %c0_380, %c0_381] : memref<2x3x4x1x8xf32, #tpu.memory_space<vmem>>, vector<1x1x1x1x8xf32>
    %460 = vector.shape_cast %459 : vector<1x1x1x1x8xf32> to vector<1x8xf32>
    %461 = vector.broadcast %460 : vector<1x8xf32> to vector<16x8xf32>
    %462 = arith.addf %458, %461 : vector<16x8xf32>
    %463 = vector.shape_cast %448 : vector<16x8xf32> to vector<2x8x8xf32>
    %464 = vector.shape_cast %455 : vector<16x8xf32> to vector<2x8x8xf32>
    %465 = vector.shape_cast %462 : vector<16x8xf32> to vector<2x8x8xf32>
    "tpu.trace_start"() <{level = 10 : i32, message = "bqd,bkd->bqk"}> : () -> ()
    %cst_382 = arith.constant dense<0.000000e+00> : vector<2x8x8xf32>
    %466 = tpu.matmul %463, %464, %cst_382 {dimension_numbers = #tpu.dot_dimension_numbers<[2], [2], [1], [1], [0, 0, 0, 1, 1, 1], [0], [0]>} : vector<2x8x8xf32>, vector<2x8x8xf32>, vector<2x8x8xf32> -> vector<2x8x8xf32>
    "tpu.trace_stop"() : () -> ()
    %467 = arith.addf %466, %14 : vector<2x8x8xf32>
    %cst_383 = arith.constant dense<0xFF800000> : vector<2x8xf32>
    %468 = vector.multi_reduction <maximumf>, %467, %cst_383 [2] : vector<2x8x8xf32> to vector<2x8xf32>
    %469 = vector.shape_cast %468 : vector<2x8xf32> to vector<2x8x1xf32>
    %470 = vector.broadcast %469 : vector<2x8x1xf32> to vector<2x8x8xf32>
    %471 = arith.subf %467, %470 : vector<2x8x8xf32>
    %472 = math.exp %471 : vector<2x8x8xf32>
    %cst_384 = arith.constant dense<0.000000e+00> : vector<2x8xf32>
    %473 = vector.multi_reduction <add>, %472, %cst_384 [2] : vector<2x8x8xf32> to vector<2x8xf32>
    %474 = vector.shape_cast %473 : vector<2x8xf32> to vector<2x8x1xf32>
    %475 = tpu.reciprocal %474 {approx = true} : vector<2x8x1xf32> -> vector<2x8x1xf32>
    %476 = vector.broadcast %475 : vector<2x8x1xf32> to vector<2x8x8xf32>
    %477 = arith.mulf %472, %476 : vector<2x8x8xf32>
    %478 = arith.truncf %477 : vector<2x8x8xf32> to vector<2x8x8xbf16>
    %479 = arith.truncf %465 : vector<2x8x8xf32> to vector<2x8x8xbf16>
    "tpu.trace_start"() <{level = 10 : i32, message = "bqk,bkd->bqd"}> : () -> ()
    %cst_385 = arith.constant dense<0.000000e+00> : vector<2x8x8xf32>
    %480 = tpu.matmul %478, %479, %cst_385 {dimension_numbers = #tpu.dot_dimension_numbers<[2], [1], [1], [2], [0, 0, 0, 1, 1, 2], [0], [0]>} : vector<2x8x8xbf16>, vector<2x8x8xbf16>, vector<2x8x8xf32> -> vector<2x8x8xf32>
    "tpu.trace_stop"() : () -> ()
    %481 = vector.shape_cast %480 : vector<2x8x8xf32> to vector<16x8xf32>
    %482 = arith.truncf %481 : vector<16x8xf32> to vector<16x8xbf16>
    %c1_386 = arith.constant 1 : index
    %c3_387 = arith.constant 3 : index
    %c0_388 = arith.constant 0 : index
    %c0_389 = arith.constant 0 : index
    %483 = vector.load %arg6[%c1_386, %c3_387, %c0_388, %c0_389] : memref<2x4x8x32xbf16, #tpu.memory_space<vmem>>, vector<1x1x8x32xbf16>
    %484 = vector.shape_cast %483 : vector<1x1x8x32xbf16> to vector<8x32xbf16>
    %cst_390 = arith.constant dense<0.000000e+00> : vector<16x32xf32>
    %485 = tpu.matmul %482, %484, %cst_390 {dimension_numbers = #tpu.dot_dimension_numbers<[1], [0], [0], [1], [0, 0, 1, 1], [], []>} : vector<16x8xbf16>, vector<8x32xbf16>, vector<16x32xf32> -> vector<16x32xf32>
    %486 = arith.addf %441, %485 : vector<16x32xf32>
    %487 = arith.addf %278, %486 : vector<16x32xf32>
    %c1_391 = arith.constant 1 : index
    %c0_392 = arith.constant 0 : index
    %c0_393 = arith.constant 0 : index
    %488 = vector.load %arg7[%c1_391, %c0_392, %c0_393] : memref<2x1x32xf32, #tpu.memory_space<vmem>>, vector<1x1x32xf32>
    %489 = vector.shape_cast %488 : vector<1x1x32xf32> to vector<1x32xf32>
    %490 = vector.broadcast %489 : vector<1x32xf32> to vector<16x32xf32>
    %491 = arith.addf %487, %490 : vector<16x32xf32>
    %c3_394 = arith.constant 3 : index
    %c0_395 = arith.constant 0 : index
    %c0_396 = arith.constant 0 : index
    %492 = vector.load %arg2[%c3_394, %c0_395, %c0_396] : memref<5x1x32xf32, #tpu.memory_space<vmem>>, vector<1x1x32xf32>
    %493 = vector.shape_cast %492 : vector<1x1x32xf32> to vector<1x32xf32>
    %c3_397 = arith.constant 3 : index
    %c0_398 = arith.constant 0 : index
    %c0_399 = arith.constant 0 : index
    %494 = vector.load %arg3[%c3_397, %c0_398, %c0_399] : memref<5x1x32xf32, #tpu.memory_space<vmem>>, vector<1x1x32xf32>
    %495 = vector.shape_cast %494 : vector<1x1x32xf32> to vector<1x32xf32>
    %cst_400 = arith.constant dense<0.000000e+00> : vector<16xf32>
    %496 = vector.multi_reduction <add>, %491, %cst_400 [1] : vector<16x32xf32> to vector<16xf32>
    %497 = vector.shape_cast %496 : vector<16xf32> to vector<16x1xf32>
    %cst_401 = arith.constant 3.200000e+01 : f32
    %498 = vector.broadcast %cst_401 : f32 to vector<16x1xf32>
    %499 = arith.divf %497, %498 : vector<16x1xf32>
    %500 = vector.broadcast %499 : vector<16x1xf32> to vector<16x32xf32>
    %501 = arith.subf %491, %500 : vector<16x32xf32>
    %502 = arith.mulf %501, %501 : vector<16x32xf32>
    %cst_402 = arith.constant dense<0.000000e+00> : vector<16xf32>
    %503 = vector.multi_reduction <add>, %502, %cst_402 [1] : vector<16x32xf32> to vector<16xf32>
    %504 = vector.shape_cast %503 : vector<16xf32> to vector<16x1xf32>
    %cst_403 = arith.constant 3.200000e+01 : f32
    %505 = vector.broadcast %cst_403 : f32 to vector<16x1xf32>
    %506 = arith.divf %504, %505 : vector<16x1xf32>
    %507 = vector.broadcast %499 : vector<16x1xf32> to vector<16x32xf32>
    %508 = arith.subf %491, %507 : vector<16x32xf32>
    %cst_404 = arith.constant 9.99999974E-6 : f32
    %509 = vector.broadcast %cst_404 : f32 to vector<16x1xf32>
    %510 = arith.addf %506, %509 : vector<16x1xf32>
    %511 = math.rsqrt %510 : vector<16x1xf32>
    %512 = vector.broadcast %511 : vector<16x1xf32> to vector<16x32xf32>
    %513 = arith.mulf %508, %512 : vector<16x32xf32>
    %514 = vector.broadcast %493 : vector<1x32xf32> to vector<16x32xf32>
    %515 = arith.mulf %513, %514 : vector<16x32xf32>
    %516 = vector.broadcast %495 : vector<1x32xf32> to vector<16x32xf32>
    %517 = arith.addf %515, %516 : vector<16x32xf32>
    %518 = arith.truncf %517 : vector<16x32xf32> to vector<16x32xbf16>
    %c1_405 = arith.constant 1 : index
    %c0_406 = arith.constant 0 : index
    %c0_407 = arith.constant 0 : index
    %519 = vector.load %arg8[%c1_405, %c0_406, %c0_407] : memref<2x32x128xbf16, #tpu.memory_space<vmem>>, vector<1x32x128xbf16>
    %520 = vector.shape_cast %519 : vector<1x32x128xbf16> to vector<32x128xbf16>
    %cst_408 = arith.constant dense<0.000000e+00> : vector<16x128xf32>
    %521 = tpu.matmul %518, %520, %cst_408 {dimension_numbers = #tpu.dot_dimension_numbers<[1], [0], [0], [1], [0, 0, 1, 1], [], []>} : vector<16x32xbf16>, vector<32x128xbf16>, vector<16x128xf32> -> vector<16x128xf32>
    %c1_409 = arith.constant 1 : index
    %c0_410 = arith.constant 0 : index
    %c0_411 = arith.constant 0 : index
    %522 = vector.load %arg9[%c1_409, %c0_410, %c0_411] : memref<2x1x128xf32, #tpu.memory_space<vmem>>, vector<1x1x128xf32>
    %523 = vector.shape_cast %522 : vector<1x1x128xf32> to vector<1x128xf32>
    %524 = vector.broadcast %523 : vector<1x128xf32> to vector<16x128xf32>
    %525 = arith.addf %521, %524 : vector<16x128xf32>
    %cst_412 = arith.constant 1.702000e+00 : f32
    %526 = vector.broadcast %cst_412 : f32 to vector<16x128xf32>
    %527 = arith.mulf %526, %525 : vector<16x128xf32>
    %528 = arith.negf %527 : vector<16x128xf32>
    %529 = math.exp %528 : vector<16x128xf32>
    %cst_413 = arith.constant 1.000000e+00 : f32
    %530 = vector.broadcast %cst_413 : f32 to vector<16x128xf32>
    %531 = arith.addf %530, %529 : vector<16x128xf32>
    %532 = arith.divf %530, %531 : vector<16x128xf32>
    %533 = arith.mulf %525, %532 : vector<16x128xf32>
    %534 = arith.truncf %533 : vector<16x128xf32> to vector<16x128xbf16>
    %c1_414 = arith.constant 1 : index
    %c0_415 = arith.constant 0 : index
    %c0_416 = arith.constant 0 : index
    %535 = vector.load %arg10[%c1_414, %c0_415, %c0_416] : memref<2x128x32xbf16, #tpu.memory_space<vmem>>, vector<1x128x32xbf16>
    %536 = vector.shape_cast %535 : vector<1x128x32xbf16> to vector<128x32xbf16>
    %cst_417 = arith.constant dense<0.000000e+00> : vector<16x32xf32>
    %537 = tpu.matmul %534, %536, %cst_417 {dimension_numbers = #tpu.dot_dimension_numbers<[1], [0], [0], [1], [0, 0, 1, 1], [], []>} : vector<16x128xbf16>, vector<128x32xbf16>, vector<16x32xf32> -> vector<16x32xf32>
    %c1_418 = arith.constant 1 : index
    %c0_419 = arith.constant 0 : index
    %c0_420 = arith.constant 0 : index
    %538 = vector.load %arg11[%c1_418, %c0_419, %c0_420] : memref<2x1x32xf32, #tpu.memory_space<vmem>>, vector<1x1x32xf32>
    %539 = vector.shape_cast %538 : vector<1x1x32xf32> to vector<1x32xf32>
    %540 = vector.broadcast %539 : vector<1x32xf32> to vector<16x32xf32>
    %541 = arith.addf %537, %540 : vector<16x32xf32>
    %542 = arith.addf %491, %541 : vector<16x32xf32>
    %c4 = arith.constant 4 : index
    %c0_421 = arith.constant 0 : index
    %c0_422 = arith.constant 0 : index
    %543 = vector.load %arg2[%c4, %c0_421, %c0_422] : memref<5x1x32xf32, #tpu.memory_space<vmem>>, vector<1x1x32xf32>
    %544 = vector.shape_cast %543 : vector<1x1x32xf32> to vector<1x32xf32>
    %c4_423 = arith.constant 4 : index
    %c0_424 = arith.constant 0 : index
    %c0_425 = arith.constant 0 : index
    %545 = vector.load %arg3[%c4_423, %c0_424, %c0_425] : memref<5x1x32xf32, #tpu.memory_space<vmem>>, vector<1x1x32xf32>
    %546 = vector.shape_cast %545 : vector<1x1x32xf32> to vector<1x32xf32>
    %cst_426 = arith.constant dense<0.000000e+00> : vector<16xf32>
    %547 = vector.multi_reduction <add>, %542, %cst_426 [1] : vector<16x32xf32> to vector<16xf32>
    %548 = vector.shape_cast %547 : vector<16xf32> to vector<16x1xf32>
    %cst_427 = arith.constant 3.200000e+01 : f32
    %549 = vector.broadcast %cst_427 : f32 to vector<16x1xf32>
    %550 = arith.divf %548, %549 : vector<16x1xf32>
    %551 = vector.broadcast %550 : vector<16x1xf32> to vector<16x32xf32>
    %552 = arith.subf %542, %551 : vector<16x32xf32>
    %553 = arith.mulf %552, %552 : vector<16x32xf32>
    %cst_428 = arith.constant dense<0.000000e+00> : vector<16xf32>
    %554 = vector.multi_reduction <add>, %553, %cst_428 [1] : vector<16x32xf32> to vector<16xf32>
    %555 = vector.shape_cast %554 : vector<16xf32> to vector<16x1xf32>
    %cst_429 = arith.constant 3.200000e+01 : f32
    %556 = vector.broadcast %cst_429 : f32 to vector<16x1xf32>
    %557 = arith.divf %555, %556 : vector<16x1xf32>
    %558 = vector.broadcast %550 : vector<16x1xf32> to vector<16x32xf32>
    %559 = arith.subf %542, %558 : vector<16x32xf32>
    %cst_430 = arith.constant 9.99999974E-6 : f32
    %560 = vector.broadcast %cst_430 : f32 to vector<16x1xf32>
    %561 = arith.addf %557, %560 : vector<16x1xf32>
    %562 = math.rsqrt %561 : vector<16x1xf32>
    %563 = vector.broadcast %562 : vector<16x1xf32> to vector<16x32xf32>
    %564 = arith.mulf %559, %563 : vector<16x32xf32>
    %565 = vector.broadcast %544 : vector<1x32xf32> to vector<16x32xf32>
    %566 = arith.mulf %564, %565 : vector<16x32xf32>
    %567 = vector.broadcast %546 : vector<1x32xf32> to vector<16x32xf32>
    %568 = arith.addf %566, %567 : vector<16x32xf32>
    %c0_431 = arith.constant 0 : index
    %c0_432 = arith.constant 0 : index
    %569 = vector.load %arg12[%c0_431, %c0_432] : memref<16x32xf32, #tpu.memory_space<vmem>>, vector<16x32xf32>
    tpu.vector_store %arg12[%c0_431, %c0_432], %568 {strides = array<i32>} : memref<16x32xf32, #tpu.memory_space<vmem>>, vector<16x32xf32>,
    return
  }
}

</mosaic_0001>

<bundles_post_ra>
// kernel: tpu_custom_call.1
= control target key start
LH: loop header
LB: loop body
LE: loop exit
PB: predicated region body
PF: predicated region fallthrough
CT: control target
= control target key end

     0   :  { %vm68_vm0 = vcmask 261120   ;;  %s4199_s0 = inlined_call_operand.vmem [shape: f32[16,32], index: 0, kind: input, shape index: {}]   ;;  %s4200_s1 = inlined_call_operand.vmem [shape: s32[2,8], index: 1, kind: input, shape index: {}]   ;;  %s4201_s2 = inlined_call_operand.vmem [shape: f32[5,1,32], index: 2, kind: input, shape index: {}]   ;;  %s4202_s3 = inlined_call_operand.vmem [shape: f32[5,1,32], index: 3, kind: input, shape index: {}]   ;;  %s4203_s4 = inlined_call_operand.vmem [shape: bf16[2,3,4,32,8], index: 4, kind: input, shape index: {}]   ;;  %s4204_s5 = inlined_call_operand.vmem [shape: f32[2,3,4,1,8], index: 5, kind: input, shape index: {}]   ;;  %s4205_s6 = inlined_call_operand.vmem [shape: bf16[2,4,8,32], index: 6, kind: input, shape index: {}]   ;;  %s4206_s7 = inlined_call_operand.vmem [shape: f32[2,1,32], index: 7, kind: input, shape index: {}]   ;;  %s4207_s8 = inlined_call_operand.vmem [shape: bf16[2,32,128], index: 8, kind: input, shape index: {}]   ;;  %s4208_s9 = inlined_call_operand.vmem [shape: f32[2,1,128], index: 9, kind: input, shape index: {}]   ;;  %s4209_s10 = inlined_call_operand.vmem [shape: bf16[2,128,32], index: 10, kind: input, shape index: {}]   ;;  %s4210_s11 = inlined_call_operand.vmem [shape: f32[2,1,32], index: 11, kind: input, shape index: {}]   ;;  %s4211_s12 = inlined_call_operand.hbm [shape: f32[16,32], index: 12, kind: output, shape index: {}]  }
   0x1   :  { %v3551_v0 = vld [vmem:[%s4199_s0] sm:$0xff]  ;;  %v3556_v1 = vld [vmem:[%s4199_s0 + $0x8] sm:$0xff] }
   0x2   :  { %v69_v2 = vsel %vm68_vm0, %v3551_v0, 0.0  ;;  %v72_v3 = vsel %vm68_vm0, %v3556_v1, 0.0 }
   0x3   :  { %70 = vadd.xlane.f32.xlu0 %v69_v2 }
   0xb   :  { %73 = vadd.xlane.f32.xlu0 %v72_v3 }
   0xc   :  { %17 = vsyncpa [#allocation3], 0  ;;  %v3477_v4 = vmov 32.0   ;;  %v3236_v21 = vld [vmem:[%s4203_s4 + $0x8] sm:$0xff]  ;;  %v3235_v26 = vld [vmem:[%s4203_s4] sm:$0xff]  ;;  %vm240_vm8 = vcmask 64512  }
   0xd   :  { %3349 = vrcp.f32 %v3477_v4  ;;  %v3238_v22 = vld [vmem:[%s4203_s4 + $0x48] sm:$0xff]  ;;  %160 = vmatpush.bf16.msra.mxu0 %v3236_v21  ;;  %v3237_v27 = vld [vmem:[%s4203_s4 + $0x40] sm:$0xff]  ;;  %v3242_v31 = vld [vmem:[%s4203_s4 + $0x18] sm:$0xff]  ;;  %vm322_vm9 = vcmask 1043456   ;;  %v45_v21 = vlaneseq  ;;  %s2712_s29 = sshll.u32 %s4211_s12, 4  ;;  %s3482_s30 = smov 8   ;;  %s2713_s29 = int_to_ptr.hbm [resolvable:$true] %s2712_s29 }
   0xe   :  { %v3240_v23 = vld [vmem:[%s4203_s4 + $0x88] sm:$0xff]  ;;  %196 = vmatpush.bf16.msra.mxu1 %v3238_v22  ;;  %v3239_v28 = vld [vmem:[%s4203_s4 + $0x80] sm:$0xff]  ;;  %v3241_v33 = vld [vmem:[%s4203_s4 + $0x10] sm:$0xff]  ;;  %v3478_v22 = vmov 0  }
   0xf   :  { %232 = vmatpush.bf16.msra.mxu2 %v3240_v23  ;;  %v3309_v47 = vld [vmem:[%s4201_s2] ss:$0 sm:$0xff]  ;;  %v3312_v58 = vld [vmem:[%s4204_s5 + $0x4] ss:$0 sm:$0xff]  ;;  %v3244_v62 = vld [vmem:[%s4203_s4 + $0x58] sm:$0xff] }
  0x10   :  { %v3310_v51 = vld [vmem:[%s4202_s3] ss:$0 sm:$0xff]  ;;  %v3313_v3 = vld [vmem:[%s4204_s5 + $0x8] ss:$0 sm:$0xff]  ;;  %v3243_v4 = vld [vmem:[%s4203_s4 + $0x50] sm:$0xff] }
  0x11   :  { %161 = vmatpush.bf16.msra.mxu0 %v3235_v26  ;;  %v3311_v59 = vld [vmem:[%s4204_s5] ss:$0 sm:$0xff]  ;;  %v48_v26 = vand.u32 127, %v45_v21 }
  0x12   :  { %197 = vmatpush.bf16.msra.mxu1 %v3237_v27 }
  0x13   :  { %v3350_v5 = vpop.eup %3349  ;;  %233 = vmatpush.bf16.msra.mxu2 %v3239_v28 }
  0x14   :  { %v76_v6 = vmul.f32 32.0, %v3350_v5  ;;  %vm80_vm1 = vweird.f32 %v3350_v5 }
  0x16   :  { %v77_v7 = vsub.f32 1.0, %v76_v6  ;;  %388 = vmatpush.bf16.msrb.mxu1 %v3242_v31 }
  0x18   :  { %v78_v8 = vmul.f32 %v3350_v5, %v77_v7 }
  0x1a   :  { %v79_v9 = vadd.f32 %v3350_v5, %v78_v8  ;;  %389 = vmatpush.bf16.msrb.mxu1 %v3241_v33  ;;  %v3246_v8 = vld [vmem:[%s4203_s4 + $0x98] sm:$0xff] }
  0x1c   :  { %v3562_v10 = vsel %vm80_vm1, %v3350_v5, %v79_v9 }
  0x76   :  { %v71_v11 = vpop.xlane.xlu0 %70 }
  0x77   :  { %v82_v12 = vmul.f32 %v3562_v10, %v71_v11 }
  0x79   :  { %v84_v13 = vsub.f32 %v3551_v0, %v82_v12 }
  0x7b   :  { %v86_v14 = vmul.f32 %v84_v13, %v84_v13 }
  0x7d   :  { %v88_v15 = vsel %vm68_vm0, %v86_v14, 0.0 }
  0x7e   :  { %89 = vadd.xlane.f32.xlu1 %v88_v15  ;;  %v74_v16 = vpop.xlane.xlu0 %73  ;;  %v3245_v15 = vld [vmem:[%s4203_s4 + $0x90] sm:$0xff] }
  0x7f   :  { %v83_v17 = vmul.f32 %v3562_v10, %v74_v16 }
  0x81   :  { %v85_v18 = vsub.f32 %v3556_v1, %v83_v17 }
  0x83   :  { %v87_v19 = vmul.f32 %v85_v18, %v85_v18 }
  0x85   :  { %v91_v20 = vsel %vm68_vm0, %v87_v19, 0.0 }
  0x86   :  { %92 = vadd.xlane.f32.xlu1 %v91_v20  ;;  %v50_v20 = vld [vmem:[%s4200_s1] sm:$0x3] }
  0x87   :  { %vm51_vm10 = vcmp.gt.s32.totalorder %v50_v20, 0 }
  0x88   :  { %v52_v23 = vsel %vm51_vm10, 1, %v3478_v22 }
  0x89   :  { %v58_v27 = vperm.slane %v52_v23, 0 }
  0x8b   :  { %vm60_vm13 = vcmp.eq.s32.totalorder %v58_v27, 1 }
  0xf1   :  { %v90_v24 = vpop.xlane.xlu1 %89 }
  0xf2   :  { %v94_v25 = vmul.f32 %v90_v24, %v3562_v10  ;;  %v53_v24 = vrot.slane %v52_v23, 1 }
  0xf4   :  { %v96_v29 = vadd.f32 1e-05, %v94_v25  ;;  %v46_v25 = vshrl.u32 %v45_v21, 7  ;;  %vm54_vm11 = vcmp.ne.s32.totalorder %v53_v24, 0 }
  0xf5   :  { %v57_v28 = vsel %vm54_vm11, 1, %v3478_v22 }
  0xf6   :  { %3351 = vrsqrt.f32 %v96_v29  ;;  %vm104_vm3 = vweird.f32 %v96_v29  ;;  %vm49_vm12 = vcmp.le.s32.totalorder %v48_v26, %v46_v25 }
  0xf7   :  { %vm62_vm14 = vmand %vm49_vm12, %vm60_vm13 }
  0xf9   :  { %v93_v30 = vpop.xlane.xlu1 %92 }
  0xfa   :  { %v95_v32 = vmul.f32 %v93_v30, %v3562_v10  ;;  %v3479_v30 = vmov -1e+09  }
  0xfb   :  { %v3646_v31 = vsel %vm62_vm14, 0.0, %v3479_v30 }
  0xfc   :  { %v3352_v34 = vpop.eup %3351  ;;  %v97_v35 = vadd.f32 1e-05, %v95_v32 }
  0xfd   :  { %v99_v36 = vmul.f32 %v3352_v34, %v96_v29  ;;  %vm105_vm2 = vweird.f32 %v3352_v34  ;;  %v59_v29 = vperm.slane %v57_v28, 0 }
  0xfe   :  { %3353 = vrsqrt.f32 %v97_v35  ;;  %vm106_vm4 = vmor %vm104_vm3, %vm105_vm2  ;;  %vm114_vm6 = vweird.f32 %v97_v35 }
  0xff   :  { %v100_v37 = vmul.f32 %v3352_v34, %v99_v36  ;;  %vm61_vm15 = vcmp.eq.s32.totalorder %v59_v29, 1 }
 0x100   :  { %vm63_vm1 = vmand %vm49_vm12, %vm61_vm15 }
 0x101   :  { %v101_v38 = vmul.f32 0.5, %v100_v37  ;;  %v3653_v36 = vsel %vm63_vm1, 0.0, %v3479_v30 }
 0x103   :  { %v102_v39 = vsub.f32 1.5, %v101_v38  ;;  %v3314_v38 = vld [vmem:[%s4204_s5 + $0x1] ss:$0 sm:$0xff] }
 0x104   :  { %v3354_v40 = vpop.eup %3353 }
 0x105   :  { %v103_v41 = vmul.f32 %v3352_v34, %v102_v39  ;;  %v109_v42 = vmul.f32 %v3354_v40, %v97_v35  ;;  %vm115_vm5 = vweird.f32 %v3354_v40  ;;  %v3315_v35 = vld [vmem:[%s4204_s5 + $0x5] ss:$0 sm:$0xff] }
 0x106   :  { %vm116_vm7 = vmor %vm114_vm6, %vm115_vm5 }
 0x107   :  { %v110_v43 = vmul.f32 %v3354_v40, %v109_v42  ;;  %v107_v44 = vsel %vm106_vm4, %v3352_v34, %v103_v41 }
 0x108   :  { %v118_v48 = vmul.f32 %v107_v44, %v84_v13 }
 0x109   :  { %v111_v45 = vmul.f32 0.5, %v110_v43 }
 0x10a   :  { %v123_v52 = vmul.f32 %v3309_v47, %v118_v48 }
 0x10b   :  { %v112_v46 = vsub.f32 1.5, %v111_v45  ;;  %v3316_v45 = vld [vmem:[%s4204_s5 + $0x9] ss:$0 sm:$0xff] }
 0x10c   :  { %v128_v55 = vadd.f32 %v3310_v51, %v123_v52 }
 0x10d   :  { %v113_v49 = vmul.f32 %v3354_v40, %v112_v46 }
 0x10f   :  { %v117_v50 = vsel %vm116_vm7, %v3354_v40, %v113_v49 }
 0x110   :  { %v119_v53 = vmul.f32 %v117_v50, %v85_v18 }
 0x112   :  { %v124_v54 = vmul.f32 %v3309_v47, %v119_v53 }
 0x114   :  { %v129_v56 = vadd.f32 %v3310_v51, %v124_v54 }
 0x116   :  { %v3602_v57 = vpack.c.bf16 %v129_v56, %v128_v55 }
 0x118   :  { %2732 = vmatmul.msk.bf16.vlgmr.msra.gmra.mxu0 %vm68_vm0, %v3602_v57  ;;  %2746 = vmatmul.msk.bf16.vlgmr.msra.gmra.mxu1 %vm68_vm0, %v3602_v57 }
 0x119   :  { %2760 = vmatmul.msk.bf16.vlgmr.msra.gmra.mxu2 %vm68_vm0, %v3602_v57 }
 0x128   :  { %2780 = vmatmul.msk.bf16.vlgmr.msrb.gmra.mxu1 %vm68_vm0, %v3602_v57 }
 0x195   :  { %v163_v60 = vpop.f32.mrf.mxu0  ;;  %v199_v61 = vpop.f32.mrf.mxu1 }
 0x196   :  { %v200_v63 = vadd.f32 %v3312_v58, %v199_v61  ;;  %v164_v2 = vadd.f32 %v3311_v59, %v163_v60 }
 0x198   :  { %2761 = vmatpush.xpose.msk.msrb.mxu2 %vm240_vm8, %v200_v63 }
 0x19b   :  { %2762 = vmatmul.msk.f32.vlgmr.msrb.gmra.mxu2 %vm240_vm8, %v164_v2 }
 0x19c   :  { %424 = vmatpush.bf16.msra.mxu2 %v3244_v62  ;;  %v235_v5 = vpop.f32.mrf.mxu2 }
 0x19d   :  { %v236_v6 = vadd.f32 %v3313_v3, %v235_v5  ;;  %v201_v7 = vpop.f32.mrf.mxu1  ;;  %v165_v9 = vpop.f32.mrf.mxu0 }
 0x19e   :  { %v202_v11 = vadd.f32 %v3312_v58, %v201_v7  ;;  %v166_v13 = vadd.f32 %v3311_v59, %v165_v9 }
 0x19f   :  { %v317_v12 = vpack.c.bf16 %v236_v6, %v236_v6 }
 0x1a0   :  { %425 = vmatpush.bf16.msra.mxu2 %v3243_v4  ;;  %2763 = vmatpush.xpose.msk.msra.mxu3 %vm240_vm8, %v202_v11 }
 0x1a1   :  { %v324_v14 = vsel %vm322_vm9, %v317_v12, 0 }
 0x1a2   :  { %333 = vmatpush.bf16.msrb.mxu0 %v324_v14 }
 0x1a3   :  { %2764 = vmatmul.msk.f32.vlgmr.msra.gmra.mxu3 %vm240_vm8, %v166_v13  ;;  %2794 = vmatmul.msk.bf16.vlgmr.msra.gmra.mxu2 %vm68_vm0, %v3602_v57 }
 0x1a4   :  { %460 = vmatpush.bf16.msrb.mxu3 %v3246_v8  ;;  %v237_v16 = vpop.f32.mrf.mxu2 }
 0x1a5   :  { %v238_v17 = vadd.f32 %v3313_v3, %v237_v16  ;;  %v391_v37 = vpop.f32.mrf.mxu1 }
 0x1a6   :  { %v392_v44 = vadd.f32 %v3314_v38, %v391_v37  ;;  %v3247_v37 = vld [vmem:[%s4203_s4 + $0x20] sm:$0xff] }
 0x1a7   :  { %v318_v18 = vpack.c.bf16 %v238_v17, %v238_v17 }
 0x1a8   :  { %461 = vmatpush.bf16.msrb.mxu3 %v3245_v15 }
 0x1a9   :  { %v343_v19 = vsel %vm322_vm9, %v318_v18, 0 }
 0x1aa   :  { %352 = vmatpush.bf16.msra.mxu0 %v343_v19 }
 0x1ab   :  { %2808 = vmatmul.msk.bf16.vlgmr.msrb.gmra.mxu3 %vm68_vm0, %v3602_v57 }
 0x1ad   :  { %v393_v48 = vpop.f32.mrf.mxu1 }
 0x1ae   :  { %v394_v52 = vadd.f32 %v3314_v38, %v393_v48  ;;  %v3250_v38 = vld [vmem:[%s4203_s4 + $0x68] sm:$0xff] }
 0x21e   :  { %v264_v32 = vpop.f32.mrf.mxu2 }
 0x21f   :  { %v265_v33 = vadd.f32 %v264_v32, %v3646_v31 }
 0x221   :  { %v293_v34 = vsel %vm240_vm8, %v265_v33, -inf }
 0x222   :  { %294 = vmax.xlane.f32.xlu2 %v293_v34 }
 0x226   :  { %v290_v39 = vpop.f32.mrf.mxu3  ;;  %v427_v40 = vpop.f32.mrf.mxu2 }
 0x227   :  { %v291_v41 = vadd.f32 %v290_v39, %v3653_v36  ;;  %v428_v42 = vadd.f32 %v3315_v35, %v427_v40  ;;  %v3249_v40 = vld [vmem:[%s4203_s4 + $0x60] sm:$0xff] }
 0x229   :  { %2809 = vmatpush.xpose.msk.msra.mxu1 %vm240_vm8, %v428_v42  ;;  %v296_v43 = vsel %vm240_vm8, %v291_v41, -inf }
 0x22a   :  { %297 = vmax.xlane.f32.xlu2 %v296_v43 }
 0x22c   :  { %2810 = vmatmul.msk.f32.vlgmr.msra.gmra.mxu1 %vm240_vm8, %v392_v44 }
 0x22e   :  { %v429_v46 = vpop.f32.mrf.mxu2  ;;  %v463_v47 = vpop.f32.mrf.mxu3 }
 0x22f   :  { %v430_v49 = vadd.f32 %v3315_v35, %v429_v46  ;;  %v464_v50 = vadd.f32 %v3316_v45, %v463_v47  ;;  %v3248_v35 = vld [vmem:[%s4203_s4 + $0x28] sm:$0xff] }
 0x231   :  { %v544_v51 = vpack.c.bf16 %v464_v50, %v464_v50  ;;  %2811 = vmatpush.xpose.msk.msrb.mxu1 %vm240_vm8, %v430_v49 }
 0x233   :  { %v550_v53 = vsel %vm322_vm9, %v544_v51, 0 }
 0x234   :  { %2812 = vmatmul.msk.f32.vlgmr.msrb.gmra.mxu1 %vm240_vm8, %v394_v52  ;;  %559 = vmatpush.bf16.msrb.mxu2 %v550_v53  ;;  %v2815_v53 = vld [vmem:[%s4205_s6 + $0x4] sm:$0xf] }
 0x236   :  { %v465_v11 = vpop.f32.mrf.mxu3 }
 0x237   :  { %v466_v12 = vadd.f32 %v3316_v45, %v465_v11 }
 0x238   :  { %655 = vmatpush.bf16.msra.mxu2 %v3248_v35 }
 0x239   :  { %v545_v14 = vpack.c.bf16 %v466_v12, %v466_v12 }
 0x23b   :  { %v569_v19 = vsel %vm322_vm9, %v545_v14, 0 }
 0x23c   :  { %656 = vmatpush.bf16.msra.mxu2 %v3247_v37 }
 0x295   :  { %v295_v54 = vpop.xlane.xlu2 %294 }
 0x296   :  { %v299_v55 = vsub.f32 %v265_v33, %v295_v54  ;;  %v359_v33 = vld [vmem:[%s4205_s6] sm:$0xf]  ;;  %v591_v54 = vsel %vm322_vm9, %v2815_v53, 0 }
 0x297   :  { %v611_v34 = vsel %vm322_vm9, %v359_v33, 0  ;;  %600 = vmatpush.bf16.msra.mxu1 %v591_v54 }
 0x298   :  { %v301_v56 = vmul.f32 1.442695, %v299_v55  ;;  %620 = vmatpush.bf16.msra.mxu3 %v611_v34  ;;  %v3252_v55 = vld [vmem:[%s4203_s4 + $0xa8] sm:$0xff] }
 0x29a   :  { %3355 = vpow2.f32 %v301_v56  ;;  %v3251_v56 = vld [vmem:[%s4203_s4 + $0xa0] sm:$0xff] }
 0x29b   :  { %727 = vmatpush.bf16.msrb.mxu1 %v3252_v55 }
 0x29d   :  { %v298_v59 = vpop.xlane.xlu2 %297 }
 0x29e   :  { %v300_v61 = vsub.f32 %v291_v41, %v298_v59 }
 0x29f   :  { %728 = vmatpush.bf16.msrb.mxu1 %v3251_v56 }
 0x2a0   :  { %v3356_v58 = vpop.eup %3355  ;;  %v303_v62 = vmul.f32 1.442695, %v300_v61 }
 0x2a1   :  { %v305_v60 = vsel %vm240_vm8, %v3356_v58, 0.0 }
 0x2a2   :  { %306 = vadd.xlane.f32.xlu2 %v305_v60  ;;  %3357 = vpow2.f32 %v303_v62 }
 0x2a8   :  { %v3358_v4 = vpop.eup %3357 }
 0x2a9   :  { %v491_v63 = vpop.f32.mrf.mxu1  ;;  %v308_v8 = vsel %vm240_vm8, %v3358_v4, 0.0 }
 0x2aa   :  { %v492_v2 = vadd.f32 %v491_v63, %v3646_v31  ;;  %v3318_v63 = vld [vmem:[%s4204_s5 + $0x6] ss:$0 sm:$0xff] }
 0x2ac   :  { %v520_v3 = vsel %vm240_vm8, %v492_v2, -inf }
 0x2ad   :  { %521 = vmax.xlane.f32.xlu0 %v520_v3  ;;  %v3317_v3 = vld [vmem:[%s4204_s5 + $0x2] ss:$0 sm:$0xff] }
 0x2b1   :  { %v517_v5 = vpop.f32.mrf.mxu1 }
 0x2b2   :  { %v518_v6 = vadd.f32 %v517_v5, %v3653_v36 }
 0x2b4   :  { %v523_v7 = vsel %vm240_vm8, %v518_v6, -inf }
 0x2b5   :  { %524 = vmax.xlane.f32.xlu1 %v523_v7  ;;  %309 = vadd.xlane.f32.xlu0 %v308_v8  ;;  %v3254_v8 = vld [vmem:[%s4203_s4 + $0x38] sm:$0xff] }
 0x315   :  { %v307_v9 = vpop.xlane.xlu2 %306 }
 0x316   :  { %3359 = vrcp.f32 %v307_v9 }
 0x31c   :  { %v3360_v13 = vpop.eup %3359 }
 0x31d   :  { %v313_v15 = vmul.f32 %v3360_v13, %v3356_v58  ;;  %v3253_v13 = vld [vmem:[%s4203_s4 + $0x30] sm:$0xff] }
 0x31f   :  { %v315_v16 = vpack.c.bf16 %v313_v15, %v313_v15 }
 0x320   :  { %v522_v17 = vpop.xlane.xlu0 %521 }
 0x321   :  { %v526_v18 = vsub.f32 %v492_v2, %v522_v17  ;;  %2765 = vmatmul.msk.bf16.vlgmr.msrb.gmra.mxu0 %vm240_vm8, %v315_v16  ;;  %v3319_v17 = vld [vmem:[%s4204_s5 + $0xa] ss:$0 sm:$0xff] }
 0x322   :  { %578 = vmatpush.bf16.msrb.mxu0 %v569_v19 }
 0x323   :  { %v528_v20 = vmul.f32 1.442695, %v526_v18 }
 0x325   :  { %3361 = vpow2.f32 %v528_v20 }
 0x328   :  { %v525_v21 = vpop.xlane.xlu1 %524  ;;  %v310_v22 = vpop.xlane.xlu0 %309 }
 0x329   :  { %v527_v23 = vsub.f32 %v518_v6, %v525_v21  ;;  %3363 = vrcp.f32 %v310_v22 }
 0x32b   :  { %v3362_v24 = vpop.eup %3361  ;;  %v530_v25 = vmul.f32 1.442695, %v527_v23 }
 0x32c   :  { %v532_v26 = vsel %vm240_vm8, %v3362_v24, 0.0 }
 0x32d   :  { %3365 = vpow2.f32 %v530_v25  ;;  %533 = vadd.xlane.f32.xlu1 %v532_v26 }
 0x32f   :  { %v3364_v27 = vpop.eup %3363 }
 0x330   :  { %v314_v28 = vmul.f32 %v3364_v27, %v3358_v4 }
 0x332   :  { %v316_v29 = vpack.c.bf16 %v314_v28, %v314_v28 }
 0x333   :  { %v3366_v30 = vpop.eup %3365 }
 0x334   :  { %2766 = vmatmul.msk.bf16.vlgmr.msra.gmra.mxu0 %vm240_vm8, %v316_v29  ;;  %v535_v32 = vsel %vm240_vm8, %v3366_v30, 0.0 }
 0x335   :  { %536 = vadd.xlane.f32.xlu2 %v535_v32  ;;  %691 = vmatpush.bf16.msra.mxu0 %v3250_v38 }
 0x339   :  { %692 = vmatpush.bf16.msra.mxu0 %v3249_v40 }
 0x39e   :  { %v335_v39 = vpop.f32.mrf.mxu0 }
 0x3a0   :  { %v534_v41 = vpop.xlane.xlu1 %533 }
 0x3a1   :  { %3367 = vrcp.f32 %v534_v41 }
 0x3a6   :  { %v337_v42 = vpop.f32.mrf.mxu0 }
 0x3a7   :  { %v3368_v43 = vpop.eup %3367 }
 0x3a8   :  { %v540_v44 = vmul.f32 %v3368_v43, %v3362_v24  ;;  %v537_v45 = vpop.xlane.xlu2 %536 }
 0x3a9   :  { %3369 = vrcp.f32 %v537_v45  ;;  %v3256_v45 = vld [vmem:[%s4203_s4 + $0x78] sm:$0xff] }
 0x3aa   :  { %v542_v46 = vpack.c.bf16 %v540_v44, %v540_v44 }
 0x3ac   :  { %2813 = vmatmul.msk.bf16.vlgmr.msrb.gmra.mxu2 %vm240_vm8, %v542_v46  ;;  %v3255_v46 = vld [vmem:[%s4203_s4 + $0x70] sm:$0xff] }
 0x3af   :  { %v3370_v47 = vpop.eup %3369 }
 0x3b0   :  { %v541_v48 = vmul.f32 %v3370_v47, %v3366_v30  ;;  %v3258_v47 = vld [vmem:[%s4203_s4 + $0xb8] sm:$0xff] }
 0x3b1   :  { %v354_v49 = vpop.f32.mrf.mxu0 }
 0x3b2   :  { %v543_v50 = vpack.c.bf16 %v541_v48, %v541_v48  ;;  %v358_v51 = vpack.c.bf16 %v354_v49, %v335_v39  ;;  %v3257_v48 = vld [vmem:[%s4203_s4 + $0xb0] sm:$0xff] }
 0x3b4   :  { %2814 = vmatmul.msk.bf16.vlgmr.msrb.gmra.mxu0 %vm240_vm8, %v543_v50  ;;  %2817 = vmatmul.msk.bf16.vlgmr.msra.gmra.mxu3 %vm240_vm8, %v358_v51 }
 0x3b9   :  { %v356_v52 = vpop.f32.mrf.mxu0 }
 0x3bc   :  { %2831 = vmatmul.msk.bf16.vlgmr.msra.gmra.mxu2 %vm68_vm0, %v3602_v57 }
 0x3c4   :  { %2845 = vmatmul.msk.bf16.vlgmr.msra.gmra.mxu0 %vm68_vm0, %v3602_v57 }
 0x42f   :  { %v561_v58 = vpop.f32.mrf.mxu2 }
 0x431   :  { %v580_v59 = vpop.f32.mrf.mxu0 }
 0x432   :  { %v584_v60 = vpack.c.bf16 %v580_v59, %v561_v58  ;;  %v2866_v58 = vld [vmem:[%s4205_s6 + $0x8] sm:$0xf] }
 0x433   :  { %v858_v59 = vsel %vm322_vm9, %v2866_v58, 0 }
 0x434   :  { %2816 = vmatmul.msk.bf16.vlgmr.msra.gmra.mxu1 %vm240_vm8, %v584_v60 }
 0x435   :  { %867 = vmatpush.bf16.msra.mxu1 %v858_v59 }
 0x437   :  { %v563_v61 = vpop.f32.mrf.mxu2  ;;  %v3735_v15 = vpop.f32.mrf.mxu3 }
 0x439   :  { %v582_v62 = vpop.f32.mrf.mxu0 }
 0x43f   :  { %v658_v2 = vpop.f32.mrf.mxu2  ;;  %v3742_v19 = vpop.f32.mrf.mxu3 }
 0x440   :  { %v659_v6 = vadd.f32 %v3317_v3, %v658_v2 }
 0x441   :  { %v694_v4 = vpop.f32.mrf.mxu0 }
 0x442   :  { %v695_v5 = vadd.f32 %v3318_v63, %v694_v4 }
 0x444   :  { %2859 = vmatmul.msk.bf16.vlgmr.msrb.gmra.mxu1 %vm68_vm0, %v3602_v57  ;;  %2860 = vmatpush.xpose.msk.msrb.mxu3 %vm240_vm8, %v695_v5  ;;  %v3320_v5 = vld [vmem:[%s4204_s5 + $0x3] ss:$0 sm:$0xff] }
 0x447   :  { %2861 = vmatmul.msk.f32.vlgmr.msrb.gmra.mxu3 %vm240_vm8, %v659_v6  ;;  %v660_v9 = vpop.f32.mrf.mxu2 }
 0x448   :  { %v661_v12 = vadd.f32 %v3317_v3, %v660_v9  ;;  %v3321_v3 = vld [vmem:[%s4204_s5 + $0x7] ss:$0 sm:$0xff] }
 0x449   :  { %v696_v7 = vpop.f32.mrf.mxu0 }
 0x44a   :  { %v697_v11 = vadd.f32 %v3318_v63, %v696_v7 }
 0x44c   :  { %2862 = vmatpush.xpose.msk.msrb.mxu2 %vm240_vm8, %v697_v11 }
 0x44f   :  { %2863 = vmatmul.msk.f32.vlgmr.msrb.gmra.mxu2 %vm240_vm8, %v661_v12 }
 0x450   :  { %904 = vmatpush.bf16.msra.mxu2 %v3254_v8 }
 0x454   :  { %905 = vmatpush.bf16.msra.mxu2 %v3253_v13 }
 0x457   :  { %2881 = vmatmul.msk.bf16.vlgmr.msra.gmra.mxu2 %vm68_vm0, %v3602_v57 }
 0x4b1   :  { %v3733_v14 = vpop.f32.mrf.mxu1 }
 0x4b9   :  { %v3737_v16 = vpop.f32.mrf.mxu1 }
 0x4c1   :  { %v730_v18 = vpop.f32.mrf.mxu1 }
 0x4c2   :  { %v731_v20 = vadd.f32 %v3319_v17, %v730_v18 }
 0x4c4   :  { %v811_v21 = vpack.c.bf16 %v731_v20, %v731_v20 }
 0x4c6   :  { %v817_v22 = vsel %vm322_vm9, %v811_v21, 0 }
 0x4c7   :  { %826 = vmatpush.bf16.msra.mxu3 %v817_v22 }
 0x4c9   :  { %v732_v23 = vpop.f32.mrf.mxu1 }
 0x4ca   :  { %v733_v24 = vadd.f32 %v3319_v17, %v732_v23  ;;  %v758_v25 = vpop.f32.mrf.mxu3 }
 0x4cb   :  { %v759_v26 = vadd.f32 %v758_v25, %v3646_v31  ;;  %940 = vmatpush.bf16.msrb.mxu3 %v3256_v45 }
 0x4cc   :  { %v812_v27 = vpack.c.bf16 %v733_v24, %v733_v24 }
 0x4cd   :  { %v787_v28 = vsel %vm240_vm8, %v759_v26, -inf }
 0x4ce   :  { %v836_v29 = vsel %vm322_vm9, %v812_v27, 0  ;;  %788 = vmax.xlane.f32.xlu0 %v787_v28 }
 0x4cf   :  { %845 = vmatpush.bf16.msrb.mxu0 %v836_v29  ;;  %941 = vmatpush.bf16.msrb.mxu3 %v3255_v46  ;;  %v625_v29 = vadd.f32 %v3742_v19, %v3737_v16 }
 0x4d2   :  { %v784_v30 = vpop.f32.mrf.mxu2 }
 0x4d3   :  { %v785_v32 = vadd.f32 %v784_v30, %v3653_v36  ;;  %976 = vmatpush.bf16.msra.mxu0 %v3258_v47 }
 0x4d5   :  { %v790_v33 = vsel %vm240_vm8, %v785_v32, -inf }
 0x4d6   :  { %791 = vmax.xlane.f32.xlu1 %v790_v33 }
 0x4d7   :  { %977 = vmatpush.bf16.msra.mxu0 %v3257_v48 }
 0x4da   :  { %v907_v4 = vpop.f32.mrf.mxu2 }
 0x4db   :  { %v908_v11 = vadd.f32 %v3320_v5, %v907_v4 }
 0x4e2   :  { %v909_v18 = vpop.f32.mrf.mxu2 }
 0x4e3   :  { %v910_v23 = vadd.f32 %v3320_v5, %v909_v18 }
 0x541   :  { %v789_v34 = vpop.xlane.xlu0 %788 }
 0x542   :  { %v793_v35 = vsub.f32 %v759_v26, %v789_v34  ;;  %v623_v26 = vadd.f32 %v3735_v15, %v3733_v14 }
 0x544   :  { %v795_v37 = vmul.f32 1.442695, %v793_v35 }
 0x546   :  { %3371 = vpow2.f32 %v795_v37 }
 0x549   :  { %v792_v38 = vpop.xlane.xlu1 %791 }
 0x54a   :  { %v794_v39 = vsub.f32 %v785_v32, %v792_v38 }
 0x54c   :  { %v3372_v40 = vpop.eup %3371  ;;  %v797_v41 = vmul.f32 1.442695, %v794_v39 }
 0x54d   :  { %v799_v42 = vsel %vm240_vm8, %v3372_v40, 0.0 }
 0x54e   :  { %3373 = vpow2.f32 %v797_v41  ;;  %800 = vadd.xlane.f32.xlu2 %v799_v42 }
 0x554   :  { %v3374_v43 = vpop.eup %3373 }
 0x555   :  { %v802_v44 = vsel %vm240_vm8, %v3374_v43, 0.0 }
 0x556   :  { %803 = vadd.xlane.f32.xlu0 %v802_v44 }
 0x5c1   :  { %v801_v49 = vpop.xlane.xlu2 %800 }
 0x5c2   :  { %3375 = vrcp.f32 %v801_v49 }
 0x5c8   :  { %v3376_v50 = vpop.eup %3375 }
 0x5c9   :  { %v807_v51 = vmul.f32 %v3376_v50, %v3372_v40  ;;  %v804_v52 = vpop.xlane.xlu0 %803 }
 0x5ca   :  { %3377 = vrcp.f32 %v804_v52 }
 0x5cb   :  { %v809_v53 = vpack.c.bf16 %v807_v51, %v807_v51 }
 0x5cd   :  { %2864 = vmatmul.msk.bf16.vlgmr.msra.gmra.mxu3 %vm240_vm8, %v809_v53 }
 0x5d0   :  { %v3378_v54 = vpop.eup %3377 }
 0x5d1   :  { %v808_v55 = vmul.f32 %v3378_v54, %v3374_v43  ;;  %v2916_v54 = vld [vmem:[%s4205_s6 + $0xc] sm:$0xf] }
 0x5d3   :  { %v810_v56 = vpack.c.bf16 %v808_v55, %v808_v55  ;;  %v1107_v55 = vsel %vm322_vm9, %v2916_v54, 0  ;;  %v3266_v54 = vld [vmem:[%s4209_s10 + $0x28] sm:$0xff] }
 0x5d4   :  { %1116 = vmatpush.bf16.msra.mxu3 %v1107_v55  ;;  %v3265_v55 = vld [vmem:[%s4209_s10 + $0x20] sm:$0xff] }
 0x5d5   :  { %2865 = vmatmul.msk.bf16.vlgmr.msrb.gmra.mxu0 %vm240_vm8, %v810_v56 }
 0x5dd   :  { %2895 = vmatmul.msk.bf16.vlgmr.msrb.gmra.mxu3 %vm68_vm0, %v3602_v57 }
 0x5e5   :  { %2909 = vmatmul.msk.bf16.vlgmr.msra.gmra.mxu0 %vm68_vm0, %v3602_v57  ;;  %v3322_v57 = vld [vmem:[%s4204_s5 + $0xb] ss:$0 sm:$0xff] }
 0x650   :  { %v828_v60 = vpop.f32.mrf.mxu3 }
 0x652   :  { %v847_v61 = vpop.f32.mrf.mxu0 }
 0x653   :  { %v851_v62 = vpack.c.bf16 %v847_v61, %v828_v60 }
 0x655   :  { %2867 = vmatmul.msk.bf16.vlgmr.msra.gmra.mxu1 %vm240_vm8, %v851_v62 }
 0x658   :  { %v830_v63 = vpop.f32.mrf.mxu3 }
 0x65a   :  { %v849_v2 = vpop.f32.mrf.mxu0 }
 0x65b   :  { %v3323_v2 = vld [vmem:[%s4206_s7] ss:$0 sm:$0xff] }
 0x660   :  { %v943_v6 = vpop.f32.mrf.mxu3 }
 0x661   :  { %v944_v7 = vadd.f32 %v3321_v3, %v943_v6 }
 0x662   :  { %v979_v8 = vpop.f32.mrf.mxu0 }
 0x663   :  { %v980_v9 = vadd.f32 %v3322_v57, %v979_v8  ;;  %2910 = vmatpush.xpose.msk.msrb.mxu1 %vm240_vm8, %v944_v7 }
 0x665   :  { %v1060_v12 = vpack.c.bf16 %v980_v9, %v980_v9 }
 0x666   :  { %2911 = vmatmul.msk.f32.vlgmr.msrb.gmra.mxu1 %vm240_vm8, %v908_v11 }
 0x667   :  { %v1066_v13 = vsel %vm322_vm9, %v1060_v12, 0 }
 0x668   :  { %v945_v17 = vpop.f32.mrf.mxu3  ;;  %1075 = vmatpush.bf16.msra.mxu1 %v1066_v13 }
 0x669   :  { %v946_v20 = vadd.f32 %v3321_v3, %v945_v17 }
 0x66a   :  { %v981_v21 = vpop.f32.mrf.mxu0 }
 0x66b   :  { %v982_v22 = vadd.f32 %v3322_v57, %v981_v21  ;;  %2912 = vmatpush.xpose.msk.msrb.mxu2 %vm240_vm8, %v946_v20 }
 0x66d   :  { %v1061_v24 = vpack.c.bf16 %v982_v22, %v982_v22 }
 0x66e   :  { %2913 = vmatmul.msk.f32.vlgmr.msrb.gmra.mxu2 %vm240_vm8, %v910_v23  ;;  %v3260_v23 = vld [vmem:[%s4207_s8 + $0x8] sm:$0xff] }
 0x66f   :  { %v1085_v25 = vsel %vm322_vm9, %v1061_v24, 0  ;;  %1221 = vmatpush.bf16.msrb.mxu0 %v3260_v23 }
 0x670   :  { %1094 = vmatpush.bf16.msra.mxu2 %v1085_v25 }
 0x6d2   :  { %v869_v27 = vpop.f32.mrf.mxu1 }
 0x6d3   :  { %v874_v28 = vadd.f32 %v869_v27, %v623_v26  ;;  %v3259_v27 = vld [vmem:[%s4207_s8] sm:$0xff] }
 0x6d4   :  { %1222 = vmatpush.bf16.msrb.mxu0 %v3259_v27 }
 0x6da   :  { %v871_v30 = vpop.f32.mrf.mxu1 }
 0x6db   :  { %v875_v32 = vadd.f32 %v871_v30, %v625_v29 }
 0x6e3   :  { %v1007_v33 = vpop.f32.mrf.mxu1 }
 0x6e4   :  { %v1008_v34 = vadd.f32 %v1007_v33, %v3646_v31 }
 0x6e6   :  { %v1036_v35 = vsel %vm240_vm8, %v1008_v34, -inf }
 0x6e7   :  { %1037 = vmax.xlane.f32.xlu2 %v1036_v35 }
 0x6f1   :  { %v1033_v37 = vpop.f32.mrf.mxu2 }
 0x6f2   :  { %v1034_v38 = vadd.f32 %v1033_v37, %v3653_v36 }
 0x6f4   :  { %v1039_v39 = vsel %vm240_vm8, %v1034_v38, -inf }
 0x6f5   :  { %1040 = vmax.xlane.f32.xlu1 %v1039_v39 }
 0x75a   :  { %v1038_v14 = vpop.xlane.xlu2 %1037 }
 0x75b   :  { %v1042_v15 = vsub.f32 %v1008_v34, %v1038_v14 }
 0x75d   :  { %v1044_v40 = vmul.f32 1.442695, %v1042_v15 }
 0x75f   :  { %3379 = vpow2.f32 %v1044_v40 }
 0x765   :  { %v3380_v41 = vpop.eup %3379 }
 0x766   :  { %v1048_v16 = vsel %vm240_vm8, %v3380_v41, 0.0 }
 0x767   :  { %1049 = vadd.xlane.f32.xlu1 %v1048_v16 }
 0x768   :  { %v1041_v19 = vpop.xlane.xlu1 %1040 }
 0x769   :  { %v1043_v42 = vsub.f32 %v1034_v38, %v1041_v19  ;;  %v3324_v19 = vld [vmem:[%s4201_s2 + $0x1] ss:$0 sm:$0xff] }
 0x76b   :  { %v1046_v43 = vmul.f32 1.442695, %v1043_v42 }
 0x76d   :  { %3381 = vpow2.f32 %v1046_v43 }
 0x773   :  { %v3382_v44 = vpop.eup %3381 }
 0x774   :  { %v1051_v45 = vsel %vm240_vm8, %v3382_v44, 0.0 }
 0x775   :  { %1052 = vadd.xlane.f32.xlu0 %v1051_v45  ;;  %v3325_v45 = vld [vmem:[%s4202_s3 + $0x1] ss:$0 sm:$0xff] }
 0x7da   :  { %v1050_v46 = vpop.xlane.xlu1 %1049 }
 0x7db   :  { %3383 = vrcp.f32 %v1050_v46 }
 0x7e1   :  { %v3384_v47 = vpop.eup %3383 }
 0x7e2   :  { %v1056_v48 = vmul.f32 %v3384_v47, %v3380_v41 }
 0x7e4   :  { %v1058_v49 = vpack.c.bf16 %v1056_v48, %v1056_v48 }
 0x7e6   :  { %2914 = vmatmul.msk.bf16.vlgmr.msra.gmra.mxu1 %vm240_vm8, %v1058_v49 }
 0x7e8   :  { %v1053_v50 = vpop.xlane.xlu0 %1052 }
 0x7e9   :  { %3385 = vrcp.f32 %v1053_v50 }
 0x7ef   :  { %v3386_v51 = vpop.eup %3385 }
 0x7f0   :  { %v1057_v52 = vmul.f32 %v3386_v51, %v3382_v44 }
 0x7f2   :  { %v1059_v53 = vpack.c.bf16 %v1057_v52, %v1057_v52  ;;  %v3268_v52 = vld [vmem:[%s4209_s10 + $0x38] sm:$0xff] }
 0x7f3   :  { %1340 = vmatpush.bf16.msrb.mxu1 %v3268_v52 }
 0x7f4   :  { %2915 = vmatmul.msk.bf16.vlgmr.msra.gmra.mxu2 %vm240_vm8, %v1059_v53  ;;  %v3267_v53 = vld [vmem:[%s4209_s10 + $0x30] sm:$0xff] }
 0x7f7   :  { %1341 = vmatpush.bf16.msrb.mxu1 %v3267_v53 }
 0x7fb   :  { %1342 = vmatpush.bf16.msrb.mxu1 %v3266_v54  ;;  %v3270_v54 = vld [vmem:[%s4203_s4 + $0xc8] sm:$0xff] }
 0x7fc   :  { %1446 = vmatpush.bf16.msrb.mxu2 %v3270_v54 }
 0x7ff   :  { %1343 = vmatpush.bf16.msrb.mxu1 %v3265_v55  ;;  %v3272_v55 = vld [vmem:[%s4203_s4 + $0x108] sm:$0xff] }
 0x800   :  { %1482 = vmatpush.bf16.msrb.mxu3 %v3272_v55 }
 0x863   :  { %v1077_v56 = vpop.f32.mrf.mxu1 }
 0x86b   :  { %v1079_v58 = vpop.f32.mrf.mxu1 }
 0x86c   :  { %v3264_v58 = vld [vmem:[%s4209_s10 + $0x18] sm:$0xff] }
 0x86d   :  { %1344 = vmatpush.bf16.msrb.mxu1 %v3264_v58 }
 0x877   :  { %v1096_v59 = vpop.f32.mrf.mxu2 }
 0x878   :  { %v1100_v60 = vpack.c.bf16 %v1096_v59, %v1077_v56  ;;  %v3326_v56 = vld [vmem:[%s4208_s9] ss:$0 sm:$0xff] }
 0x87a   :  { %2917 = vmatmul.msk.bf16.vlgmr.msra.gmra.mxu3 %vm240_vm8, %v1100_v60 }
 0x87f   :  { %v1098_v61 = vpop.f32.mrf.mxu2 }
 0x880   :  { %v3263_v61 = vld [vmem:[%s4209_s10 + $0x10] sm:$0xff] }
 0x881   :  { %1345 = vmatpush.bf16.msrb.mxu1 %v3263_v61 }
 0x8fd   :  { %v1118_v62 = vpop.f32.mrf.mxu3 }
 0x8fe   :  { %v1123_v63 = vadd.f32 %v1118_v62, %v874_v28 }
 0x900   :  { %v1125_v3 = vadd.f32 %v1123_v63, %v3551_v0 }
 0x902   :  { %v3811_v4 = vadd.f32 %v3323_v2, %v1125_v3 }
 0x904   :  { %v1137_v57 = vsel %vm68_vm0, %v3811_v4, 0.0 }
 0x905   :  { %1138 = vadd.xlane.f32.xlu2 %v1137_v57  ;;  %v1120_v5 = vpop.f32.mrf.mxu3 }
 0x906   :  { %v1124_v6 = vadd.f32 %v1120_v5, %v875_v32  ;;  %v3261_v5 = vld [vmem:[%s4209_s10] sm:$0xff] }
 0x908   :  { %v1126_v7 = vadd.f32 %v1124_v6, %v3556_v1 }
 0x90a   :  { %v3816_v8 = vadd.f32 %v3323_v2, %v1126_v7  ;;  %v3262_v2 = vld [vmem:[%s4209_s10 + $0x8] sm:$0xff] }
 0x90b   :  { %1346 = vmatpush.bf16.msrb.mxu1 %v3262_v2  ;;  %v3273_v2 = vld [vmem:[%s4203_s4 + $0x140] sm:$0xff] }
 0x90c   :  { %v1140_v9 = vsel %vm68_vm0, %v3816_v8, 0.0 }
 0x90d   :  { %1141 = vadd.xlane.f32.xlu0 %v1140_v9 }
 0x90f   :  { %1347 = vmatpush.bf16.msrb.mxu1 %v3261_v5 }
 0x978   :  { %v1139_v11 = vpop.xlane.xlu2 %1138 }
 0x979   :  { %v1143_v12 = vmul.f32 %v1139_v11, %v3562_v10 }
 0x97b   :  { %v1145_v0 = vsub.f32 %v3811_v4, %v1143_v12 }
 0x97d   :  { %v1147_v13 = vmul.f32 %v1145_v0, %v1145_v0 }
 0x97f   :  { %v1149_v17 = vsel %vm68_vm0, %v1147_v13, 0.0 }
 0x980   :  { %1150 = vadd.xlane.f32.xlu1 %v1149_v17  ;;  %v1142_v18 = vpop.xlane.xlu0 %1141 }
 0x981   :  { %v1144_v20 = vmul.f32 %v1142_v18, %v3562_v10 }
 0x983   :  { %v1146_v1 = vsub.f32 %v3816_v8, %v1144_v20 }
 0x985   :  { %v1148_v21 = vmul.f32 %v1146_v1, %v1146_v1 }
 0x987   :  { %v1152_v22 = vsel %vm68_vm0, %v1148_v21, 0.0 }
 0x988   :  { %1153 = vadd.xlane.f32.xlu2 %v1152_v22 }
 0x9f3   :  { %v1151_v24 = vpop.xlane.xlu1 %1150 }
 0x9f4   :  { %v1155_v25 = vmul.f32 %v1151_v24, %v3562_v10 }
 0x9f6   :  { %v1157_v26 = vadd.f32 1e-05, %v1155_v25 }
 0x9f8   :  { %3387 = vrsqrt.f32 %v1157_v26  ;;  %vm1165_vm3 = vweird.f32 %v1157_v26 }
 0x9fb   :  { %v1154_v28 = vpop.xlane.xlu2 %1153 }
 0x9fc   :  { %v1156_v29 = vmul.f32 %v1154_v28, %v3562_v10 }
 0x9fe   :  { %v3388_v30 = vpop.eup %3387  ;;  %v1158_v32 = vadd.f32 1e-05, %v1156_v29 }
 0x9ff   :  { %v1160_v33 = vmul.f32 %v3388_v30, %v1157_v26  ;;  %vm1166_vm2 = vweird.f32 %v3388_v30 }
 0xa00   :  { %3389 = vrsqrt.f32 %v1158_v32  ;;  %vm1167_vm4 = vmor %vm1165_vm3, %vm1166_vm2  ;;  %vm1175_vm6 = vweird.f32 %v1158_v32 }
 0xa01   :  { %v1161_v34 = vmul.f32 %v3388_v30, %v1160_v33 }
 0xa03   :  { %v1162_v35 = vmul.f32 0.5, %v1161_v34 }
 0xa05   :  { %v1163_v37 = vsub.f32 1.5, %v1162_v35 }
 0xa06   :  { %v3390_v38 = vpop.eup %3389 }
 0xa07   :  { %v1164_v39 = vmul.f32 %v3388_v30, %v1163_v37  ;;  %v1170_v14 = vmul.f32 %v3390_v38, %v1158_v32  ;;  %vm1176_vm5 = vweird.f32 %v3390_v38 }
 0xa08   :  { %vm1177_vm7 = vmor %vm1175_vm6, %vm1176_vm5 }
 0xa09   :  { %v1171_v15 = vmul.f32 %v3390_v38, %v1170_v14  ;;  %v1168_v40 = vsel %vm1167_vm4, %v3388_v30, %v1164_v39 }
 0xa0a   :  { %v1179_v42 = vmul.f32 %v1168_v40, %v1145_v0 }
 0xa0b   :  { %v1172_v41 = vmul.f32 0.5, %v1171_v15  ;;  %v3327_v15 = vld [vmem:[%s4210_s11] ss:$0 sm:$0xff] }
 0xa0c   :  { %v1184_v46 = vmul.f32 %v3324_v19, %v1179_v42 }
 0xa0d   :  { %v1173_v16 = vsub.f32 1.5, %v1172_v41 }
 0xa0e   :  { %v1189_v49 = vadd.f32 %v3325_v45, %v1184_v46 }
 0xa0f   :  { %v1174_v43 = vmul.f32 %v3390_v38, %v1173_v16 }
 0xa11   :  { %v1178_v44 = vsel %vm1177_vm7, %v3390_v38, %v1174_v43 }
 0xa12   :  { %v1180_v47 = vmul.f32 %v1178_v44, %v1146_v1 }
 0xa14   :  { %v1185_v48 = vmul.f32 %v3324_v19, %v1180_v47 }
 0xa16   :  { %v1190_v50 = vadd.f32 %v3325_v45, %v1185_v48 }
 0xa18   :  { %v1191_v51 = vpack.c.bf16 %v1190_v50, %v1189_v49 }
 0xa1a   :  { %2928 = vmatmul.msk.bf16.vlgmr.msrb.gmra.mxu0 %vm68_vm0, %v1191_v51 }
 0xa97   :  { %v1224_v59 = vpop.f32.mrf.mxu0 }
 0xa98   :  { %v1225_v60 = vadd.f32 %v3326_v56, %v1224_v59  ;;  %v3278_v59 = vld [vmem:[%s4203_s4 + $0x118] sm:$0xff] }
 0xa99   :  { %1709 = vmatpush.bf16.msra.mxu1 %v3278_v59 }
 0xa9a   :  { %v2929_v62 = vmul.f32 -1.702, %v1225_v60 }
 0xa9c   :  { %v1233_v63 = vmul.f32 1.442695, %v2929_v62  ;;  %v3269_v62 = vld [vmem:[%s4203_s4 + $0xc0] sm:$0xff] }
 0xa9d   :  { %1447 = vmatpush.bf16.msrb.mxu2 %v3269_v62 }
 0xa9e   :  { %3391 = vpow2.f32 %v1233_v63  ;;  %v3271_v63 = vld [vmem:[%s4203_s4 + $0x100] sm:$0xff] }
 0xa9f   :  { %v1226_v3 = vpop.f32.mrf.mxu0  ;;  %1483 = vmatpush.bf16.msrb.mxu3 %v3271_v63 }
 0xaa0   :  { %v1227_v57 = vadd.f32 %v3326_v56, %v1226_v3  ;;  %v3274_v56 = vld [vmem:[%s4203_s4 + $0x148] sm:$0xff]  ;;  %v3277_v3 = vld [vmem:[%s4203_s4 + $0x110] sm:$0xff] }
 0xaa1   :  { %1518 = vmatpush.bf16.msra.mxu0 %v3274_v56  ;;  %1710 = vmatpush.bf16.msra.mxu1 %v3277_v3  ;;  %v3275_v56 = vld [vmem:[%s4203_s4 + $0xd0] sm:$0xff]  ;;  %v3334_v3 = vld [vmem:[%s4204_s5 + $0xd] ss:$0 sm:$0xff] }
 0xaa2   :  { %v2930_v6 = vmul.f32 -1.702, %v1227_v57 }
 0xaa4   :  { %v3392_v7 = vpop.eup %3391  ;;  %v1235_v9 = vmul.f32 1.442695, %v2930_v6 }
 0xaa5   :  { %v1237_v11 = vadd.f32 1.0, %v3392_v7  ;;  %1519 = vmatpush.bf16.msra.mxu0 %v3273_v2 }
 0xaa6   :  { %3393 = vpow2.f32 %v1235_v9 }
 0xaa7   :  { %3395 = vrcp.f32 %v1237_v11  ;;  %v1250_v23 = vand.u32 2147483648, %v1237_v11  ;;  %vm1244_vm11 = vweird.f32 %v1237_v11  ;;  %v1248_v24 = vand.u32 2147483647, %v1237_v11 }
 0xaa9   :  { %v1251_v30 = vor.u32 1.1754944e-38, %v1250_v23  ;;  %vm1249_vm14 = vcmp.eq.f32.partialorder %v1248_v24, 8.507059e+37  ;;  %v3328_v23 = vld [vmem:[%s4201_s2 + $0x2] ss:$0 sm:$0xff] }
 0xaac   :  { %v3394_v12 = vpop.eup %3393 }
 0xaad   :  { %v3396_v0 = vpop.eup %3395  ;;  %v1238_v13 = vadd.f32 1.0, %v3394_v12 }
 0xaae   :  { %v1240_v17 = vmul.f32 %v3396_v0, %v1237_v11  ;;  %vm1245_vm10 = vweird.f32 %v3396_v0 }
 0xaaf   :  { %3397 = vrcp.f32 %v1238_v13  ;;  %vm1246_vm12 = vmor %vm1244_vm11, %vm1245_vm10  ;;  %v1265_v26 = vand.u32 2147483648, %v1238_v13  ;;  %v1263_v29 = vand.u32 2147483647, %v1238_v13  ;;  %vm1259_vm15 = vweird.f32 %v1238_v13 }
 0xab0   :  { %v1241_v18 = vsub.f32 1.0, %v1240_v17 }
 0xab1   :  { %v1266_v34 = vor.u32 1.1754944e-38, %v1265_v26  ;;  %vm1264_vm2 = vcmp.eq.f32.partialorder %v1263_v29, 8.507059e+37 }
 0xab2   :  { %v1242_v20 = vmul.f32 %v3396_v0, %v1241_v18 }
 0xab4   :  { %v1243_v21 = vadd.f32 %v3396_v0, %v1242_v20 }
 0xab5   :  { %v3398_v1 = vpop.eup %3397 }
 0xab6   :  { %v1255_v22 = vmul.f32 %v3398_v1, %v1238_v13  ;;  %v1247_v27 = vsel %vm1246_vm12, %v3396_v0, %v1243_v21  ;;  %vm1260_vm13 = vweird.f32 %v3398_v1 }
 0xab7   :  { %v1252_v33 = vsel %vm1249_vm14, %v1251_v30, %v1247_v27  ;;  %vm1261_vm1 = vmor %vm1259_vm15, %vm1260_vm13  ;;  %v3329_v27 = vld [vmem:[%s4202_s3 + $0x2] ss:$0 sm:$0xff] }
 0xab8   :  { %v1256_v25 = vsub.f32 1.0, %v1255_v22  ;;  %v1269_v38 = vmul.f32 %v1252_v33, %v1225_v60 }
 0xaba   :  { %v1257_v28 = vmul.f32 %v3398_v1, %v1256_v25 }
 0xabc   :  { %v1258_v32 = vadd.f32 %v3398_v1, %v1257_v28 }
 0xabe   :  { %v1262_v35 = vsel %vm1261_vm1, %v3398_v1, %v1258_v32 }
 0xabf   :  { %v1267_v37 = vsel %vm1264_vm2, %v1266_v34, %v1262_v35  ;;  %v3330_v35 = vld [vmem:[%s4204_s5 + $0x14] ss:$0 sm:$0xff] }
 0xac0   :  { %v1270_v39 = vmul.f32 %v1267_v37, %v1227_v57 }
 0xac2   :  { %v1271_v14 = vpack.c.bf16 %v1270_v39, %v1269_v38  ;;  %v3333_v39 = vld [vmem:[%s4204_s5 + $0x10] ss:$0 sm:$0xff] }
 0xac4   :  { %1348 = vmatmul.bf16.vlgmr.msrb.gmra.mxu1 %v1271_v14 }
 0xb41   :  { %v1349_v40 = vpop.f32.mrf.mxu1 }
 0xb42   :  { %v1350_v41 = vadd.f32 %v3327_v15, %v1349_v40  ;;  %v3332_v40 = vld [vmem:[%s4204_s5 + $0xc] ss:$0 sm:$0xff] }
 0xb44   :  { %v3872_v16 = vadd.f32 %v1350_v41, %v3811_v4 }
 0xb46   :  { %v1360_v19 = vsel %vm68_vm0, %v3872_v16, 0.0 }
 0xb47   :  { %1361 = vadd.xlane.f32.xlu0 %v1360_v19 }
 0xb49   :  { %v1351_v42 = vpop.f32.mrf.mxu1 }
 0xb4a   :  { %v1352_v43 = vadd.f32 %v3327_v15, %v1351_v42 }
 0xb4c   :  { %v3877_v44 = vadd.f32 %v1352_v43, %v3816_v8 }
 0xb4e   :  { %v1363_v45 = vsel %vm68_vm0, %v3877_v44, 0.0 }
 0xb4f   :  { %1364 = vadd.xlane.f32.xlu1 %v1363_v45 }
 0xbba   :  { %v1362_v46 = vpop.xlane.xlu0 %1361 }
 0xbbb   :  { %v1366_v47 = vmul.f32 %v1362_v46, %v3562_v10  ;;  %v3331_v46 = vld [vmem:[%s4204_s5 + $0x11] ss:$0 sm:$0xff] }
 0xbbd   :  { %v1368_v48 = vsub.f32 %v3872_v16, %v1366_v47 }
 0xbbf   :  { %v1370_v4 = vmul.f32 %v1368_v48, %v1368_v48 }
 0xbc1   :  { %v1372_v49 = vsel %vm68_vm0, %v1370_v4, 0.0 }
 0xbc2   :  { %v1365_v50 = vpop.xlane.xlu1 %1364  ;;  %1373 = vadd.xlane.f32.xlu2 %v1372_v49 }
 0xbc3   :  { %v1367_v51 = vmul.f32 %v1365_v50, %v3562_v10 }
 0xbc5   :  { %v1369_v52 = vsub.f32 %v3877_v44, %v1367_v51 }
 0xbc7   :  { %v1371_v8 = vmul.f32 %v1369_v52, %v1369_v52 }
 0xbc9   :  { %v1375_v53 = vsel %vm68_vm0, %v1371_v8, 0.0 }
 0xbca   :  { %1376 = vadd.xlane.f32.xlu0 %v1375_v53 }
 0xc35   :  { %v1374_v58 = vpop.xlane.xlu2 %1373 }
 0xc36   :  { %v1378_v60 = vmul.f32 %v1374_v58, %v3562_v10 }
 0xc38   :  { %v1380_v61 = vadd.f32 1e-05, %v1378_v60 }
 0xc3a   :  { %3399 = vrsqrt.f32 %v1380_v61  ;;  %vm1388_vm4 = vweird.f32 %v1380_v61 }
 0xc3d   :  { %v1377_v57 = vpop.xlane.xlu0 %1376 }
 0xc3e   :  { %v1379_v5 = vmul.f32 %v1377_v57, %v3562_v10 }
 0xc40   :  { %v3400_v6 = vpop.eup %3399  ;;  %v1381_v7 = vadd.f32 1e-05, %v1379_v5 }
 0xc41   :  { %v1383_v9 = vmul.f32 %v3400_v6, %v1380_v61  ;;  %vm1389_vm3 = vweird.f32 %v3400_v6 }
 0xc42   :  { %3401 = vrsqrt.f32 %v1381_v7  ;;  %vm1390_vm5 = vmor %vm1388_vm4, %vm1389_vm3  ;;  %vm1398_vm7 = vweird.f32 %v1381_v7 }
 0xc43   :  { %v1384_v11 = vmul.f32 %v3400_v6, %v1383_v9 }
 0xc45   :  { %v1385_v12 = vmul.f32 0.5, %v1384_v11 }
 0xc47   :  { %v1386_v0 = vsub.f32 1.5, %v1385_v12 }
 0xc48   :  { %v3402_v13 = vpop.eup %3401 }
 0xc49   :  { %v1387_v17 = vmul.f32 %v3400_v6, %v1386_v0  ;;  %v1393_v18 = vmul.f32 %v3402_v13, %v1381_v7  ;;  %vm1399_vm6 = vweird.f32 %v3402_v13 }
 0xc4a   :  { %vm1400_vm10 = vmor %vm1398_vm7, %vm1399_vm6 }
 0xc4b   :  { %v1394_v20 = vmul.f32 %v3402_v13, %v1393_v18  ;;  %v1391_v1 = vsel %vm1390_vm5, %v3400_v6, %v1387_v17 }
 0xc4c   :  { %v1402_v24 = vmul.f32 %v1391_v1, %v1368_v48 }
 0xc4d   :  { %v1395_v21 = vmul.f32 0.5, %v1394_v20 }
 0xc4e   :  { %v1407_v28 = vmul.f32 %v3328_v23, %v1402_v24 }
 0xc4f   :  { %v1396_v22 = vsub.f32 1.5, %v1395_v21 }
 0xc50   :  { %v1412_v32 = vadd.f32 %v3329_v27, %v1407_v28 }
 0xc51   :  { %v1397_v25 = vmul.f32 %v3402_v13, %v1396_v22 }
 0xc53   :  { %v1401_v26 = vsel %vm1400_vm10, %v3402_v13, %v1397_v25  ;;  %v3280_v25 = vld [vmem:[%s4203_s4 + $0x158] sm:$0xff] }
 0xc54   :  { %v1403_v29 = vmul.f32 %v1401_v26, %v1369_v52  ;;  %v3276_v52 = vld [vmem:[%s4203_s4 + $0xd8] sm:$0xff]  ;;  %v3279_v26 = vld [vmem:[%s4203_s4 + $0x150] sm:$0xff] }
 0xc56   :  { %v1408_v30 = vmul.f32 %v3328_v23, %v1403_v29 }
 0xc58   :  { %v1413_v33 = vadd.f32 %v3329_v27, %v1408_v30 }
 0xc5a   :  { %v3919_v34 = vpack.c.bf16 %v1413_v33, %v1412_v32 }
 0xc5c   :  { %2978 = vmatmul.msk.bf16.vlgmr.msrb.gmra.mxu2 %vm68_vm0, %v3919_v34  ;;  %2992 = vmatmul.msk.bf16.vlgmr.msrb.gmra.mxu3 %vm68_vm0, %v3919_v34 }
 0xc5d   :  { %3006 = vmatmul.msk.bf16.vlgmr.msra.gmra.mxu0 %vm68_vm0, %v3919_v34  ;;  %3041 = vmatmul.msk.bf16.vlgmr.msra.gmra.mxu1 %vm68_vm0, %v3919_v34 }
 0xcda   :  { %v1521_v37 = vpop.f32.mrf.mxu0  ;;  %v1712_v43 = vpop.f32.mrf.mxu1 }
 0xcdb   :  { %v1522_v38 = vadd.f32 %v3330_v35, %v1521_v37  ;;  %v1713_v49 = vadd.f32 %v3331_v46, %v1712_v43 }
 0xcdd   :  { %v1602_v14 = vpack.c.bf16 %v1522_v38, %v1522_v38 }
 0xcdf   :  { %v1608_v15 = vsel %vm322_vm9, %v1602_v14, 0  ;;  %v1449_v41 = vpop.f32.mrf.mxu2  ;;  %v1485_v19 = vpop.f32.mrf.mxu3 }
 0xce0   :  { %v1486_v42 = vadd.f32 %v3333_v39, %v1485_v19  ;;  %1617 = vmatpush.bf16.msrb.mxu0 %v1608_v15  ;;  %v1450_v47 = vadd.f32 %v3332_v40, %v1449_v41  ;;  %v3013_v41 = vld [vmem:[%s4205_s6 + $0x10] sm:$0xf] }
 0xce1   :  { %v1896_v19 = vsel %vm322_vm9, %v3013_v41, 0 }
 0xce2   :  { %v1523_v45 = vpop.f32.mrf.mxu0  ;;  %3007 = vmatpush.xpose.msk.msra.mxu2 %vm240_vm8, %v1486_v42  ;;  %v1714_v54 = vpop.f32.mrf.mxu1 }
 0xce3   :  { %v1524_v48 = vadd.f32 %v3330_v35, %v1523_v45  ;;  %v1715_v58 = vadd.f32 %v3331_v46, %v1714_v54  ;;  %v3335_v45 = vld [vmem:[%s4204_s5 + $0x15] ss:$0 sm:$0xff] }
 0xce4   :  { %1745 = vmatpush.bf16.msra.mxu0 %v3280_v25  ;;  %v3062_v25 = vld [vmem:[%s4205_s6 + $0x14] sm:$0xf] }
 0xce5   :  { %v1603_v4 = vpack.c.bf16 %v1524_v48, %v1524_v48  ;;  %3008 = vmatmul.msk.f32.vlgmr.msra.gmra.mxu2 %vm240_vm8, %v1450_v47 }
 0xce7   :  { %v1627_v50 = vsel %vm322_vm9, %v1603_v4, 0  ;;  %v1487_v51 = vpop.f32.mrf.mxu3  ;;  %v1451_v8 = vpop.f32.mrf.mxu2 }
 0xce8   :  { %v1488_v53 = vadd.f32 %v3333_v39, %v1487_v51  ;;  %1636 = vmatpush.bf16.msrb.mxu2 %v1627_v50  ;;  %v1452_v55 = vadd.f32 %v3332_v40, %v1451_v8  ;;  %1746 = vmatpush.bf16.msra.mxu0 %v3279_v26  ;;  %v1876_v26 = vsel %vm322_vm9, %v3062_v25, 0 }
 0xcea   :  { %3009 = vmatpush.xpose.msk.msra.mxu3 %vm240_vm8, %v1488_v53 }
 0xcec   :  { %3056 = vmatpush.xpose.msk.msra.mxu2 %vm240_vm8, %v1713_v49 }
 0xced   :  { %3010 = vmatmul.msk.f32.vlgmr.msra.gmra.mxu3 %vm240_vm8, %v1452_v55  ;;  %v3284_v55 = vld [vmem:[%s4203_s4 + $0x128] sm:$0xff] }
 0xcee   :  { %1673 = vmatpush.bf16.msrb.mxu3 %v3276_v52 }
 0xcf2   :  { %1674 = vmatpush.bf16.msrb.mxu3 %v3275_v56 }
 0xcf5   :  { %3027 = vmatmul.msk.bf16.vlgmr.msrb.gmra.mxu3 %vm68_vm0, %v3919_v34 }
 0xcf6   :  { %3058 = vmatpush.xpose.msk.msra.mxu3 %vm240_vm8, %v1715_v58 }
 0xcfa   :  { %1885 = vmatpush.bf16.msrb.mxu3 %v1876_v26 }
 0xd68   :  { %v1549_v59 = vpop.f32.mrf.mxu2 }
 0xd69   :  { %v1550_v60 = vadd.f32 %v1549_v59, %v3646_v31 }
 0xd6b   :  { %v1578_v61 = vsel %vm240_vm8, %v1550_v60, -inf }
 0xd6c   :  { %1579 = vmax.xlane.f32.xlu0 %v1578_v61 }
 0xd70   :  { %v1575_v62 = vpop.f32.mrf.mxu3 }
 0xd71   :  { %v1576_v63 = vadd.f32 %v1575_v62, %v3653_v36 }
 0xd73   :  { %v1581_v2 = vsel %vm240_vm8, %v1576_v63, -inf }
 0xd74   :  { %1582 = vmax.xlane.f32.xlu1 %v1581_v2 }
 0xd78   :  { %v1676_v57 = vpop.f32.mrf.mxu3 }
 0xd79   :  { %v1677_v5 = vadd.f32 %v3334_v3, %v1676_v57 }
 0xd80   :  { %v1678_v6 = vpop.f32.mrf.mxu3 }
 0xd81   :  { %v1679_v7 = vadd.f32 %v3334_v3, %v1678_v6 }
 0xd83   :  { %3059 = vmatmul.msk.f32.vlgmr.msra.gmra.mxu3 %vm240_vm8, %v1679_v7 }
 0xddf   :  { %v1580_v9 = vpop.xlane.xlu0 %1579 }
 0xde0   :  { %v1584_v11 = vsub.f32 %v1550_v60, %v1580_v9 }
 0xde2   :  { %v1586_v12 = vmul.f32 1.442695, %v1584_v11 }
 0xde4   :  { %3403 = vpow2.f32 %v1586_v12  ;;  %v3336_v12 = vld [vmem:[%s4204_s5 + $0x12] ss:$0 sm:$0xff] }
 0xde7   :  { %v1583_v0 = vpop.xlane.xlu1 %1582 }
 0xde8   :  { %v1585_v13 = vsub.f32 %v1576_v63, %v1583_v0  ;;  %v3283_v63 = vld [vmem:[%s4203_s4 + $0x120] sm:$0xff] }
 0xdea   :  { %v3404_v17 = vpop.eup %3403  ;;  %v1588_v18 = vmul.f32 1.442695, %v1585_v13 }
 0xdeb   :  { %v1590_v20 = vsel %vm240_vm8, %v3404_v17, 0.0 }
 0xdec   :  { %3405 = vpow2.f32 %v1588_v18  ;;  %1591 = vadd.xlane.f32.xlu1 %v1590_v20  ;;  %v3282_v20 = vld [vmem:[%s4203_s4 + $0xe8] sm:$0xff] }
 0xdf2   :  { %v3406_v1 = vpop.eup %3405 }
 0xdf3   :  { %v1593_v21 = vsel %vm240_vm8, %v3406_v1, 0.0 }
 0xdf4   :  { %1594 = vadd.xlane.f32.xlu2 %v1593_v21 }
 0xe06   :  { %v1802_v22 = vpop.f32.mrf.mxu3 }
 0xe07   :  { %v1803_v23 = vadd.f32 %v1802_v22, %v3653_v36 }
 0xe09   :  { %v1808_v24 = vsel %vm240_vm8, %v1803_v23, -inf }
 0xe0a   :  { %1809 = vmax.xlane.f32.xlu2 %v1808_v24 }
 0xe5f   :  { %v1592_v27 = vpop.xlane.xlu1 %1591 }
 0xe60   :  { %3407 = vrcp.f32 %v1592_v27  ;;  %v3286_v27 = vld [vmem:[%s4203_s4 + $0x168] sm:$0xff] }
 0xe61   :  { %2012 = vmatpush.bf16.msra.mxu3 %v3286_v27  ;;  %v3340_v27 = vld [vmem:[%s4204_s5 + $0x13] ss:$0 sm:$0xff] }
 0xe66   :  { %v3408_v28 = vpop.eup %3407 }
 0xe67   :  { %v1598_v29 = vmul.f32 %v3408_v28, %v3404_v17  ;;  %v1595_v30 = vpop.xlane.xlu2 %1594  ;;  %v3285_v28 = vld [vmem:[%s4203_s4 + $0x160] sm:$0xff] }
 0xe68   :  { %3409 = vrcp.f32 %v1595_v30  ;;  %2013 = vmatpush.bf16.msra.mxu3 %v3285_v28 }
 0xe69   :  { %v1600_v32 = vpack.c.bf16 %v1598_v29, %v1598_v29 }
 0xe6b   :  { %3011 = vmatmul.msk.bf16.vlgmr.msrb.gmra.mxu0 %vm240_vm8, %v1600_v32 }
 0xe6c   :  { %1905 = vmatpush.bf16.msrb.mxu0 %v1896_v19 }
 0xe6e   :  { %v3410_v33 = vpop.eup %3409 }
 0xe6f   :  { %v1599_v35 = vmul.f32 %v3410_v33, %v3406_v1  ;;  %v3281_v1 = vld [vmem:[%s4203_s4 + $0xe0] sm:$0xff]  ;;  %v3337_v33 = vld [vmem:[%s4204_s5 + $0xe] ss:$0 sm:$0xff] }
 0xe71   :  { %v1601_v37 = vpack.c.bf16 %v1599_v35, %v1599_v35 }
 0xe73   :  { %3012 = vmatmul.msk.bf16.vlgmr.msrb.gmra.mxu2 %vm240_vm8, %v1601_v37  ;;  %v3288_v37 = vld [vmem:[%s4203_s4 + $0xf8] sm:$0xff] }
 0xe7b   :  { %3055 = vmatmul.msk.bf16.vlgmr.msra.gmra.mxu0 %vm68_vm0, %v3919_v34 }
 0xe7d   :  { %v1810_v38 = vpop.xlane.xlu2 %1809 }
 0xe7e   :  { %v1812_v39 = vsub.f32 %v1803_v23, %v1810_v38 }
 0xe80   :  { %v1815_v14 = vmul.f32 1.442695, %v1812_v39  ;;  %v3287_v39 = vld [vmem:[%s4203_s4 + $0xf0] sm:$0xff] }
 0xe82   :  { %3411 = vpow2.f32 %v1815_v14 }
 0xe83   :  { %3057 = vmatmul.msk.f32.vlgmr.msra.gmra.mxu2 %vm240_vm8, %v1677_v5 }
 0xe88   :  { %v3412_v15 = vpop.eup %3411 }
 0xe89   :  { %v1820_v40 = vsel %vm240_vm8, %v3412_v15, 0.0 }
 0xe8a   :  { %1821 = vadd.xlane.f32.xlu1 %v1820_v40 }
 0xee8   :  { %v1619_v42 = vpop.f32.mrf.mxu0 }
 0xef0   :  { %v1621_v43 = vpop.f32.mrf.mxu0 }
 0xef6   :  { %v1638_v46 = vpop.f32.mrf.mxu2 }
 0xef7   :  { %v1642_v47 = vpack.c.bf16 %v1638_v46, %v1619_v42 }
 0xef8   :  { %v1748_v48 = vpop.f32.mrf.mxu0 }
 0xef9   :  { %v1749_v4 = vadd.f32 %v3335_v45, %v1748_v48  ;;  %3064 = vmatmul.msk.bf16.vlgmr.msrb.gmra.mxu0 %vm240_vm8, %v1642_v47  ;;  %v3338_v48 = vld [vmem:[%s4204_s5 + $0x16] ss:$0 sm:$0xff] }
 0xefb   :  { %v1829_v49 = vpack.c.bf16 %v1749_v4, %v1749_v4 }
 0xefd   :  { %v1835_v50 = vsel %vm322_vm9, %v1829_v49, 0  ;;  %v1822_v51 = vpop.xlane.xlu1 %1821 }
 0xefe   :  { %3413 = vrcp.f32 %v1822_v51  ;;  %v1640_v52 = vpop.f32.mrf.mxu2  ;;  %1844 = vmatpush.bf16.msrb.mxu1 %v1835_v50 }
 0xf00   :  { %v1750_v8 = vpop.f32.mrf.mxu0 }
 0xf01   :  { %v1751_v53 = vadd.f32 %v3335_v45, %v1750_v8 }
 0xf02   :  { %1940 = vmatpush.bf16.msra.mxu1 %v3282_v20 }
 0xf03   :  { %v1830_v54 = vpack.c.bf16 %v1751_v53, %v1751_v53 }
 0xf04   :  { %v3414_v56 = vpop.eup %3413 }
 0xf05   :  { %v1826_v58 = vmul.f32 %v3414_v56, %v3412_v15  ;;  %v1854_v59 = vsel %vm322_vm9, %v1830_v54, 0 }
 0xf06   :  { %v1776_v60 = vpop.f32.mrf.mxu2  ;;  %1863 = vmatpush.bf16.msrb.mxu2 %v1854_v59  ;;  %1941 = vmatpush.bf16.msra.mxu1 %v3281_v1 }
 0xf07   :  { %v1828_v61 = vpack.c.bf16 %v1826_v58, %v1826_v58  ;;  %v1777_v62 = vadd.f32 %v1776_v60, %v3646_v31 }
 0xf09   :  { %3061 = vmatmul.msk.bf16.vlgmr.msrb.gmra.mxu2 %vm240_vm8, %v1828_v61  ;;  %v1805_v2 = vsel %vm240_vm8, %v1777_v62, -inf }
 0xf0a   :  { %1976 = vmatpush.bf16.msra.mxu2 %v3284_v55  ;;  %1806 = vmax.xlane.f32.xlu0 %v1805_v2 }
 0xf0e   :  { %1977 = vmatpush.bf16.msra.mxu2 %v3283_v63 }
 0xf19   :  { %3092 = vmatmul.msk.bf16.vlgmr.msra.gmra.mxu2 %vm68_vm0, %v3919_v34 }
 0xf76   :  { %v4043_v40 = vpop.f32.mrf.mxu0 }
 0xf7d   :  { %v1807_v3 = vpop.xlane.xlu0 %1806 }
 0xf7e   :  { %v1811_v57 = vsub.f32 %v1777_v62, %v1807_v3  ;;  %v1909_v19 = vpop.f32.mrf.mxu0 }
 0xf80   :  { %v1813_v5 = vmul.f32 1.442695, %v1811_v57 }
 0xf82   :  { %3415 = vpow2.f32 %v1813_v5 }
 0xf88   :  { %v3416_v6 = vpop.eup %3415 }
 0xf89   :  { %v1817_v7 = vsel %vm240_vm8, %v3416_v6, 0.0 }
 0xf8a   :  { %1818 = vadd.xlane.f32.xlu2 %v1817_v7  ;;  %v3290_v7 = vld [vmem:[%s4203_s4 + $0x138] sm:$0xff] }
 0xf8c   :  { %v1865_v9 = vpop.f32.mrf.mxu2 }
 0xf94   :  { %v1867_v11 = vpop.f32.mrf.mxu2 }
 0xf95   :  { %v3292_v11 = vld [vmem:[%s4203_s4 + $0x178] sm:$0xff] }
 0xf9c   :  { %v1979_v0 = vpop.f32.mrf.mxu2 }
 0xf9d   :  { %v1980_v13 = vadd.f32 %v3336_v12, %v1979_v0 }
 0xf9f   :  { %3107 = vmatpush.xpose.msk.msra.mxu0 %vm240_vm8, %v1980_v13 }
 0xfa4   :  { %v1981_v17 = vpop.f32.mrf.mxu2 }
 0xfa5   :  { %v1982_v18 = vadd.f32 %v3336_v12, %v1981_v17  ;;  %v3291_v12 = vld [vmem:[%s4203_s4 + $0x170] sm:$0xff] }
 0xfa7   :  { %3109 = vmatpush.xpose.msk.msrb.mxu0 %vm240_vm8, %v1982_v18 }
 0xffd   :  { %v1819_v21 = vpop.xlane.xlu2 %1818 }
 0xffe   :  { %3417 = vrcp.f32 %v1819_v21 }
0x1004   :  { %v3418_v22 = vpop.eup %3417 }
0x1005   :  { %v1825_v23 = vmul.f32 %v3418_v22, %v3416_v6 }
0x1007   :  { %v1827_v24 = vpack.c.bf16 %v1825_v23, %v1825_v23  ;;  %v3113_v23 = vld [vmem:[%s4205_s6 + $0x18] sm:$0xf] }
0x1009   :  { %3060 = vmatmul.msk.bf16.vlgmr.msrb.gmra.mxu1 %vm240_vm8, %v1827_v24  ;;  %v2143_v24 = vsel %vm322_vm9, %v3113_v23, 0 }
0x1019   :  { %3078 = vmatmul.msk.bf16.vlgmr.msra.gmra.mxu1 %vm68_vm0, %v3919_v34 }
0x1086   :  { %v1846_v29 = vpop.f32.mrf.mxu1 }
0x1087   :  { %v1869_v30 = vpack.c.bf16 %v1865_v9, %v1846_v29  ;;  %v3289_v9 = vld [vmem:[%s4203_s4 + $0x130] sm:$0xff] }
0x1089   :  { %3063 = vmatmul.msk.bf16.vlgmr.msrb.gmra.mxu3 %vm240_vm8, %v1869_v30 }
0x108a   :  { %2152 = vmatpush.bf16.msrb.mxu3 %v2143_v24 }
0x108e   :  { %v1848_v32 = vpop.f32.mrf.mxu1 }
0x1096   :  { %v1943_v35 = vpop.f32.mrf.mxu1 }
0x1097   :  { %v1944_v38 = vadd.f32 %v3337_v33, %v1943_v35 }
0x1099   :  { %3106 = vmatmul.msk.bf16.vlgmr.msra.gmra.mxu3 %vm68_vm0, %v3919_v34  ;;  %3108 = vmatmul.msk.f32.vlgmr.msra.gmra.mxu0 %vm240_vm8, %v1944_v38 }
0x109a   :  { %2189 = vmatpush.bf16.msra.mxu0 %v3288_v37 }
0x109e   :  { %v1945_v14 = vpop.f32.mrf.mxu1  ;;  %2190 = vmatpush.bf16.msra.mxu0 %v3287_v39  ;;  %v3339_v39 = vld [vmem:[%s4204_s5 + $0xf] ss:$0 sm:$0xff] }
0x109f   :  { %v1946_v15 = vadd.f32 %v3337_v33, %v1945_v14  ;;  %v3341_v14 = vld [vmem:[%s4204_s5 + $0x17] ss:$0 sm:$0xff] }
0x10a1   :  { %3110 = vmatmul.msk.f32.vlgmr.msrb.gmra.mxu0 %vm240_vm8, %v1946_v15 }
0x10a9   :  { %3128 = vmatmul.msk.bf16.vlgmr.msra.gmra.mxu0 %vm68_vm0, %v3919_v34 }
0x110c   :  { %v4045_v41 = vpop.f32.mrf.mxu3 }
0x1114   :  { %v1889_v42 = vpop.f32.mrf.mxu3 }
0x1115   :  { %v4047_v43 = vadd.f32 %v1909_v19, %v1889_v42 }
0x1116   :  { %v2043_v45 = vpop.f32.mrf.mxu0 }
0x1117   :  { %v2044_v46 = vadd.f32 %v2043_v45, %v3646_v31 }
0x1119   :  { %v2072_v47 = vsel %vm240_vm8, %v2044_v46, -inf }
0x111a   :  { %2073 = vmax.xlane.f32.xlu1 %v2072_v47 }
0x111c   :  { %v2015_v4 = vpop.f32.mrf.mxu3 }
0x111d   :  { %v2016_v49 = vadd.f32 %v3338_v48, %v2015_v4 }
0x111e   :  { %v2069_v50 = vpop.f32.mrf.mxu0 }
0x111f   :  { %v2096_v51 = vpack.c.bf16 %v2016_v49, %v2016_v49  ;;  %v2070_v52 = vadd.f32 %v2069_v50, %v3653_v36 }
0x1121   :  { %v2102_v8 = vsel %vm322_vm9, %v2096_v51, 0  ;;  %v2075_v53 = vsel %vm240_vm8, %v2070_v52, -inf  ;;  %v1908_v51 = vadd.f32 %v4043_v40, %v4045_v41 }
0x1122   :  { %2111 = vmatpush.bf16.msrb.mxu1 %v2102_v8  ;;  %2076 = vmax.xlane.f32.xlu0 %v2075_v53 }
0x1124   :  { %v2017_v54 = vpop.f32.mrf.mxu3 }
0x1125   :  { %v2018_v55 = vadd.f32 %v3338_v48, %v2017_v54 }
0x1126   :  { %2225 = vmatpush.bf16.msra.mxu1 %v3290_v7  ;;  %v2192_v29 = vpop.f32.mrf.mxu0 }
0x1127   :  { %v2097_v56 = vpack.c.bf16 %v2018_v55, %v2018_v55  ;;  %v2193_v42 = vadd.f32 %v3339_v39, %v2192_v29 }
0x1129   :  { %v2121_v58 = vsel %vm322_vm9, %v2097_v56, 0 }
0x112a   :  { %2130 = vmatpush.bf16.msrb.mxu2 %v2121_v58  ;;  %2226 = vmatpush.bf16.msra.mxu1 %v3289_v9 }
0x112e   :  { %2261 = vmatpush.bf16.msra.mxu2 %v3292_v11  ;;  %v2194_v37 = vpop.f32.mrf.mxu0 }
0x112f   :  { %v2195_v15 = vadd.f32 %v3339_v39, %v2194_v37 }
0x1132   :  { %2262 = vmatpush.bf16.msra.mxu2 %v3291_v12 }
0x118d   :  { %v2074_v59 = vpop.xlane.xlu1 %2073 }
0x118e   :  { %v2078_v60 = vsub.f32 %v2044_v46, %v2074_v59 }
0x1190   :  { %v2080_v61 = vmul.f32 1.442695, %v2078_v60 }
0x1192   :  { %3419 = vpow2.f32 %v2080_v61 }
0x1195   :  { %v2077_v62 = vpop.xlane.xlu0 %2076 }
0x1196   :  { %v2079_v63 = vsub.f32 %v2070_v52, %v2077_v62 }
0x1198   :  { %v3420_v2 = vpop.eup %3419  ;;  %v2082_v3 = vmul.f32 1.442695, %v2079_v63 }
0x1199   :  { %v2084_v57 = vsel %vm240_vm8, %v3420_v2, 0.0 }
0x119a   :  { %3421 = vpow2.f32 %v2082_v3  ;;  %2085 = vadd.xlane.f32.xlu0 %v2084_v57 }
0x11a0   :  { %v3422_v5 = vpop.eup %3421 }
0x11a1   :  { %v2087_v6 = vsel %vm240_vm8, %v3422_v5, 0.0 }
0x11a2   :  { %2088 = vadd.xlane.f32.xlu2 %v2087_v6 }
0x120d   :  { %v2086_v0 = vpop.xlane.xlu0 %2085 }
0x120e   :  { %3423 = vrcp.f32 %v2086_v0 }
0x1214   :  { %v3424_v13 = vpop.eup %3423 }
0x1215   :  { %v2092_v17 = vmul.f32 %v3424_v13, %v3420_v2  ;;  %v2089_v18 = vpop.xlane.xlu2 %2088 }
0x1216   :  { %3425 = vrcp.f32 %v2089_v18 }
0x1217   :  { %v2094_v20 = vpack.c.bf16 %v2092_v17, %v2092_v17  ;;  %v3163_v17 = vld [vmem:[%s4205_s6 + $0x1c] sm:$0xf] }
0x1218   :  { %v2392_v18 = vsel %vm322_vm9, %v3163_v17, 0  ;;  %v3345_v17 = vld [vmem:[%s4208_s9 + $0x1] ss:$0 sm:$0xff] }
0x1219   :  { %3111 = vmatmul.msk.bf16.vlgmr.msrb.gmra.mxu1 %vm240_vm8, %v2094_v20 }
0x121a   :  { %2401 = vmatpush.bf16.msrb.mxu1 %v2392_v18  ;;  %v3298_v18 = vld [vmem:[%s4209_s10 + $0x58] sm:$0xff] }
0x121c   :  { %v3426_v1 = vpop.eup %3425 }
0x121d   :  { %v2093_v21 = vmul.f32 %v3426_v1, %v3422_v5 }
0x121f   :  { %v2095_v22 = vpack.c.bf16 %v2093_v21, %v2093_v21 }
0x1221   :  { %3112 = vmatmul.msk.bf16.vlgmr.msrb.gmra.mxu2 %vm240_vm8, %v2095_v22 }
0x1229   :  { %3142 = vmatmul.msk.bf16.vlgmr.msra.gmra.mxu1 %vm68_vm0, %v3919_v34 }
0x1231   :  { %3156 = vmatmul.msk.bf16.vlgmr.msra.gmra.mxu2 %vm68_vm0, %v3919_v34 }
0x1296   :  { %v2113_v25 = vpop.f32.mrf.mxu1 }
0x129e   :  { %v2115_v26 = vpop.f32.mrf.mxu1 }
0x129f   :  { %v3342_v26 = vld [vmem:[%s4206_s7 + $0x1] ss:$0 sm:$0xff] }
0x12a4   :  { %v2132_v28 = vpop.f32.mrf.mxu2 }
0x12a5   :  { %v2136_v30 = vpack.c.bf16 %v2132_v28, %v2113_v25 }
0x12a6   :  { %v2228_v32 = vpop.f32.mrf.mxu1 }
0x12a7   :  { %v2229_v33 = vadd.f32 %v3340_v27, %v2228_v32  ;;  %3114 = vmatmul.msk.bf16.vlgmr.msrb.gmra.mxu3 %vm240_vm8, %v2136_v30 }
0x12a9   :  { %3157 = vmatpush.xpose.msk.msra.mxu3 %vm240_vm8, %v2229_v33 }
0x12ac   :  { %v2134_v34 = vpop.f32.mrf.mxu2 }
0x12ae   :  { %v2230_v35 = vpop.f32.mrf.mxu1 }
0x12af   :  { %v2231_v38 = vadd.f32 %v3340_v27, %v2230_v35 }
0x12b1   :  { %3159 = vmatpush.xpose.msk.msrb.mxu0 %vm240_vm8, %v2231_v38 }
0x12b4   :  { %v2264_v19 = vpop.f32.mrf.mxu2  ;;  %3160 = vmatmul.msk.f32.vlgmr.msrb.gmra.mxu0 %vm240_vm8, %v2195_v15 }
0x12b5   :  { %v2265_v45 = vadd.f32 %v3341_v14, %v2264_v19 }
0x12b7   :  { %v2345_v46 = vpack.c.bf16 %v2265_v45, %v2265_v45  ;;  %3158 = vmatmul.msk.f32.vlgmr.msra.gmra.mxu3 %vm240_vm8, %v2193_v42 }
0x12b9   :  { %v2351_v47 = vsel %vm322_vm9, %v2345_v46, 0  ;;  %v3294_v46 = vld [vmem:[%s4207_s8 + $0x18] sm:$0xff] }
0x12ba   :  { %2360 = vmatpush.bf16.msrb.mxu3 %v2351_v47  ;;  %2509 = vmatpush.bf16.msrb.mxu2 %v3294_v46 }
0x12bc   :  { %v2266_v48 = vpop.f32.mrf.mxu2 }
0x12bd   :  { %v2267_v4 = vadd.f32 %v3341_v14, %v2266_v48 }
0x12bf   :  { %v2346_v49 = vpack.c.bf16 %v2267_v4, %v2267_v4 }
0x12c1   :  { %v2370_v50 = vsel %vm322_vm9, %v2346_v49, 0  ;;  %v3293_v49 = vld [vmem:[%s4207_s8 + $0x10] sm:$0xff] }
0x12c2   :  { %2379 = vmatpush.bf16.msra.mxu0 %v2370_v50  ;;  %2510 = vmatpush.bf16.msrb.mxu2 %v3293_v49 }
0x132a   :  { %v2154_v52 = vpop.f32.mrf.mxu3 }
0x132b   :  { %v2159_v8 = vadd.f32 %v2154_v52, %v1908_v51 }
0x1331   :  { %v2318_v53 = vpop.f32.mrf.mxu0 }
0x1332   :  { %v2319_v54 = vadd.f32 %v2318_v53, %v3653_v36  ;;  %v2156_v55 = vpop.f32.mrf.mxu3 }
0x1333   :  { %v2160_v56 = vadd.f32 %v2156_v55, %v4047_v43 }
0x1334   :  { %v2324_v58 = vsel %vm240_vm8, %v2319_v54, -inf }
0x1335   :  { %2325 = vmax.xlane.f32.xlu2 %v2324_v58 }
0x133a   :  { %v2292_v59 = vpop.f32.mrf.mxu3 }
0x133b   :  { %v2293_v60 = vadd.f32 %v2292_v59, %v3646_v31 }
0x133d   :  { %v2321_v61 = vsel %vm240_vm8, %v2293_v60, -inf }
0x133e   :  { %2322 = vmax.xlane.f32.xlu1 %v2321_v61 }
0x13a8   :  { %v2326_v62 = vpop.xlane.xlu2 %2325 }
0x13a9   :  { %v2328_v63 = vsub.f32 %v2319_v54, %v2326_v62 }
0x13ab   :  { %v2331_v40 = vmul.f32 1.442695, %v2328_v63 }
0x13ad   :  { %3427 = vpow2.f32 %v2331_v40 }
0x13b1   :  { %v2323_v41 = vpop.xlane.xlu1 %2322 }
0x13b2   :  { %v2327_v2 = vsub.f32 %v2293_v60, %v2323_v41  ;;  %v3343_v41 = vld [vmem:[%s4201_s2 + $0x3] ss:$0 sm:$0xff] }
0x13b3   :  { %v3428_v3 = vpop.eup %3427 }
0x13b4   :  { %v2329_v36 = vmul.f32 1.442695, %v2327_v2  ;;  %v2336_v57 = vsel %vm240_vm8, %v3428_v3, 0.0 }
0x13b5   :  { %2337 = vadd.xlane.f32.xlu1 %v2336_v57  ;;  %v3344_v57 = vld [vmem:[%s4202_s3 + $0x3] ss:$0 sm:$0xff] }
0x13b6   :  { %3429 = vpow2.f32 %v2329_v36 }
0x13bc   :  { %v3430_v43 = vpop.eup %3429 }
0x13bd   :  { %v2333_v5 = vsel %vm240_vm8, %v3430_v43, 0.0 }
0x13be   :  { %2334 = vadd.xlane.f32.xlu0 %v2333_v5 }
0x1428   :  { %v2338_v31 = vpop.xlane.xlu1 %2337 }
0x1429   :  { %3431 = vrcp.f32 %v2338_v31 }
0x142f   :  { %v3432_v6 = vpop.eup %3431 }
0x1430   :  { %v2342_v7 = vmul.f32 %v3432_v6, %v3428_v3 }
0x1431   :  { %v2335_v9 = vpop.xlane.xlu0 %2334 }
0x1432   :  { %v2344_v11 = vpack.c.bf16 %v2342_v7, %v2342_v7  ;;  %3433 = vrcp.f32 %v2335_v9 }
0x1434   :  { %3162 = vmatmul.msk.bf16.vlgmr.msra.gmra.mxu0 %vm240_vm8, %v2344_v11  ;;  %v3302_v11 = vld [vmem:[%s4209_s10 + $0x78] sm:$0xff] }
0x1435   :  { %2630 = vmatpush.bf16.msra.mxu3 %v3302_v11 }
0x1438   :  { %v3434_v12 = vpop.eup %3433 }
0x1439   :  { %v2341_v0 = vmul.f32 %v3434_v12, %v3430_v43  ;;  %v3301_v12 = vld [vmem:[%s4209_s10 + $0x70] sm:$0xff] }
0x143a   :  { %2631 = vmatpush.bf16.msra.mxu3 %v3301_v12 }
0x143b   :  { %v2343_v13 = vpack.c.bf16 %v2341_v0, %v2341_v0  ;;  %v3300_v0 = vld [vmem:[%s4209_s10 + $0x68] sm:$0xff] }
0x143d   :  { %3161 = vmatmul.msk.bf16.vlgmr.msrb.gmra.mxu3 %vm240_vm8, %v2343_v13  ;;  %v3299_v13 = vld [vmem:[%s4209_s10 + $0x60] sm:$0xff] }
0x143e   :  { %2632 = vmatpush.bf16.msra.mxu3 %v3300_v0 }
0x1442   :  { %2633 = vmatpush.bf16.msra.mxu3 %v3299_v13 }
0x1446   :  { %2634 = vmatpush.bf16.msra.mxu3 %v3298_v18 }
0x14b1   :  { %v2381_v20 = vpop.f32.mrf.mxu0 }
0x14b9   :  { %v2383_v1 = vpop.f32.mrf.mxu0 }
0x14c0   :  { %v2362_v21 = vpop.f32.mrf.mxu3 }
0x14c1   :  { %v2385_v22 = vpack.c.bf16 %v2381_v20, %v2362_v21  ;;  %v3297_v21 = vld [vmem:[%s4209_s10 + $0x50] sm:$0xff] }
0x14c2   :  { %2635 = vmatpush.bf16.msra.mxu3 %v3297_v21 }
0x14c3   :  { %3164 = vmatmul.msk.bf16.vlgmr.msrb.gmra.mxu1 %vm240_vm8, %v2385_v22 }
0x14c8   :  { %v2364_v23 = vpop.f32.mrf.mxu3 }
0x1540   :  { %v2403_v24 = vpop.f32.mrf.mxu1 }
0x1541   :  { %v2408_v25 = vadd.f32 %v2403_v24, %v2159_v8  ;;  %v3296_v24 = vld [vmem:[%s4209_s10 + $0x48] sm:$0xff] }
0x1542   :  { %2636 = vmatpush.bf16.msra.mxu3 %v3296_v24 }
0x1543   :  { %v2410_v27 = vadd.f32 %v2408_v25, %v3872_v16 }
0x1545   :  { %v4118_v28 = vadd.f32 %v3342_v26, %v2410_v27  ;;  %v3295_v27 = vld [vmem:[%s4209_s10 + $0x40] sm:$0xff] }
0x1546   :  { %2637 = vmatpush.bf16.msra.mxu3 %v3295_v27  ;;  %v3347_v27 = vld [vmem:[%s4201_s2 + $0x4] ss:$0 sm:$0xff]  ;;  %s3480_s2 = smov [#allocation2]  }
0x1547   :  { %v2423_v29 = vsel %vm68_vm0, %v4118_v28, 0.0  ;;  %s2710_s8 = sshll.u32 %s3480_s2, 4  ;;  %s2711_s8 = int_to_ptr.vmem [resolvable:$true] %s2710_s8 }
0x1548   :  { %2424 = vadd.xlane.f32.xlu2 %v2423_v29  ;;  %v2405_v30 = vpop.f32.mrf.mxu1 }
0x1549   :  { %v2409_v32 = vadd.f32 %v2405_v30, %v2160_v56 }
0x154b   :  { %v2411_v33 = vadd.f32 %v2409_v32, %v3877_v44 }
0x154d   :  { %v4123_v34 = vadd.f32 %v3342_v26, %v2411_v33 }
0x154f   :  { %v2426_v35 = vsel %vm68_vm0, %v4123_v34, 0.0 }
0x1550   :  { %2427 = vadd.xlane.f32.xlu0 %v2426_v35 }
0x15bb   :  { %v2425_v37 = vpop.xlane.xlu2 %2424 }
0x15bc   :  { %v2429_v38 = vmul.f32 %v2425_v37, %v3562_v10 }
0x15be   :  { %v2431_v16 = vsub.f32 %v4118_v28, %v2429_v38 }
0x15c0   :  { %v2433_v39 = vmul.f32 %v2431_v16, %v2431_v16 }
0x15c2   :  { %v2435_v14 = vsel %vm68_vm0, %v2433_v39, 0.0 }
0x15c3   :  { %2436 = vadd.xlane.f32.xlu1 %v2435_v14  ;;  %v2428_v15 = vpop.xlane.xlu0 %2427 }
0x15c4   :  { %v2430_v19 = vmul.f32 %v2428_v15, %v3562_v10 }
0x15c6   :  { %v2432_v44 = vsub.f32 %v4123_v34, %v2430_v19 }
0x15c8   :  { %v2434_v42 = vmul.f32 %v2432_v44, %v2432_v44 }
0x15ca   :  { %v2438_v45 = vsel %vm68_vm0, %v2434_v42, 0.0 }
0x15cb   :  { %2439 = vadd.xlane.f32.xlu2 %v2438_v45 }
0x1636   :  { %v2437_v47 = vpop.xlane.xlu1 %2436 }
0x1637   :  { %v2441_v48 = vmul.f32 %v2437_v47, %v3562_v10 }
0x1639   :  { %v2443_v4 = vadd.f32 1e-05, %v2441_v48 }
0x163b   :  { %3435 = vrsqrt.f32 %v2443_v4  ;;  %vm2451_vm9 = vweird.f32 %v2443_v4 }
0x163e   :  { %v2440_v50 = vpop.xlane.xlu2 %2439 }
0x163f   :  { %v2442_v51 = vmul.f32 %v2440_v50, %v3562_v10 }
0x1641   :  { %v3436_v52 = vpop.eup %3435  ;;  %v2444_v8 = vadd.f32 1e-05, %v2442_v51 }
0x1642   :  { %v2446_v53 = vmul.f32 %v3436_v52, %v2443_v4  ;;  %vm2452_vm8 = vweird.f32 %v3436_v52 }
0x1643   :  { %3437 = vrsqrt.f32 %v2444_v8  ;;  %vm2453_vm11 = vmor %vm2451_vm9, %vm2452_vm8  ;;  %vm2461_vm13 = vweird.f32 %v2444_v8 }
0x1644   :  { %v2447_v54 = vmul.f32 %v3436_v52, %v2446_v53 }
0x1646   :  { %v2448_v55 = vmul.f32 0.5, %v2447_v54 }
0x1648   :  { %v2449_v56 = vsub.f32 1.5, %v2448_v55 }
0x1649   :  { %v3438_v58 = vpop.eup %3437 }
0x164a   :  { %v2450_v59 = vmul.f32 %v3436_v52, %v2449_v56  ;;  %v2456_v60 = vmul.f32 %v3438_v58, %v2444_v8  ;;  %vm2462_vm12 = vweird.f32 %v3438_v58 }
0x164b   :  { %vm2463_vm14 = vmor %vm2461_vm13, %vm2462_vm12 }
0x164c   :  { %v2457_v61 = vmul.f32 %v3438_v58, %v2456_v60  ;;  %v2454_v62 = vsel %vm2453_vm11, %v3436_v52, %v2450_v59  ;;  %v3346_v59 = vld [vmem:[%s4210_s11 + $0x1] ss:$0 sm:$0xff] }
0x164d   :  { %v2465_v2 = vmul.f32 %v2454_v62, %v2431_v16 }
0x164e   :  { %v2458_v63 = vmul.f32 0.5, %v2457_v61 }
0x164f   :  { %v2470_v43 = vmul.f32 %v3343_v41, %v2465_v2 }
0x1650   :  { %v2459_v40 = vsub.f32 1.5, %v2458_v63 }
0x1651   :  { %v2475_v6 = vadd.f32 %v3344_v57, %v2470_v43 }
0x1652   :  { %v2460_v3 = vmul.f32 %v3438_v58, %v2459_v40 }
0x1654   :  { %v2464_v36 = vsel %vm2463_vm14, %v3438_v58, %v2460_v3 }
0x1655   :  { %v2466_v5 = vmul.f32 %v2464_v36, %v2432_v44 }
0x1657   :  { %v2471_v31 = vmul.f32 %v3343_v41, %v2466_v5 }
0x1659   :  { %v2476_v7 = vadd.f32 %v3344_v57, %v2471_v31 }
0x165b   :  { %v2477_v9 = vpack.c.bf16 %v2476_v7, %v2475_v6 }
0x165d   :  { %3181 = vmatmul.msk.bf16.vlgmr.msrb.gmra.mxu2 %vm68_vm0, %v2477_v9 }
0x16e0   :  { %v2512_v20 = vpop.f32.mrf.mxu2 }
0x16e1   :  { %v2513_v1 = vadd.f32 %v3345_v17, %v2512_v20 }
0x16e3   :  { %v3182_v22 = vmul.f32 -1.702, %v2513_v1 }
0x16e5   :  { %v2521_v23 = vmul.f32 1.442695, %v3182_v22 }
0x16e7   :  { %3439 = vpow2.f32 %v2521_v23 }
0x16e8   :  { %v2514_v25 = vpop.f32.mrf.mxu2 }
0x16e9   :  { %v2515_v26 = vadd.f32 %v3345_v17, %v2514_v25 }
0x16eb   :  { %v3183_v29 = vmul.f32 -1.702, %v2515_v26 }
0x16ed   :  { %v3440_v30 = vpop.eup %3439  ;;  %v2523_v32 = vmul.f32 1.442695, %v3183_v29 }
0x16ee   :  { %v2525_v33 = vadd.f32 1.0, %v3440_v30 }
0x16ef   :  { %3441 = vpow2.f32 %v2523_v32  ;;  %v3348_v32 = vld [vmem:[%s4202_s3 + $0x4] ss:$0 sm:$0xff]  ;;  %s3481_s3 = smov 128  }
0x16f0   :  { %3443 = vrcp.f32 %v2525_v33  ;;  %v2538_v42 = vand.u32 2147483648, %v2525_v33  ;;  %vm2532_vm1 = vweird.f32 %v2525_v33  ;;  %v2536_v45 = vand.u32 2147483647, %v2525_v33 }
0x16f2   :  { %v2539_v50 = vor.u32 1.1754944e-38, %v2538_v42  ;;  %vm2537_vm4 = vcmp.eq.f32.partialorder %v2536_v45, 8.507059e+37 }
0x16f5   :  { %v3442_v35 = vpop.eup %3441 }
0x16f6   :  { %v3444_v37 = vpop.eup %3443  ;;  %v2526_v38 = vadd.f32 1.0, %v3442_v35 }
0x16f7   :  { %v2528_v16 = vmul.f32 %v3444_v37, %v2525_v33  ;;  %vm2533_vm15 = vweird.f32 %v3444_v37 }
0x16f8   :  { %3445 = vrcp.f32 %v2526_v38  ;;  %vm2534_vm2 = vmor %vm2532_vm1, %vm2533_vm15  ;;  %v2553_v47 = vand.u32 2147483648, %v2526_v38  ;;  %v2551_v49 = vand.u32 2147483647, %v2526_v38  ;;  %vm2547_vm5 = vweird.f32 %v2526_v38 }
0x16f9   :  { %v2529_v39 = vsub.f32 1.0, %v2528_v16 }
0x16fa   :  { %v2554_v8 = vor.u32 1.1754944e-38, %v2553_v47  ;;  %vm2552_vm7 = vcmp.eq.f32.partialorder %v2551_v49, 8.507059e+37 }
0x16fb   :  { %v2530_v14 = vmul.f32 %v3444_v37, %v2529_v39 }
0x16fd   :  { %v2531_v19 = vadd.f32 %v3444_v37, %v2530_v14 }
0x16fe   :  { %v3446_v15 = vpop.eup %3445 }
0x16ff   :  { %v2543_v44 = vmul.f32 %v3446_v15, %v2526_v38  ;;  %v2535_v48 = vsel %vm2534_vm2, %v3444_v37, %v2531_v19  ;;  %vm2548_vm3 = vweird.f32 %v3446_v15 }
0x1700   :  { %v2540_v52 = vsel %vm2537_vm4, %v2539_v50, %v2535_v48  ;;  %vm2549_vm6 = vmor %vm2547_vm5, %vm2548_vm3 }
0x1701   :  { %v2544_v46 = vsub.f32 1.0, %v2543_v44  ;;  %v2557_v55 = vmul.f32 %v2540_v52, %v2513_v1 }
0x1703   :  { %v2545_v4 = vmul.f32 %v3446_v15, %v2544_v46 }
0x1705   :  { %v2546_v51 = vadd.f32 %v3446_v15, %v2545_v4 }
0x1707   :  { %v2550_v53 = vsel %vm2549_vm6, %v3446_v15, %v2546_v51 }
0x1708   :  { %v2555_v54 = vsel %vm2552_vm7, %v2554_v8, %v2550_v53 }
0x1709   :  { %v2558_v56 = vmul.f32 %v2555_v54, %v2515_v26 }
0x170b   :  { %v2559_v58 = vpack.c.bf16 %v2558_v56, %v2557_v55 }
0x170d   :  { %2638 = vmatmul.bf16.vlgmr.msra.gmra.mxu3 %v2559_v58 }
0x1790   :  { %v2639_v60 = vpop.f32.mrf.mxu3 }
0x1791   :  { %v2640_v61 = vadd.f32 %v3346_v59, %v2639_v60 }
0x1793   :  { %v2644_v62 = vadd.f32 %v2640_v61, %v4118_v28 }
0x1795   :  { %v2650_v63 = vsel %vm68_vm0, %v2644_v62, 0.0 }
0x1796   :  { %2651 = vadd.xlane.f32.xlu0 %v2650_v63 }
0x1798   :  { %v2641_v40 = vpop.f32.mrf.mxu3 }
0x1799   :  { %v2642_v41 = vadd.f32 %v3346_v59, %v2641_v40 }
0x179b   :  { %v2645_v2 = vadd.f32 %v2642_v41, %v4123_v34 }
0x179d   :  { %v2653_v3 = vsel %vm68_vm0, %v2645_v2, 0.0 }
0x179e   :  { %2654 = vadd.xlane.f32.xlu1 %v2653_v3 }
0x1809   :  { %v2652_v36 = vpop.xlane.xlu0 %2651 }
0x180a   :  { %v2656_v57 = vmul.f32 %v2652_v36, %v3562_v10 }
0x180c   :  { %v2658_v43 = vsub.f32 %v2644_v62, %v2656_v57 }
0x180e   :  { %v2660_v5 = vmul.f32 %v2658_v43, %v2658_v43 }
0x1810   :  { %v2662_v31 = vsel %vm68_vm0, %v2660_v5, 0.0 }
0x1811   :  { %v2655_v6 = vpop.xlane.xlu1 %2654  ;;  %2663 = vadd.xlane.f32.xlu2 %v2662_v31 }
0x1812   :  { %v2657_v28 = vmul.f32 %v2655_v6, %v3562_v10 }
0x1814   :  { %v2659_v7 = vsub.f32 %v2645_v2, %v2657_v28 }
0x1816   :  { %v2661_v9 = vmul.f32 %v2659_v7, %v2659_v7 }
0x1818   :  { %v2665_v11 = vsel %vm68_vm0, %v2661_v9, 0.0 }
0x1819   :  { %2666 = vadd.xlane.f32.xlu0 %v2665_v11 }
0x1884   :  { %v2664_v34 = vpop.xlane.xlu2 %2663 }
0x1885   :  { %v2668_v12 = vmul.f32 %v2664_v34, %v3562_v10 }
0x1887   :  { %v2670_v0 = vadd.f32 1e-05, %v2668_v12 }
0x1889   :  { %3447 = vrsqrt.f32 %v2670_v0  ;;  %vm2678_vm8 = vweird.f32 %v2670_v0 }
0x188c   :  { %v2667_v13 = vpop.xlane.xlu0 %2666 }
0x188d   :  { %v2669_v17 = vmul.f32 %v2667_v13, %v3562_v10 }
0x188f   :  { %v3448_v18 = vpop.eup %3447  ;;  %v2671_v20 = vadd.f32 1e-05, %v2669_v17 }
0x1890   :  { %v2673_v1 = vmul.f32 %v3448_v18, %v2670_v0  ;;  %vm2679_vm10 = vweird.f32 %v3448_v18 }
0x1891   :  { %3449 = vrsqrt.f32 %v2671_v20  ;;  %vm2680_vm9 = vmor %vm2678_vm8, %vm2679_vm10  ;;  %vm2688_vm12 = vweird.f32 %v2671_v20 }
0x1892   :  { %v2674_v21 = vmul.f32 %v3448_v18, %v2673_v1 }
0x1894   :  { %v2675_v22 = vmul.f32 0.5, %v2674_v21 }
0x1896   :  { %v2676_v23 = vsub.f32 1.5, %v2675_v22 }
0x1897   :  { %v3450_v24 = vpop.eup %3449 }
0x1898   :  { %v2677_v25 = vmul.f32 %v3448_v18, %v2676_v23  ;;  %v2683_v26 = vmul.f32 %v3450_v24, %v2671_v20  ;;  %vm2689_vm11 = vweird.f32 %v3450_v24 }
0x1899   :  { %vm2690_vm13 = vmor %vm2688_vm12, %vm2689_vm11 }
0x189a   :  { %v2681_v29 = vsel %vm2680_vm9, %v3448_v18, %v2677_v25  ;;  %v2684_v30 = vmul.f32 %v3450_v24, %v2683_v26 }
0x189b   :  { %v2692_v10 = vmul.f32 %v2681_v29, %v2658_v43 }
0x189c   :  { %v2685_v33 = vmul.f32 0.5, %v2684_v30 }
0x189d   :  { %v2697_v35 = vmul.f32 %v3347_v27, %v2692_v10 }
0x189e   :  { %v2686_v37 = vsub.f32 1.5, %v2685_v33 }
0x189f   :  { %v2702_v38 = vadd.f32 %v3348_v32, %v2697_v35 }
0x18a0   :  { %v2687_v16 = vmul.f32 %v3450_v24, %v2686_v37 }
0x18a1   :  { %2704 = vst.msk [vmem:[#allocation2] sm:$0xff] %vm68_vm0, %v2702_v38 }
0x18a2   :  { %v2691_v39 = vsel %vm2690_vm13, %v3450_v24, %v2687_v16 }
0x18a3   :  { %v2693_v14 = vmul.f32 %v2691_v39, %v2659_v7 }
0x18a5   :  { %v2698_v15 = vmul.f32 %v3347_v27, %v2693_v14 }
0x18a7   :  { %v2703_v19 = vadd.f32 %v3348_v32, %v2698_v15 }
0x18a9   :  { %2705 = vst.msk [vmem:[#allocation2 + $0x8] sm:$0xff] %vm68_vm0, %v2703_v19 }
0x18aa   :  { %2718 = dma.vmem_to_hbm [thread:$0]  %s2711_s8, 256, %s2713_s29, [#allocation3], %s3481_s3, %s3481_s3, %s3482_s30  }
0x18ab   :  { %3475 = dma.done.wait [#allocation3], 256  }
0x18ac   :  { %3476 = vsyncadd [#allocation3], 4294967040 }
0x18ad   :  { %2723 = vsyncpa [#allocation3], 1 }

</bundles_post_ra>
